<compile_context>
chip_gen: v7x
topology: tpu7x:2x2x1
jax: 0.10.0
libtpu: 0.0.40
codegen_flags: <defaults>
</compile_context>

<pallas_src>
import functools

import jax
import jax.numpy as jnp
from jax.experimental import pallas as pl
from jax.experimental.pallas import tpu as pltpu

PARAM_ORDER_LN = ("w1", "b1", "w2", "b2", "w3", "b3", "g", "bt")
PARAM_ORDER_NO_LN = ("w1", "b1", "w2", "b2", "w3", "b3")

# ------------------------- in-kernel MLP helpers -----------------------------


def _layernorm(y, g, bt, eps=1e-5):
    mu = jnp.mean(y, axis=-1, keepdims=True)
    var = jnp.mean((y - mu) ** 2, axis=-1, keepdims=True)
    return (y - mu) * jax.lax.rsqrt(var + eps) * g + bt


def _mlp_tail(h_pre, w2, b2, w3, b3, g=None, bt=None):
    """ReLU -> Linear -> ReLU -> Linear [-> LayerNorm] on already-computed
    first-layer pre-activations."""
    h = jnp.maximum(h_pre, 0.0)
    h = jnp.maximum(jnp.dot(h, w2, preferred_element_type=jnp.float32) + b2, 0.0)
    y = jnp.dot(h, w3, preferred_element_type=jnp.float32) + b3
    if g is not None:
        y = _layernorm(y, g, bt)
    return y


def _mlp(x, w1, b1, w2, b2, w3, b3, g=None, bt=None):
    """Plain 3-Linear MLP (mlp_n_hidden_layers=2) with optional LayerNorm."""
    h_pre = jnp.dot(x, w1, preferred_element_type=jnp.float32) + b1
    return _mlp_tail(h_pre, w2, b2, w3, b3, g, bt)


def _mlp_split_first(parts, seg, w1, b1, w2, b2, w3, b3, g=None, bt=None):
    """MLP applied to the *virtual* concat of `parts` (each [rows, seg]) along
    the feature axis: first Linear is rewritten as a sum of per-segment
    matmuls against row-slices of w1 — no concatenate is ever formed."""
    acc = jnp.dot(parts[0], w1[0:seg, :], preferred_element_type=jnp.float32)
    for i in range(1, len(parts)):
        acc = acc + jnp.dot(parts[i], w1[i * seg:(i + 1) * seg, :],
                            preferred_element_type=jnp.float32)
    return _mlp_tail(acc + b1, w2, b2, w3, b3, g, bt)


# ------------------------------ fused kernel ---------------------------------


def epd_fused_kernel(*refs, n_steps: int, latent: int):
    """Entire EncodeProcessDecode forward in one kernel invocation.

    ref layout (all inputs VMEM-resident, full-array blocks):
      [0:5]   node, edge_attr, one_hot(row) [E,N], one_hot(col) [E,N],
              mean-scatter matrix [N,E]
      [5:13]  node-encoder MLP params   (w1,b1,w2,b2,w3,b3,g,bt)
      [13:21] edge-encoder MLP params
      [21:29] processor edge_mlp params   (stacked over steps on dim 0)
      [29:37] processor node_mlp_1 params (stacked)
      [37:45] processor node_mlp_2 params (stacked)
      [45:51] decoder MLP params (no LayerNorm)
      [51]    output ref [N, out_size]
    """
    assert len(refs) == 52
    node_ref, edge_ref, grow_ref, gcol_ref, scat_ref = refs[0:5]
    ne = refs[5:13]
    ee = refs[13:21]
    pe = refs[21:29]
    pn1 = refs[29:37]
    pn2 = refs[37:45]
    de = refs[45:51]
    out_ref = refs[51]

    load = lambda rs: tuple(r[...] for r in rs)          # whole param
    load_s = lambda rs, s: tuple(r[s] for r in rs)       # per-step slice

    # ---- encode (GraphIndependent: node MLP+LN, edge MLP+LN) ----
    x = _mlp(node_ref[...], *load(ne))                   # [N, L]
    e = _mlp(edge_ref[...], *load(ee))                   # [E, L]

    grow = grow_ref[...]                                 # [E, N] one_hot(row)
    gcol = gcol_ref[...]                                 # [E, N] one_hot(col)
    scat = scat_ref[...]                                 # [N, E] mean scatter

    # ---- process: n_steps MetaLayer steps with residuals (unrolled) ----
    for s in range(n_steps):
        ew = load_s(pe, s)
        n1w = load_s(pn1, s)
        n2w = load_s(pn2, s)

        # gather x[row] / x[col] as one-hot matmuls (stays on the MXU)
        xr = jnp.dot(grow, x, preferred_element_type=jnp.float32)   # [E, L]
        xc = jnp.dot(gcol, x, preferred_element_type=jnp.float32)   # [E, L]

        # EdgeModel: e' = MLP([x[row], x[col], e]) + LN
        e_new = _mlp_split_first([xr, xc, e], latent, *ew)

        # NodeModel: m = MLP1([x[row], e']); agg = scatter_mean(m, col);
        #            x' = MLP2([x, agg])
        m = _mlp_split_first([xr, e_new], latent, *n1w)
        agg = jnp.dot(scat, m, preferred_element_type=jnp.float32)  # [N, L]
        x_new = _mlp_split_first([x, agg], latent, *n2w)

        # residuals
        x = x_new + x
        e = e_new + e

    # ---- decode (MLP, no LayerNorm) ----
    out_ref[...] = _mlp(x, *load(de))


# -------------------------- parameter construction ---------------------------


def init_mlp(key, d_in, hidden, d_out, layernorm=True):
    """Kaiming-normal weights, zero biases, LN gamma=1 / beta=0."""
    k1, k2, k3 = jax.random.split(key, 3)

    def kaiming(k, fan_in, fan_out):
        return jax.random.normal(k, (fan_in, fan_out), jnp.float32) * jnp.sqrt(
            2.0 / fan_in)

    p = {
        "w1": kaiming(k1, d_in, hidden),
        "b1": jnp.zeros((1, hidden), jnp.float32),
        "w2": kaiming(k2, hidden, hidden),
        "b2": jnp.zeros((1, hidden), jnp.float32),
        "w3": kaiming(k3, hidden, d_out),
        "b3": jnp.zeros((1, d_out), jnp.float32),
    }
    if layernorm:
        p["g"] = jnp.ones((1, d_out), jnp.float32)
        p["bt"] = jnp.zeros((1, d_out), jnp.float32)
    return p


def _stack_mlps(mlps):
    return {k: jnp.stack([m[k] for m in mlps]) for k in mlps[0]}


def init_encode_process_decode(key, node_in, edge_in, latent, hidden,
                               n_steps, out_size):
    keys = jax.random.split(key, 3 + 3 * n_steps)
    params = {
        "ne": init_mlp(keys[0], node_in, hidden, latent, layernorm=True),
        "ee": init_mlp(keys[1], edge_in, hidden, latent, layernorm=True),
        "de": init_mlp(keys[2], latent, hidden, out_size, layernorm=False),
    }
    pe, pn1, pn2 = [], [], []
    for i in range(n_steps):
        # EdgeModel: cat([src, dest, edge_attr]) -> latent
        pe.append(init_mlp(keys[3 + 3 * i], 3 * latent, hidden, latent, True))
        # NodeModel.node_mlp_1: cat([x[row], edge_attr]) -> latent
        pn1.append(init_mlp(keys[4 + 3 * i], 2 * latent, hidden, latent, True))
        # NodeModel.node_mlp_2: cat([x, agg]) -> latent
        pn2.append(init_mlp(keys[5 + 3 * i], 2 * latent, hidden, latent, True))
    params["pe"] = _stack_mlps(pe)     # each leaf: [n_steps, ...]
    params["pn1"] = _stack_mlps(pn1)
    params["pn2"] = _stack_mlps(pn2)
    return params


# -------------------------------- forward ------------------------------------


def encode_process_decode_forward(params, node, edge_attr, edge_index):
    row, col = edge_index[0], edge_index[1]
    n_nodes = node.shape[0]
    n_steps = params["pe"]["w1"].shape[0]
    latent = params["ne"]["w3"].shape[1]
    out_size = params["de"]["w3"].shape[1]

    # Dense gather / mean-scatter operators from edge_index (built once per
    # forward in plain JAX; used as matmuls inside the kernel).
    grow = jax.nn.one_hot(row, n_nodes, dtype=jnp.float32)            # [E, N]
    gcol = jax.nn.one_hot(col, n_nodes, dtype=jnp.float32)            # [E, N]
    counts = jnp.sum(gcol, axis=0)                                    # [N]
    # torch_scatter.scatter_mean semantics: sum / clamp(count, min=1)
    scat = gcol.T / jnp.maximum(counts, 1.0)[:, None]                 # [N, E]

    inputs = [node, edge_attr, grow, gcol, scat]
    inputs += [params["ne"][k] for k in PARAM_ORDER_LN]
    inputs += [params["ee"][k] for k in PARAM_ORDER_LN]
    inputs += [params["pe"][k] for k in PARAM_ORDER_LN]
    inputs += [params["pn1"][k] for k in PARAM_ORDER_LN]
    inputs += [params["pn2"][k] for k in PARAM_ORDER_LN]
    inputs += [params["de"][k] for k in PARAM_ORDER_NO_LN]

    vmem_spec = lambda: pl.BlockSpec(memory_space=pltpu.MemorySpace.VMEM)
    out = pl.pallas_call(
        functools.partial(epd_fused_kernel, n_steps=n_steps, latent=latent),
        out_shape=jax.ShapeDtypeStruct((n_nodes, out_size), jnp.float32),
        in_specs=[vmem_spec() for _ in inputs],
        out_specs=vmem_spec(),
    )(*inputs)
    return out


# ----------------------------------- main -------------------------------------

if __name__ == "__main__":
    # hyperparameters implied by EncodeProcessDecode.__init__
    NODE_IN, EDGE_IN = 5, 3
    LATENT, HIDDEN = 32, 32
    MLP_N_HIDDEN_LAYERS = 2          # fused kernel implements exactly this depth
    N_STEPS, OUT_SIZE = 2, 4

    N_NODES, N_EDGES = 16, 32

    key = jax.random.PRNGKey(0)
    kp, kn, ke, kr, kc = jax.random.split(key, 5)

    params = init_encode_process_decode(kp, NODE_IN, EDGE_IN, LATENT, HIDDEN,
                                        N_STEPS, OUT_SIZE)

    node = jax.random.normal(kn, (N_NODES, NODE_IN), jnp.float32)
    edge_attr = jax.random.normal(ke, (N_EDGES, EDGE_IN), jnp.float32)
    edge_index = jnp.stack([
        jax.random.randint(kr, (N_EDGES,), 0, N_NODES),
        jax.random.randint(kc, (N_EDGES,), 0, N_NODES),
    ], axis=0)

    fwd = jax.jit(encode_process_decode_forward)
    out = jax.block_until_ready(fwd(params, node, edge_attr, edge_index))
    assert out.shape == (N_NODES, OUT_SIZE)
    assert bool(jnp.all(jnp.isfinite(out)))
    print("KERNEL_OK")
</pallas_src>

<mosaic_0001>
module attributes {stable_mosaic.version = 11 : i64} {
  func.func @epd_fused_kernel(%arg0: memref<16x5xf32, #tpu.memory_space<vmem>>, %arg1: memref<32x3xf32, #tpu.memory_space<vmem>>, %arg2: memref<32x16xf32, #tpu.memory_space<vmem>>, %arg3: memref<32x16xf32, #tpu.memory_space<vmem>>, %arg4: memref<16x32xf32, #tpu.memory_space<vmem>>, %arg5: memref<5x32xf32, #tpu.memory_space<vmem>>, %arg6: memref<1x32xf32, #tpu.memory_space<vmem>>, %arg7: memref<32x32xf32, #tpu.memory_space<vmem>>, %arg8: memref<1x32xf32, #tpu.memory_space<vmem>>, %arg9: memref<32x32xf32, #tpu.memory_space<vmem>>, %arg10: memref<1x32xf32, #tpu.memory_space<vmem>>, %arg11: memref<1x32xf32, #tpu.memory_space<vmem>>, %arg12: memref<1x32xf32, #tpu.memory_space<vmem>>, %arg13: memref<3x32xf32, #tpu.memory_space<vmem>>, %arg14: memref<1x32xf32, #tpu.memory_space<vmem>>, %arg15: memref<32x32xf32, #tpu.memory_space<vmem>>, %arg16: memref<1x32xf32, #tpu.memory_space<vmem>>, %arg17: memref<32x32xf32, #tpu.memory_space<vmem>>, %arg18: memref<1x32xf32, #tpu.memory_space<vmem>>, %arg19: memref<1x32xf32, #tpu.memory_space<vmem>>, %arg20: memref<1x32xf32, #tpu.memory_space<vmem>>, %arg21: memref<2x96x32xf32, #tpu.memory_space<vmem>>, %arg22: memref<2x1x32xf32, #tpu.memory_space<vmem>>, %arg23: memref<2x32x32xf32, #tpu.memory_space<vmem>>, %arg24: memref<2x1x32xf32, #tpu.memory_space<vmem>>, %arg25: memref<2x32x32xf32, #tpu.memory_space<vmem>>, %arg26: memref<2x1x32xf32, #tpu.memory_space<vmem>>, %arg27: memref<2x1x32xf32, #tpu.memory_space<vmem>>, %arg28: memref<2x1x32xf32, #tpu.memory_space<vmem>>, %arg29: memref<2x64x32xf32, #tpu.memory_space<vmem>>, %arg30: memref<2x1x32xf32, #tpu.memory_space<vmem>>, %arg31: memref<2x32x32xf32, #tpu.memory_space<vmem>>, %arg32: memref<2x1x32xf32, #tpu.memory_space<vmem>>, %arg33: memref<2x32x32xf32, #tpu.memory_space<vmem>>, %arg34: memref<2x1x32xf32, #tpu.memory_space<vmem>>, %arg35: memref<2x1x32xf32, #tpu.memory_space<vmem>>, %arg36: memref<2x1x32xf32, #tpu.memory_space<vmem>>, %arg37: memref<2x64x32xf32, #tpu.memory_space<vmem>>, %arg38: memref<2x1x32xf32, #tpu.memory_space<vmem>>, %arg39: memref<2x32x32xf32, #tpu.memory_space<vmem>>, %arg40: memref<2x1x32xf32, #tpu.memory_space<vmem>>, %arg41: memref<2x32x32xf32, #tpu.memory_space<vmem>>, %arg42: memref<2x1x32xf32, #tpu.memory_space<vmem>>, %arg43: memref<2x1x32xf32, #tpu.memory_space<vmem>>, %arg44: memref<2x1x32xf32, #tpu.memory_space<vmem>>, %arg45: memref<32x32xf32, #tpu.memory_space<vmem>>, %arg46: memref<1x32xf32, #tpu.memory_space<vmem>>, %arg47: memref<32x32xf32, #tpu.memory_space<vmem>>, %arg48: memref<1x32xf32, #tpu.memory_space<vmem>>, %arg49: memref<32x4xf32, #tpu.memory_space<vmem>>, %arg50: memref<1x4xf32, #tpu.memory_space<vmem>>, %arg51: memref<16x4xf32, #tpu.memory_space<vmem>>) attributes {dimension_semantics = [], scalar_prefetch = 0 : i64, scratch_operands = 0 : i64, tpu.core_type = #tpu.core_type<tc>} {
    %c0 = arith.constant 0 : index
    %c0_0 = arith.constant 0 : index
    %0 = vector.load %arg0[%c0, %c0_0] : memref<16x5xf32, #tpu.memory_space<vmem>>, vector<16x5xf32>
    %c0_1 = arith.constant 0 : index
    %c0_2 = arith.constant 0 : index
    %1 = vector.load %arg5[%c0_1, %c0_2] : memref<5x32xf32, #tpu.memory_space<vmem>>, vector<5x32xf32>
    %c0_3 = arith.constant 0 : index
    %c0_4 = arith.constant 0 : index
    %2 = vector.load %arg6[%c0_3, %c0_4] : memref<1x32xf32, #tpu.memory_space<vmem>>, vector<1x32xf32>
    %c0_5 = arith.constant 0 : index
    %c0_6 = arith.constant 0 : index
    %3 = vector.load %arg7[%c0_5, %c0_6] : memref<32x32xf32, #tpu.memory_space<vmem>>, vector<32x32xf32>
    %c0_7 = arith.constant 0 : index
    %c0_8 = arith.constant 0 : index
    %4 = vector.load %arg8[%c0_7, %c0_8] : memref<1x32xf32, #tpu.memory_space<vmem>>, vector<1x32xf32>
    %c0_9 = arith.constant 0 : index
    %c0_10 = arith.constant 0 : index
    %5 = vector.load %arg9[%c0_9, %c0_10] : memref<32x32xf32, #tpu.memory_space<vmem>>, vector<32x32xf32>
    %c0_11 = arith.constant 0 : index
    %c0_12 = arith.constant 0 : index
    %6 = vector.load %arg10[%c0_11, %c0_12] : memref<1x32xf32, #tpu.memory_space<vmem>>, vector<1x32xf32>
    %c0_13 = arith.constant 0 : index
    %c0_14 = arith.constant 0 : index
    %7 = vector.load %arg11[%c0_13, %c0_14] : memref<1x32xf32, #tpu.memory_space<vmem>>, vector<1x32xf32>
    %c0_15 = arith.constant 0 : index
    %c0_16 = arith.constant 0 : index
    %8 = vector.load %arg12[%c0_15, %c0_16] : memref<1x32xf32, #tpu.memory_space<vmem>>, vector<1x32xf32>
    %cst = arith.constant dense<0.000000e+00> : vector<16x32xf32>
    %9 = tpu.matmul %0, %1, %cst {dimension_numbers = #tpu.dot_dimension_numbers<[1], [0], [0], [1], [0, 0, 1, 1], [], []>} : vector<16x5xf32>, vector<5x32xf32>, vector<16x32xf32> -> vector<16x32xf32>
    %10 = vector.broadcast %2 : vector<1x32xf32> to vector<16x32xf32>
    %11 = arith.addf %9, %10 : vector<16x32xf32>
    %cst_17 = arith.constant 0.000000e+00 : f32
    %12 = vector.broadcast %cst_17 : f32 to vector<16x32xf32>
    %13 = arith.maximumf %11, %12 : vector<16x32xf32>
    %cst_18 = arith.constant dense<0.000000e+00> : vector<16x32xf32>
    %14 = tpu.matmul %13, %3, %cst_18 {dimension_numbers = #tpu.dot_dimension_numbers<[1], [0], [0], [1], [0, 0, 1, 1], [], []>} : vector<16x32xf32>, vector<32x32xf32>, vector<16x32xf32> -> vector<16x32xf32>
    %15 = vector.broadcast %4 : vector<1x32xf32> to vector<16x32xf32>
    %16 = arith.addf %14, %15 : vector<16x32xf32>
    %cst_19 = arith.constant 0.000000e+00 : f32
    %17 = vector.broadcast %cst_19 : f32 to vector<16x32xf32>
    %18 = arith.maximumf %16, %17 : vector<16x32xf32>
    %cst_20 = arith.constant dense<0.000000e+00> : vector<16x32xf32>
    %19 = tpu.matmul %18, %5, %cst_20 {dimension_numbers = #tpu.dot_dimension_numbers<[1], [0], [0], [1], [0, 0, 1, 1], [], []>} : vector<16x32xf32>, vector<32x32xf32>, vector<16x32xf32> -> vector<16x32xf32>
    %20 = vector.broadcast %6 : vector<1x32xf32> to vector<16x32xf32>
    %21 = arith.addf %19, %20 : vector<16x32xf32>
    %cst_21 = arith.constant dense<0.000000e+00> : vector<16xf32>
    %22 = vector.multi_reduction <add>, %21, %cst_21 [1] : vector<16x32xf32> to vector<16xf32>
    %23 = vector.shape_cast %22 : vector<16xf32> to vector<16x1xf32>
    %cst_22 = arith.constant 3.200000e+01 : f32
    %24 = vector.broadcast %cst_22 : f32 to vector<16x1xf32>
    %25 = arith.divf %23, %24 : vector<16x1xf32>
    %26 = vector.broadcast %25 : vector<16x1xf32> to vector<16x32xf32>
    %27 = arith.subf %21, %26 : vector<16x32xf32>
    %28 = arith.mulf %27, %27 : vector<16x32xf32>
    %cst_23 = arith.constant dense<0.000000e+00> : vector<16xf32>
    %29 = vector.multi_reduction <add>, %28, %cst_23 [1] : vector<16x32xf32> to vector<16xf32>
    %30 = vector.shape_cast %29 : vector<16xf32> to vector<16x1xf32>
    %cst_24 = arith.constant 3.200000e+01 : f32
    %31 = vector.broadcast %cst_24 : f32 to vector<16x1xf32>
    %32 = arith.divf %30, %31 : vector<16x1xf32>
    %33 = vector.broadcast %25 : vector<16x1xf32> to vector<16x32xf32>
    %34 = arith.subf %21, %33 : vector<16x32xf32>
    %cst_25 = arith.constant 9.99999974E-6 : f32
    %35 = vector.broadcast %cst_25 : f32 to vector<16x1xf32>
    %36 = arith.addf %32, %35 : vector<16x1xf32>
    %37 = math.rsqrt %36 : vector<16x1xf32>
    %38 = vector.broadcast %37 : vector<16x1xf32> to vector<16x32xf32>
    %39 = arith.mulf %34, %38 : vector<16x32xf32>
    %40 = vector.broadcast %7 : vector<1x32xf32> to vector<16x32xf32>
    %41 = arith.mulf %39, %40 : vector<16x32xf32>
    %42 = vector.broadcast %8 : vector<1x32xf32> to vector<16x32xf32>
    %43 = arith.addf %41, %42 : vector<16x32xf32>
    %c0_26 = arith.constant 0 : index
    %c0_27 = arith.constant 0 : index
    %44 = vector.load %arg1[%c0_26, %c0_27] : memref<32x3xf32, #tpu.memory_space<vmem>>, vector<32x3xf32>
    %c0_28 = arith.constant 0 : index
    %c0_29 = arith.constant 0 : index
    %45 = vector.load %arg13[%c0_28, %c0_29] : memref<3x32xf32, #tpu.memory_space<vmem>>, vector<3x32xf32>
    %c0_30 = arith.constant 0 : index
    %c0_31 = arith.constant 0 : index
    %46 = vector.load %arg14[%c0_30, %c0_31] : memref<1x32xf32, #tpu.memory_space<vmem>>, vector<1x32xf32>
    %c0_32 = arith.constant 0 : index
    %c0_33 = arith.constant 0 : index
    %47 = vector.load %arg15[%c0_32, %c0_33] : memref<32x32xf32, #tpu.memory_space<vmem>>, vector<32x32xf32>
    %c0_34 = arith.constant 0 : index
    %c0_35 = arith.constant 0 : index
    %48 = vector.load %arg16[%c0_34, %c0_35] : memref<1x32xf32, #tpu.memory_space<vmem>>, vector<1x32xf32>
    %c0_36 = arith.constant 0 : index
    %c0_37 = arith.constant 0 : index
    %49 = vector.load %arg17[%c0_36, %c0_37] : memref<32x32xf32, #tpu.memory_space<vmem>>, vector<32x32xf32>
    %c0_38 = arith.constant 0 : index
    %c0_39 = arith.constant 0 : index
    %50 = vector.load %arg18[%c0_38, %c0_39] : memref<1x32xf32, #tpu.memory_space<vmem>>, vector<1x32xf32>
    %c0_40 = arith.constant 0 : index
    %c0_41 = arith.constant 0 : index
    %51 = vector.load %arg19[%c0_40, %c0_41] : memref<1x32xf32, #tpu.memory_space<vmem>>, vector<1x32xf32>
    %c0_42 = arith.constant 0 : index
    %c0_43 = arith.constant 0 : index
    %52 = vector.load %arg20[%c0_42, %c0_43] : memref<1x32xf32, #tpu.memory_space<vmem>>, vector<1x32xf32>
    %cst_44 = arith.constant dense<0.000000e+00> : vector<32x32xf32>
    %53 = tpu.matmul %44, %45, %cst_44 {dimension_numbers = #tpu.dot_dimension_numbers<[1], [0], [0], [1], [0, 0, 1, 1], [], []>} : vector<32x3xf32>, vector<3x32xf32>, vector<32x32xf32> -> vector<32x32xf32>
    %54 = vector.broadcast %46 : vector<1x32xf32> to vector<32x32xf32>
    %55 = arith.addf %53, %54 : vector<32x32xf32>
    %cst_45 = arith.constant 0.000000e+00 : f32
    %56 = vector.broadcast %cst_45 : f32 to vector<32x32xf32>
    %57 = arith.maximumf %55, %56 : vector<32x32xf32>
    %cst_46 = arith.constant dense<0.000000e+00> : vector<32x32xf32>
    %58 = tpu.matmul %57, %47, %cst_46 {dimension_numbers = #tpu.dot_dimension_numbers<[1], [0], [0], [1], [0, 0, 1, 1], [], []>} : vector<32x32xf32>, vector<32x32xf32>, vector<32x32xf32> -> vector<32x32xf32>
    %59 = vector.broadcast %48 : vector<1x32xf32> to vector<32x32xf32>
    %60 = arith.addf %58, %59 : vector<32x32xf32>
    %cst_47 = arith.constant 0.000000e+00 : f32
    %61 = vector.broadcast %cst_47 : f32 to vector<32x32xf32>
    %62 = arith.maximumf %60, %61 : vector<32x32xf32>
    %cst_48 = arith.constant dense<0.000000e+00> : vector<32x32xf32>
    %63 = tpu.matmul %62, %49, %cst_48 {dimension_numbers = #tpu.dot_dimension_numbers<[1], [0], [0], [1], [0, 0, 1, 1], [], []>} : vector<32x32xf32>, vector<32x32xf32>, vector<32x32xf32> -> vector<32x32xf32>
    %64 = vector.broadcast %50 : vector<1x32xf32> to vector<32x32xf32>
    %65 = arith.addf %63, %64 : vector<32x32xf32>
    %cst_49 = arith.constant dense<0.000000e+00> : vector<32xf32>
    %66 = vector.multi_reduction <add>, %65, %cst_49 [1] : vector<32x32xf32> to vector<32xf32>
    %67 = vector.shape_cast %66 : vector<32xf32> to vector<32x1xf32>
    %cst_50 = arith.constant 3.200000e+01 : f32
    %68 = vector.broadcast %cst_50 : f32 to vector<32x1xf32>
    %69 = arith.divf %67, %68 : vector<32x1xf32>
    %70 = vector.broadcast %69 : vector<32x1xf32> to vector<32x32xf32>
    %71 = arith.subf %65, %70 : vector<32x32xf32>
    %72 = arith.mulf %71, %71 : vector<32x32xf32>
    %cst_51 = arith.constant dense<0.000000e+00> : vector<32xf32>
    %73 = vector.multi_reduction <add>, %72, %cst_51 [1] : vector<32x32xf32> to vector<32xf32>
    %74 = vector.shape_cast %73 : vector<32xf32> to vector<32x1xf32>
    %cst_52 = arith.constant 3.200000e+01 : f32
    %75 = vector.broadcast %cst_52 : f32 to vector<32x1xf32>
    %76 = arith.divf %74, %75 : vector<32x1xf32>
    %77 = vector.broadcast %69 : vector<32x1xf32> to vector<32x32xf32>
    %78 = arith.subf %65, %77 : vector<32x32xf32>
    %cst_53 = arith.constant 9.99999974E-6 : f32
    %79 = vector.broadcast %cst_53 : f32 to vector<32x1xf32>
    %80 = arith.addf %76, %79 : vector<32x1xf32>
    %81 = math.rsqrt %80 : vector<32x1xf32>
    %82 = vector.broadcast %81 : vector<32x1xf32> to vector<32x32xf32>
    %83 = arith.mulf %78, %82 : vector<32x32xf32>
    %84 = vector.broadcast %51 : vector<1x32xf32> to vector<32x32xf32>
    %85 = arith.mulf %83, %84 : vector<32x32xf32>
    %86 = vector.broadcast %52 : vector<1x32xf32> to vector<32x32xf32>
    %87 = arith.addf %85, %86 : vector<32x32xf32>
    %c0_54 = arith.constant 0 : index
    %c0_55 = arith.constant 0 : index
    %88 = vector.load %arg2[%c0_54, %c0_55] : memref<32x16xf32, #tpu.memory_space<vmem>>, vector<32x16xf32>
    %c0_56 = arith.constant 0 : index
    %c0_57 = arith.constant 0 : index
    %89 = vector.load %arg3[%c0_56, %c0_57] : memref<32x16xf32, #tpu.memory_space<vmem>>, vector<32x16xf32>
    %c0_58 = arith.constant 0 : index
    %c0_59 = arith.constant 0 : index
    %90 = vector.load %arg4[%c0_58, %c0_59] : memref<16x32xf32, #tpu.memory_space<vmem>>, vector<16x32xf32>
    %c0_60 = arith.constant 0 : index
    %c0_61 = arith.constant 0 : index
    %c0_62 = arith.constant 0 : index
    %91 = vector.load %arg21[%c0_60, %c0_61, %c0_62] : memref<2x96x32xf32, #tpu.memory_space<vmem>>, vector<1x96x32xf32>
    %92 = vector.shape_cast %91 : vector<1x96x32xf32> to vector<96x32xf32>
    %c0_63 = arith.constant 0 : index
    %c0_64 = arith.constant 0 : index
    %c0_65 = arith.constant 0 : index
    %93 = vector.load %arg22[%c0_63, %c0_64, %c0_65] : memref<2x1x32xf32, #tpu.memory_space<vmem>>, vector<1x1x32xf32>
    %94 = vector.shape_cast %93 : vector<1x1x32xf32> to vector<1x32xf32>
    %c0_66 = arith.constant 0 : index
    %c0_67 = arith.constant 0 : index
    %c0_68 = arith.constant 0 : index
    %95 = vector.load %arg23[%c0_66, %c0_67, %c0_68] : memref<2x32x32xf32, #tpu.memory_space<vmem>>, vector<1x32x32xf32>
    %96 = vector.shape_cast %95 : vector<1x32x32xf32> to vector<32x32xf32>
    %c0_69 = arith.constant 0 : index
    %c0_70 = arith.constant 0 : index
    %c0_71 = arith.constant 0 : index
    %97 = vector.load %arg24[%c0_69, %c0_70, %c0_71] : memref<2x1x32xf32, #tpu.memory_space<vmem>>, vector<1x1x32xf32>
    %98 = vector.shape_cast %97 : vector<1x1x32xf32> to vector<1x32xf32>
    %c0_72 = arith.constant 0 : index
    %c0_73 = arith.constant 0 : index
    %c0_74 = arith.constant 0 : index
    %99 = vector.load %arg25[%c0_72, %c0_73, %c0_74] : memref<2x32x32xf32, #tpu.memory_space<vmem>>, vector<1x32x32xf32>
    %100 = vector.shape_cast %99 : vector<1x32x32xf32> to vector<32x32xf32>
    %c0_75 = arith.constant 0 : index
    %c0_76 = arith.constant 0 : index
    %c0_77 = arith.constant 0 : index
    %101 = vector.load %arg26[%c0_75, %c0_76, %c0_77] : memref<2x1x32xf32, #tpu.memory_space<vmem>>, vector<1x1x32xf32>
    %102 = vector.shape_cast %101 : vector<1x1x32xf32> to vector<1x32xf32>
    %c0_78 = arith.constant 0 : index
    %c0_79 = arith.constant 0 : index
    %c0_80 = arith.constant 0 : index
    %103 = vector.load %arg27[%c0_78, %c0_79, %c0_80] : memref<2x1x32xf32, #tpu.memory_space<vmem>>, vector<1x1x32xf32>
    %104 = vector.shape_cast %103 : vector<1x1x32xf32> to vector<1x32xf32>
    %c0_81 = arith.constant 0 : index
    %c0_82 = arith.constant 0 : index
    %c0_83 = arith.constant 0 : index
    %105 = vector.load %arg28[%c0_81, %c0_82, %c0_83] : memref<2x1x32xf32, #tpu.memory_space<vmem>>, vector<1x1x32xf32>
    %106 = vector.shape_cast %105 : vector<1x1x32xf32> to vector<1x32xf32>
    %c0_84 = arith.constant 0 : index
    %c0_85 = arith.constant 0 : index
    %c0_86 = arith.constant 0 : index
    %107 = vector.load %arg29[%c0_84, %c0_85, %c0_86] : memref<2x64x32xf32, #tpu.memory_space<vmem>>, vector<1x64x32xf32>
    %108 = vector.shape_cast %107 : vector<1x64x32xf32> to vector<64x32xf32>
    %c0_87 = arith.constant 0 : index
    %c0_88 = arith.constant 0 : index
    %c0_89 = arith.constant 0 : index
    %109 = vector.load %arg30[%c0_87, %c0_88, %c0_89] : memref<2x1x32xf32, #tpu.memory_space<vmem>>, vector<1x1x32xf32>
    %110 = vector.shape_cast %109 : vector<1x1x32xf32> to vector<1x32xf32>
    %c0_90 = arith.constant 0 : index
    %c0_91 = arith.constant 0 : index
    %c0_92 = arith.constant 0 : index
    %111 = vector.load %arg31[%c0_90, %c0_91, %c0_92] : memref<2x32x32xf32, #tpu.memory_space<vmem>>, vector<1x32x32xf32>
    %112 = vector.shape_cast %111 : vector<1x32x32xf32> to vector<32x32xf32>
    %c0_93 = arith.constant 0 : index
    %c0_94 = arith.constant 0 : index
    %c0_95 = arith.constant 0 : index
    %113 = vector.load %arg32[%c0_93, %c0_94, %c0_95] : memref<2x1x32xf32, #tpu.memory_space<vmem>>, vector<1x1x32xf32>
    %114 = vector.shape_cast %113 : vector<1x1x32xf32> to vector<1x32xf32>
    %c0_96 = arith.constant 0 : index
    %c0_97 = arith.constant 0 : index
    %c0_98 = arith.constant 0 : index
    %115 = vector.load %arg33[%c0_96, %c0_97, %c0_98] : memref<2x32x32xf32, #tpu.memory_space<vmem>>, vector<1x32x32xf32>
    %116 = vector.shape_cast %115 : vector<1x32x32xf32> to vector<32x32xf32>
    %c0_99 = arith.constant 0 : index
    %c0_100 = arith.constant 0 : index
    %c0_101 = arith.constant 0 : index
    %117 = vector.load %arg34[%c0_99, %c0_100, %c0_101] : memref<2x1x32xf32, #tpu.memory_space<vmem>>, vector<1x1x32xf32>
    %118 = vector.shape_cast %117 : vector<1x1x32xf32> to vector<1x32xf32>
    %c0_102 = arith.constant 0 : index
    %c0_103 = arith.constant 0 : index
    %c0_104 = arith.constant 0 : index
    %119 = vector.load %arg35[%c0_102, %c0_103, %c0_104] : memref<2x1x32xf32, #tpu.memory_space<vmem>>, vector<1x1x32xf32>
    %120 = vector.shape_cast %119 : vector<1x1x32xf32> to vector<1x32xf32>
    %c0_105 = arith.constant 0 : index
    %c0_106 = arith.constant 0 : index
    %c0_107 = arith.constant 0 : index
    %121 = vector.load %arg36[%c0_105, %c0_106, %c0_107] : memref<2x1x32xf32, #tpu.memory_space<vmem>>, vector<1x1x32xf32>
    %122 = vector.shape_cast %121 : vector<1x1x32xf32> to vector<1x32xf32>
    %c0_108 = arith.constant 0 : index
    %c0_109 = arith.constant 0 : index
    %c0_110 = arith.constant 0 : index
    %123 = vector.load %arg37[%c0_108, %c0_109, %c0_110] : memref<2x64x32xf32, #tpu.memory_space<vmem>>, vector<1x64x32xf32>
    %124 = vector.shape_cast %123 : vector<1x64x32xf32> to vector<64x32xf32>
    %c0_111 = arith.constant 0 : index
    %c0_112 = arith.constant 0 : index
    %c0_113 = arith.constant 0 : index
    %125 = vector.load %arg38[%c0_111, %c0_112, %c0_113] : memref<2x1x32xf32, #tpu.memory_space<vmem>>, vector<1x1x32xf32>
    %126 = vector.shape_cast %125 : vector<1x1x32xf32> to vector<1x32xf32>
    %c0_114 = arith.constant 0 : index
    %c0_115 = arith.constant 0 : index
    %c0_116 = arith.constant 0 : index
    %127 = vector.load %arg39[%c0_114, %c0_115, %c0_116] : memref<2x32x32xf32, #tpu.memory_space<vmem>>, vector<1x32x32xf32>
    %128 = vector.shape_cast %127 : vector<1x32x32xf32> to vector<32x32xf32>
    %c0_117 = arith.constant 0 : index
    %c0_118 = arith.constant 0 : index
    %c0_119 = arith.constant 0 : index
    %129 = vector.load %arg40[%c0_117, %c0_118, %c0_119] : memref<2x1x32xf32, #tpu.memory_space<vmem>>, vector<1x1x32xf32>
    %130 = vector.shape_cast %129 : vector<1x1x32xf32> to vector<1x32xf32>
    %c0_120 = arith.constant 0 : index
    %c0_121 = arith.constant 0 : index
    %c0_122 = arith.constant 0 : index
    %131 = vector.load %arg41[%c0_120, %c0_121, %c0_122] : memref<2x32x32xf32, #tpu.memory_space<vmem>>, vector<1x32x32xf32>
    %132 = vector.shape_cast %131 : vector<1x32x32xf32> to vector<32x32xf32>
    %c0_123 = arith.constant 0 : index
    %c0_124 = arith.constant 0 : index
    %c0_125 = arith.constant 0 : index
    %133 = vector.load %arg42[%c0_123, %c0_124, %c0_125] : memref<2x1x32xf32, #tpu.memory_space<vmem>>, vector<1x1x32xf32>
    %134 = vector.shape_cast %133 : vector<1x1x32xf32> to vector<1x32xf32>
    %c0_126 = arith.constant 0 : index
    %c0_127 = arith.constant 0 : index
    %c0_128 = arith.constant 0 : index
    %135 = vector.load %arg43[%c0_126, %c0_127, %c0_128] : memref<2x1x32xf32, #tpu.memory_space<vmem>>, vector<1x1x32xf32>
    %136 = vector.shape_cast %135 : vector<1x1x32xf32> to vector<1x32xf32>
    %c0_129 = arith.constant 0 : index
    %c0_130 = arith.constant 0 : index
    %c0_131 = arith.constant 0 : index
    %137 = vector.load %arg44[%c0_129, %c0_130, %c0_131] : memref<2x1x32xf32, #tpu.memory_space<vmem>>, vector<1x1x32xf32>
    %138 = vector.shape_cast %137 : vector<1x1x32xf32> to vector<1x32xf32>
    %cst_132 = arith.constant dense<0.000000e+00> : vector<32x32xf32>
    %139 = tpu.matmul %88, %43, %cst_132 {dimension_numbers = #tpu.dot_dimension_numbers<[1], [0], [0], [1], [0, 0, 1, 1], [], []>} : vector<32x16xf32>, vector<16x32xf32>, vector<32x32xf32> -> vector<32x32xf32>
    %cst_133 = arith.constant dense<0.000000e+00> : vector<32x32xf32>
    %140 = tpu.matmul %89, %43, %cst_133 {dimension_numbers = #tpu.dot_dimension_numbers<[1], [0], [0], [1], [0, 0, 1, 1], [], []>} : vector<32x16xf32>, vector<16x32xf32>, vector<32x32xf32> -> vector<32x32xf32>
    %141 = vector.extract_strided_slice %92 {offsets = [0, 0], sizes = [32, 32], strides = [1, 1]} : vector<96x32xf32> to vector<32x32xf32>
    %cst_134 = arith.constant dense<0.000000e+00> : vector<32x32xf32>
    %142 = tpu.matmul %139, %141, %cst_134 {dimension_numbers = #tpu.dot_dimension_numbers<[1], [0], [0], [1], [0, 0, 1, 1], [], []>} : vector<32x32xf32>, vector<32x32xf32>, vector<32x32xf32> -> vector<32x32xf32>
    %143 = vector.extract_strided_slice %92 {offsets = [32, 0], sizes = [32, 32], strides = [1, 1]} : vector<96x32xf32> to vector<32x32xf32>
    %cst_135 = arith.constant dense<0.000000e+00> : vector<32x32xf32>
    %144 = tpu.matmul %140, %143, %cst_135 {dimension_numbers = #tpu.dot_dimension_numbers<[1], [0], [0], [1], [0, 0, 1, 1], [], []>} : vector<32x32xf32>, vector<32x32xf32>, vector<32x32xf32> -> vector<32x32xf32>
    %145 = arith.addf %142, %144 : vector<32x32xf32>
    %146 = vector.extract_strided_slice %92 {offsets = [64, 0], sizes = [32, 32], strides = [1, 1]} : vector<96x32xf32> to vector<32x32xf32>
    %cst_136 = arith.constant dense<0.000000e+00> : vector<32x32xf32>
    %147 = tpu.matmul %87, %146, %cst_136 {dimension_numbers = #tpu.dot_dimension_numbers<[1], [0], [0], [1], [0, 0, 1, 1], [], []>} : vector<32x32xf32>, vector<32x32xf32>, vector<32x32xf32> -> vector<32x32xf32>
    %148 = arith.addf %145, %147 : vector<32x32xf32>
    %149 = vector.broadcast %94 : vector<1x32xf32> to vector<32x32xf32>
    %150 = arith.addf %148, %149 : vector<32x32xf32>
    %cst_137 = arith.constant 0.000000e+00 : f32
    %151 = vector.broadcast %cst_137 : f32 to vector<32x32xf32>
    %152 = arith.maximumf %150, %151 : vector<32x32xf32>
    %cst_138 = arith.constant dense<0.000000e+00> : vector<32x32xf32>
    %153 = tpu.matmul %152, %96, %cst_138 {dimension_numbers = #tpu.dot_dimension_numbers<[1], [0], [0], [1], [0, 0, 1, 1], [], []>} : vector<32x32xf32>, vector<32x32xf32>, vector<32x32xf32> -> vector<32x32xf32>
    %154 = vector.broadcast %98 : vector<1x32xf32> to vector<32x32xf32>
    %155 = arith.addf %153, %154 : vector<32x32xf32>
    %cst_139 = arith.constant 0.000000e+00 : f32
    %156 = vector.broadcast %cst_139 : f32 to vector<32x32xf32>
    %157 = arith.maximumf %155, %156 : vector<32x32xf32>
    %cst_140 = arith.constant dense<0.000000e+00> : vector<32x32xf32>
    %158 = tpu.matmul %157, %100, %cst_140 {dimension_numbers = #tpu.dot_dimension_numbers<[1], [0], [0], [1], [0, 0, 1, 1], [], []>} : vector<32x32xf32>, vector<32x32xf32>, vector<32x32xf32> -> vector<32x32xf32>
    %159 = vector.broadcast %102 : vector<1x32xf32> to vector<32x32xf32>
    %160 = arith.addf %158, %159 : vector<32x32xf32>
    %cst_141 = arith.constant dense<0.000000e+00> : vector<32xf32>
    %161 = vector.multi_reduction <add>, %160, %cst_141 [1] : vector<32x32xf32> to vector<32xf32>
    %162 = vector.shape_cast %161 : vector<32xf32> to vector<32x1xf32>
    %cst_142 = arith.constant 3.200000e+01 : f32
    %163 = vector.broadcast %cst_142 : f32 to vector<32x1xf32>
    %164 = arith.divf %162, %163 : vector<32x1xf32>
    %165 = vector.broadcast %164 : vector<32x1xf32> to vector<32x32xf32>
    %166 = arith.subf %160, %165 : vector<32x32xf32>
    %167 = arith.mulf %166, %166 : vector<32x32xf32>
    %cst_143 = arith.constant dense<0.000000e+00> : vector<32xf32>
    %168 = vector.multi_reduction <add>, %167, %cst_143 [1] : vector<32x32xf32> to vector<32xf32>
    %169 = vector.shape_cast %168 : vector<32xf32> to vector<32x1xf32>
    %cst_144 = arith.constant 3.200000e+01 : f32
    %170 = vector.broadcast %cst_144 : f32 to vector<32x1xf32>
    %171 = arith.divf %169, %170 : vector<32x1xf32>
    %172 = vector.broadcast %164 : vector<32x1xf32> to vector<32x32xf32>
    %173 = arith.subf %160, %172 : vector<32x32xf32>
    %cst_145 = arith.constant 9.99999974E-6 : f32
    %174 = vector.broadcast %cst_145 : f32 to vector<32x1xf32>
    %175 = arith.addf %171, %174 : vector<32x1xf32>
    %176 = math.rsqrt %175 : vector<32x1xf32>
    %177 = vector.broadcast %176 : vector<32x1xf32> to vector<32x32xf32>
    %178 = arith.mulf %173, %177 : vector<32x32xf32>
    %179 = vector.broadcast %104 : vector<1x32xf32> to vector<32x32xf32>
    %180 = arith.mulf %178, %179 : vector<32x32xf32>
    %181 = vector.broadcast %106 : vector<1x32xf32> to vector<32x32xf32>
    %182 = arith.addf %180, %181 : vector<32x32xf32>
    %183 = vector.extract_strided_slice %108 {offsets = [0, 0], sizes = [32, 32], strides = [1, 1]} : vector<64x32xf32> to vector<32x32xf32>
    %cst_146 = arith.constant dense<0.000000e+00> : vector<32x32xf32>
    %184 = tpu.matmul %139, %183, %cst_146 {dimension_numbers = #tpu.dot_dimension_numbers<[1], [0], [0], [1], [0, 0, 1, 1], [], []>} : vector<32x32xf32>, vector<32x32xf32>, vector<32x32xf32> -> vector<32x32xf32>
    %185 = vector.extract_strided_slice %108 {offsets = [32, 0], sizes = [32, 32], strides = [1, 1]} : vector<64x32xf32> to vector<32x32xf32>
    %cst_147 = arith.constant dense<0.000000e+00> : vector<32x32xf32>
    %186 = tpu.matmul %182, %185, %cst_147 {dimension_numbers = #tpu.dot_dimension_numbers<[1], [0], [0], [1], [0, 0, 1, 1], [], []>} : vector<32x32xf32>, vector<32x32xf32>, vector<32x32xf32> -> vector<32x32xf32>
    %187 = arith.addf %184, %186 : vector<32x32xf32>
    %188 = vector.broadcast %110 : vector<1x32xf32> to vector<32x32xf32>
    %189 = arith.addf %187, %188 : vector<32x32xf32>
    %cst_148 = arith.constant 0.000000e+00 : f32
    %190 = vector.broadcast %cst_148 : f32 to vector<32x32xf32>
    %191 = arith.maximumf %189, %190 : vector<32x32xf32>
    %cst_149 = arith.constant dense<0.000000e+00> : vector<32x32xf32>
    %192 = tpu.matmul %191, %112, %cst_149 {dimension_numbers = #tpu.dot_dimension_numbers<[1], [0], [0], [1], [0, 0, 1, 1], [], []>} : vector<32x32xf32>, vector<32x32xf32>, vector<32x32xf32> -> vector<32x32xf32>
    %193 = vector.broadcast %114 : vector<1x32xf32> to vector<32x32xf32>
    %194 = arith.addf %192, %193 : vector<32x32xf32>
    %cst_150 = arith.constant 0.000000e+00 : f32
    %195 = vector.broadcast %cst_150 : f32 to vector<32x32xf32>
    %196 = arith.maximumf %194, %195 : vector<32x32xf32>
    %cst_151 = arith.constant dense<0.000000e+00> : vector<32x32xf32>
    %197 = tpu.matmul %196, %116, %cst_151 {dimension_numbers = #tpu.dot_dimension_numbers<[1], [0], [0], [1], [0, 0, 1, 1], [], []>} : vector<32x32xf32>, vector<32x32xf32>, vector<32x32xf32> -> vector<32x32xf32>
    %198 = vector.broadcast %118 : vector<1x32xf32> to vector<32x32xf32>
    %199 = arith.addf %197, %198 : vector<32x32xf32>
    %cst_152 = arith.constant dense<0.000000e+00> : vector<32xf32>
    %200 = vector.multi_reduction <add>, %199, %cst_152 [1] : vector<32x32xf32> to vector<32xf32>
    %201 = vector.shape_cast %200 : vector<32xf32> to vector<32x1xf32>
    %cst_153 = arith.constant 3.200000e+01 : f32
    %202 = vector.broadcast %cst_153 : f32 to vector<32x1xf32>
    %203 = arith.divf %201, %202 : vector<32x1xf32>
    %204 = vector.broadcast %203 : vector<32x1xf32> to vector<32x32xf32>
    %205 = arith.subf %199, %204 : vector<32x32xf32>
    %206 = arith.mulf %205, %205 : vector<32x32xf32>
    %cst_154 = arith.constant dense<0.000000e+00> : vector<32xf32>
    %207 = vector.multi_reduction <add>, %206, %cst_154 [1] : vector<32x32xf32> to vector<32xf32>
    %208 = vector.shape_cast %207 : vector<32xf32> to vector<32x1xf32>
    %cst_155 = arith.constant 3.200000e+01 : f32
    %209 = vector.broadcast %cst_155 : f32 to vector<32x1xf32>
    %210 = arith.divf %208, %209 : vector<32x1xf32>
    %211 = vector.broadcast %203 : vector<32x1xf32> to vector<32x32xf32>
    %212 = arith.subf %199, %211 : vector<32x32xf32>
    %cst_156 = arith.constant 9.99999974E-6 : f32
    %213 = vector.broadcast %cst_156 : f32 to vector<32x1xf32>
    %214 = arith.addf %210, %213 : vector<32x1xf32>
    %215 = math.rsqrt %214 : vector<32x1xf32>
    %216 = vector.broadcast %215 : vector<32x1xf32> to vector<32x32xf32>
    %217 = arith.mulf %212, %216 : vector<32x32xf32>
    %218 = vector.broadcast %120 : vector<1x32xf32> to vector<32x32xf32>
    %219 = arith.mulf %217, %218 : vector<32x32xf32>
    %220 = vector.broadcast %122 : vector<1x32xf32> to vector<32x32xf32>
    %221 = arith.addf %219, %220 : vector<32x32xf32>
    %cst_157 = arith.constant dense<0.000000e+00> : vector<16x32xf32>
    %222 = tpu.matmul %90, %221, %cst_157 {dimension_numbers = #tpu.dot_dimension_numbers<[1], [0], [0], [1], [0, 0, 1, 1], [], []>} : vector<16x32xf32>, vector<32x32xf32>, vector<16x32xf32> -> vector<16x32xf32>
    %223 = vector.extract_strided_slice %124 {offsets = [0, 0], sizes = [32, 32], strides = [1, 1]} : vector<64x32xf32> to vector<32x32xf32>
    %cst_158 = arith.constant dense<0.000000e+00> : vector<16x32xf32>
    %224 = tpu.matmul %43, %223, %cst_158 {dimension_numbers = #tpu.dot_dimension_numbers<[1], [0], [0], [1], [0, 0, 1, 1], [], []>} : vector<16x32xf32>, vector<32x32xf32>, vector<16x32xf32> -> vector<16x32xf32>
    %225 = vector.extract_strided_slice %124 {offsets = [32, 0], sizes = [32, 32], strides = [1, 1]} : vector<64x32xf32> to vector<32x32xf32>
    %cst_159 = arith.constant dense<0.000000e+00> : vector<16x32xf32>
    %226 = tpu.matmul %222, %225, %cst_159 {dimension_numbers = #tpu.dot_dimension_numbers<[1], [0], [0], [1], [0, 0, 1, 1], [], []>} : vector<16x32xf32>, vector<32x32xf32>, vector<16x32xf32> -> vector<16x32xf32>
    %227 = arith.addf %224, %226 : vector<16x32xf32>
    %228 = vector.broadcast %126 : vector<1x32xf32> to vector<16x32xf32>
    %229 = arith.addf %227, %228 : vector<16x32xf32>
    %cst_160 = arith.constant 0.000000e+00 : f32
    %230 = vector.broadcast %cst_160 : f32 to vector<16x32xf32>
    %231 = arith.maximumf %229, %230 : vector<16x32xf32>
    %cst_161 = arith.constant dense<0.000000e+00> : vector<16x32xf32>
    %232 = tpu.matmul %231, %128, %cst_161 {dimension_numbers = #tpu.dot_dimension_numbers<[1], [0], [0], [1], [0, 0, 1, 1], [], []>} : vector<16x32xf32>, vector<32x32xf32>, vector<16x32xf32> -> vector<16x32xf32>
    %233 = vector.broadcast %130 : vector<1x32xf32> to vector<16x32xf32>
    %234 = arith.addf %232, %233 : vector<16x32xf32>
    %cst_162 = arith.constant 0.000000e+00 : f32
    %235 = vector.broadcast %cst_162 : f32 to vector<16x32xf32>
    %236 = arith.maximumf %234, %235 : vector<16x32xf32>
    %cst_163 = arith.constant dense<0.000000e+00> : vector<16x32xf32>
    %237 = tpu.matmul %236, %132, %cst_163 {dimension_numbers = #tpu.dot_dimension_numbers<[1], [0], [0], [1], [0, 0, 1, 1], [], []>} : vector<16x32xf32>, vector<32x32xf32>, vector<16x32xf32> -> vector<16x32xf32>
    %238 = vector.broadcast %134 : vector<1x32xf32> to vector<16x32xf32>
    %239 = arith.addf %237, %238 : vector<16x32xf32>
    %cst_164 = arith.constant dense<0.000000e+00> : vector<16xf32>
    %240 = vector.multi_reduction <add>, %239, %cst_164 [1] : vector<16x32xf32> to vector<16xf32>
    %241 = vector.shape_cast %240 : vector<16xf32> to vector<16x1xf32>
    %cst_165 = arith.constant 3.200000e+01 : f32
    %242 = vector.broadcast %cst_165 : f32 to vector<16x1xf32>
    %243 = arith.divf %241, %242 : vector<16x1xf32>
    %244 = vector.broadcast %243 : vector<16x1xf32> to vector<16x32xf32>
    %245 = arith.subf %239, %244 : vector<16x32xf32>
    %246 = arith.mulf %245, %245 : vector<16x32xf32>
    %cst_166 = arith.constant dense<0.000000e+00> : vector<16xf32>
    %247 = vector.multi_reduction <add>, %246, %cst_166 [1] : vector<16x32xf32> to vector<16xf32>
    %248 = vector.shape_cast %247 : vector<16xf32> to vector<16x1xf32>
    %cst_167 = arith.constant 3.200000e+01 : f32
    %249 = vector.broadcast %cst_167 : f32 to vector<16x1xf32>
    %250 = arith.divf %248, %249 : vector<16x1xf32>
    %251 = vector.broadcast %243 : vector<16x1xf32> to vector<16x32xf32>
    %252 = arith.subf %239, %251 : vector<16x32xf32>
    %cst_168 = arith.constant 9.99999974E-6 : f32
    %253 = vector.broadcast %cst_168 : f32 to vector<16x1xf32>
    %254 = arith.addf %250, %253 : vector<16x1xf32>
    %255 = math.rsqrt %254 : vector<16x1xf32>
    %256 = vector.broadcast %255 : vector<16x1xf32> to vector<16x32xf32>
    %257 = arith.mulf %252, %256 : vector<16x32xf32>
    %258 = vector.broadcast %136 : vector<1x32xf32> to vector<16x32xf32>
    %259 = arith.mulf %257, %258 : vector<16x32xf32>
    %260 = vector.broadcast %138 : vector<1x32xf32> to vector<16x32xf32>
    %261 = arith.addf %259, %260 : vector<16x32xf32>
    %262 = arith.addf %261, %43 : vector<16x32xf32>
    %263 = arith.addf %182, %87 : vector<32x32xf32>
    %c1 = arith.constant 1 : index
    %c0_169 = arith.constant 0 : index
    %c0_170 = arith.constant 0 : index
    %264 = vector.load %arg21[%c1, %c0_169, %c0_170] : memref<2x96x32xf32, #tpu.memory_space<vmem>>, vector<1x96x32xf32>
    %265 = vector.shape_cast %264 : vector<1x96x32xf32> to vector<96x32xf32>
    %c1_171 = arith.constant 1 : index
    %c0_172 = arith.constant 0 : index
    %c0_173 = arith.constant 0 : index
    %266 = vector.load %arg22[%c1_171, %c0_172, %c0_173] : memref<2x1x32xf32, #tpu.memory_space<vmem>>, vector<1x1x32xf32>
    %267 = vector.shape_cast %266 : vector<1x1x32xf32> to vector<1x32xf32>
    %c1_174 = arith.constant 1 : index
    %c0_175 = arith.constant 0 : index
    %c0_176 = arith.constant 0 : index
    %268 = vector.load %arg23[%c1_174, %c0_175, %c0_176] : memref<2x32x32xf32, #tpu.memory_space<vmem>>, vector<1x32x32xf32>
    %269 = vector.shape_cast %268 : vector<1x32x32xf32> to vector<32x32xf32>
    %c1_177 = arith.constant 1 : index
    %c0_178 = arith.constant 0 : index
    %c0_179 = arith.constant 0 : index
    %270 = vector.load %arg24[%c1_177, %c0_178, %c0_179] : memref<2x1x32xf32, #tpu.memory_space<vmem>>, vector<1x1x32xf32>
    %271 = vector.shape_cast %270 : vector<1x1x32xf32> to vector<1x32xf32>
    %c1_180 = arith.constant 1 : index
    %c0_181 = arith.constant 0 : index
    %c0_182 = arith.constant 0 : index
    %272 = vector.load %arg25[%c1_180, %c0_181, %c0_182] : memref<2x32x32xf32, #tpu.memory_space<vmem>>, vector<1x32x32xf32>
    %273 = vector.shape_cast %272 : vector<1x32x32xf32> to vector<32x32xf32>
    %c1_183 = arith.constant 1 : index
    %c0_184 = arith.constant 0 : index
    %c0_185 = arith.constant 0 : index
    %274 = vector.load %arg26[%c1_183, %c0_184, %c0_185] : memref<2x1x32xf32, #tpu.memory_space<vmem>>, vector<1x1x32xf32>
    %275 = vector.shape_cast %274 : vector<1x1x32xf32> to vector<1x32xf32>
    %c1_186 = arith.constant 1 : index
    %c0_187 = arith.constant 0 : index
    %c0_188 = arith.constant 0 : index
    %276 = vector.load %arg27[%c1_186, %c0_187, %c0_188] : memref<2x1x32xf32, #tpu.memory_space<vmem>>, vector<1x1x32xf32>
    %277 = vector.shape_cast %276 : vector<1x1x32xf32> to vector<1x32xf32>
    %c1_189 = arith.constant 1 : index
    %c0_190 = arith.constant 0 : index
    %c0_191 = arith.constant 0 : index
    %278 = vector.load %arg28[%c1_189, %c0_190, %c0_191] : memref<2x1x32xf32, #tpu.memory_space<vmem>>, vector<1x1x32xf32>
    %279 = vector.shape_cast %278 : vector<1x1x32xf32> to vector<1x32xf32>
    %c1_192 = arith.constant 1 : index
    %c0_193 = arith.constant 0 : index
    %c0_194 = arith.constant 0 : index
    %280 = vector.load %arg29[%c1_192, %c0_193, %c0_194] : memref<2x64x32xf32, #tpu.memory_space<vmem>>, vector<1x64x32xf32>
    %281 = vector.shape_cast %280 : vector<1x64x32xf32> to vector<64x32xf32>
    %c1_195 = arith.constant 1 : index
    %c0_196 = arith.constant 0 : index
    %c0_197 = arith.constant 0 : index
    %282 = vector.load %arg30[%c1_195, %c0_196, %c0_197] : memref<2x1x32xf32, #tpu.memory_space<vmem>>, vector<1x1x32xf32>
    %283 = vector.shape_cast %282 : vector<1x1x32xf32> to vector<1x32xf32>
    %c1_198 = arith.constant 1 : index
    %c0_199 = arith.constant 0 : index
    %c0_200 = arith.constant 0 : index
    %284 = vector.load %arg31[%c1_198, %c0_199, %c0_200] : memref<2x32x32xf32, #tpu.memory_space<vmem>>, vector<1x32x32xf32>
    %285 = vector.shape_cast %284 : vector<1x32x32xf32> to vector<32x32xf32>
    %c1_201 = arith.constant 1 : index
    %c0_202 = arith.constant 0 : index
    %c0_203 = arith.constant 0 : index
    %286 = vector.load %arg32[%c1_201, %c0_202, %c0_203] : memref<2x1x32xf32, #tpu.memory_space<vmem>>, vector<1x1x32xf32>
    %287 = vector.shape_cast %286 : vector<1x1x32xf32> to vector<1x32xf32>
    %c1_204 = arith.constant 1 : index
    %c0_205 = arith.constant 0 : index
    %c0_206 = arith.constant 0 : index
    %288 = vector.load %arg33[%c1_204, %c0_205, %c0_206] : memref<2x32x32xf32, #tpu.memory_space<vmem>>, vector<1x32x32xf32>
    %289 = vector.shape_cast %288 : vector<1x32x32xf32> to vector<32x32xf32>
    %c1_207 = arith.constant 1 : index
    %c0_208 = arith.constant 0 : index
    %c0_209 = arith.constant 0 : index
    %290 = vector.load %arg34[%c1_207, %c0_208, %c0_209] : memref<2x1x32xf32, #tpu.memory_space<vmem>>, vector<1x1x32xf32>
    %291 = vector.shape_cast %290 : vector<1x1x32xf32> to vector<1x32xf32>
    %c1_210 = arith.constant 1 : index
    %c0_211 = arith.constant 0 : index
    %c0_212 = arith.constant 0 : index
    %292 = vector.load %arg35[%c1_210, %c0_211, %c0_212] : memref<2x1x32xf32, #tpu.memory_space<vmem>>, vector<1x1x32xf32>
    %293 = vector.shape_cast %292 : vector<1x1x32xf32> to vector<1x32xf32>
    %c1_213 = arith.constant 1 : index
    %c0_214 = arith.constant 0 : index
    %c0_215 = arith.constant 0 : index
    %294 = vector.load %arg36[%c1_213, %c0_214, %c0_215] : memref<2x1x32xf32, #tpu.memory_space<vmem>>, vector<1x1x32xf32>
    %295 = vector.shape_cast %294 : vector<1x1x32xf32> to vector<1x32xf32>
    %c1_216 = arith.constant 1 : index
    %c0_217 = arith.constant 0 : index
    %c0_218 = arith.constant 0 : index
    %296 = vector.load %arg37[%c1_216, %c0_217, %c0_218] : memref<2x64x32xf32, #tpu.memory_space<vmem>>, vector<1x64x32xf32>
    %297 = vector.shape_cast %296 : vector<1x64x32xf32> to vector<64x32xf32>
    %c1_219 = arith.constant 1 : index
    %c0_220 = arith.constant 0 : index
    %c0_221 = arith.constant 0 : index
    %298 = vector.load %arg38[%c1_219, %c0_220, %c0_221] : memref<2x1x32xf32, #tpu.memory_space<vmem>>, vector<1x1x32xf32>
    %299 = vector.shape_cast %298 : vector<1x1x32xf32> to vector<1x32xf32>
    %c1_222 = arith.constant 1 : index
    %c0_223 = arith.constant 0 : index
    %c0_224 = arith.constant 0 : index
    %300 = vector.load %arg39[%c1_222, %c0_223, %c0_224] : memref<2x32x32xf32, #tpu.memory_space<vmem>>, vector<1x32x32xf32>
    %301 = vector.shape_cast %300 : vector<1x32x32xf32> to vector<32x32xf32>
    %c1_225 = arith.constant 1 : index
    %c0_226 = arith.constant 0 : index
    %c0_227 = arith.constant 0 : index
    %302 = vector.load %arg40[%c1_225, %c0_226, %c0_227] : memref<2x1x32xf32, #tpu.memory_space<vmem>>, vector<1x1x32xf32>
    %303 = vector.shape_cast %302 : vector<1x1x32xf32> to vector<1x32xf32>
    %c1_228 = arith.constant 1 : index
    %c0_229 = arith.constant 0 : index
    %c0_230 = arith.constant 0 : index
    %304 = vector.load %arg41[%c1_228, %c0_229, %c0_230] : memref<2x32x32xf32, #tpu.memory_space<vmem>>, vector<1x32x32xf32>
    %305 = vector.shape_cast %304 : vector<1x32x32xf32> to vector<32x32xf32>
    %c1_231 = arith.constant 1 : index
    %c0_232 = arith.constant 0 : index
    %c0_233 = arith.constant 0 : index
    %306 = vector.load %arg42[%c1_231, %c0_232, %c0_233] : memref<2x1x32xf32, #tpu.memory_space<vmem>>, vector<1x1x32xf32>
    %307 = vector.shape_cast %306 : vector<1x1x32xf32> to vector<1x32xf32>
    %c1_234 = arith.constant 1 : index
    %c0_235 = arith.constant 0 : index
    %c0_236 = arith.constant 0 : index
    %308 = vector.load %arg43[%c1_234, %c0_235, %c0_236] : memref<2x1x32xf32, #tpu.memory_space<vmem>>, vector<1x1x32xf32>
    %309 = vector.shape_cast %308 : vector<1x1x32xf32> to vector<1x32xf32>
    %c1_237 = arith.constant 1 : index
    %c0_238 = arith.constant 0 : index
    %c0_239 = arith.constant 0 : index
    %310 = vector.load %arg44[%c1_237, %c0_238, %c0_239] : memref<2x1x32xf32, #tpu.memory_space<vmem>>, vector<1x1x32xf32>
    %311 = vector.shape_cast %310 : vector<1x1x32xf32> to vector<1x32xf32>
    %cst_240 = arith.constant dense<0.000000e+00> : vector<32x32xf32>
    %312 = tpu.matmul %88, %262, %cst_240 {dimension_numbers = #tpu.dot_dimension_numbers<[1], [0], [0], [1], [0, 0, 1, 1], [], []>} : vector<32x16xf32>, vector<16x32xf32>, vector<32x32xf32> -> vector<32x32xf32>
    %cst_241 = arith.constant dense<0.000000e+00> : vector<32x32xf32>
    %313 = tpu.matmul %89, %262, %cst_241 {dimension_numbers = #tpu.dot_dimension_numbers<[1], [0], [0], [1], [0, 0, 1, 1], [], []>} : vector<32x16xf32>, vector<16x32xf32>, vector<32x32xf32> -> vector<32x32xf32>
    %314 = vector.extract_strided_slice %265 {offsets = [0, 0], sizes = [32, 32], strides = [1, 1]} : vector<96x32xf32> to vector<32x32xf32>
    %cst_242 = arith.constant dense<0.000000e+00> : vector<32x32xf32>
    %315 = tpu.matmul %312, %314, %cst_242 {dimension_numbers = #tpu.dot_dimension_numbers<[1], [0], [0], [1], [0, 0, 1, 1], [], []>} : vector<32x32xf32>, vector<32x32xf32>, vector<32x32xf32> -> vector<32x32xf32>
    %316 = vector.extract_strided_slice %265 {offsets = [32, 0], sizes = [32, 32], strides = [1, 1]} : vector<96x32xf32> to vector<32x32xf32>
    %cst_243 = arith.constant dense<0.000000e+00> : vector<32x32xf32>
    %317 = tpu.matmul %313, %316, %cst_243 {dimension_numbers = #tpu.dot_dimension_numbers<[1], [0], [0], [1], [0, 0, 1, 1], [], []>} : vector<32x32xf32>, vector<32x32xf32>, vector<32x32xf32> -> vector<32x32xf32>
    %318 = arith.addf %315, %317 : vector<32x32xf32>
    %319 = vector.extract_strided_slice %265 {offsets = [64, 0], sizes = [32, 32], strides = [1, 1]} : vector<96x32xf32> to vector<32x32xf32>
    %cst_244 = arith.constant dense<0.000000e+00> : vector<32x32xf32>
    %320 = tpu.matmul %263, %319, %cst_244 {dimension_numbers = #tpu.dot_dimension_numbers<[1], [0], [0], [1], [0, 0, 1, 1], [], []>} : vector<32x32xf32>, vector<32x32xf32>, vector<32x32xf32> -> vector<32x32xf32>
    %321 = arith.addf %318, %320 : vector<32x32xf32>
    %322 = vector.broadcast %267 : vector<1x32xf32> to vector<32x32xf32>
    %323 = arith.addf %321, %322 : vector<32x32xf32>
    %cst_245 = arith.constant 0.000000e+00 : f32
    %324 = vector.broadcast %cst_245 : f32 to vector<32x32xf32>
    %325 = arith.maximumf %323, %324 : vector<32x32xf32>
    %cst_246 = arith.constant dense<0.000000e+00> : vector<32x32xf32>
    %326 = tpu.matmul %325, %269, %cst_246 {dimension_numbers = #tpu.dot_dimension_numbers<[1], [0], [0], [1], [0, 0, 1, 1], [], []>} : vector<32x32xf32>, vector<32x32xf32>, vector<32x32xf32> -> vector<32x32xf32>
    %327 = vector.broadcast %271 : vector<1x32xf32> to vector<32x32xf32>
    %328 = arith.addf %326, %327 : vector<32x32xf32>
    %cst_247 = arith.constant 0.000000e+00 : f32
    %329 = vector.broadcast %cst_247 : f32 to vector<32x32xf32>
    %330 = arith.maximumf %328, %329 : vector<32x32xf32>
    %cst_248 = arith.constant dense<0.000000e+00> : vector<32x32xf32>
    %331 = tpu.matmul %330, %273, %cst_248 {dimension_numbers = #tpu.dot_dimension_numbers<[1], [0], [0], [1], [0, 0, 1, 1], [], []>} : vector<32x32xf32>, vector<32x32xf32>, vector<32x32xf32> -> vector<32x32xf32>
    %332 = vector.broadcast %275 : vector<1x32xf32> to vector<32x32xf32>
    %333 = arith.addf %331, %332 : vector<32x32xf32>
    %cst_249 = arith.constant dense<0.000000e+00> : vector<32xf32>
    %334 = vector.multi_reduction <add>, %333, %cst_249 [1] : vector<32x32xf32> to vector<32xf32>
    %335 = vector.shape_cast %334 : vector<32xf32> to vector<32x1xf32>
    %cst_250 = arith.constant 3.200000e+01 : f32
    %336 = vector.broadcast %cst_250 : f32 to vector<32x1xf32>
    %337 = arith.divf %335, %336 : vector<32x1xf32>
    %338 = vector.broadcast %337 : vector<32x1xf32> to vector<32x32xf32>
    %339 = arith.subf %333, %338 : vector<32x32xf32>
    %340 = arith.mulf %339, %339 : vector<32x32xf32>
    %cst_251 = arith.constant dense<0.000000e+00> : vector<32xf32>
    %341 = vector.multi_reduction <add>, %340, %cst_251 [1] : vector<32x32xf32> to vector<32xf32>
    %342 = vector.shape_cast %341 : vector<32xf32> to vector<32x1xf32>
    %cst_252 = arith.constant 3.200000e+01 : f32
    %343 = vector.broadcast %cst_252 : f32 to vector<32x1xf32>
    %344 = arith.divf %342, %343 : vector<32x1xf32>
    %345 = vector.broadcast %337 : vector<32x1xf32> to vector<32x32xf32>
    %346 = arith.subf %333, %345 : vector<32x32xf32>
    %cst_253 = arith.constant 9.99999974E-6 : f32
    %347 = vector.broadcast %cst_253 : f32 to vector<32x1xf32>
    %348 = arith.addf %344, %347 : vector<32x1xf32>
    %349 = math.rsqrt %348 : vector<32x1xf32>
    %350 = vector.broadcast %349 : vector<32x1xf32> to vector<32x32xf32>
    %351 = arith.mulf %346, %350 : vector<32x32xf32>
    %352 = vector.broadcast %277 : vector<1x32xf32> to vector<32x32xf32>
    %353 = arith.mulf %351, %352 : vector<32x32xf32>
    %354 = vector.broadcast %279 : vector<1x32xf32> to vector<32x32xf32>
    %355 = arith.addf %353, %354 : vector<32x32xf32>
    %356 = vector.extract_strided_slice %281 {offsets = [0, 0], sizes = [32, 32], strides = [1, 1]} : vector<64x32xf32> to vector<32x32xf32>
    %cst_254 = arith.constant dense<0.000000e+00> : vector<32x32xf32>
    %357 = tpu.matmul %312, %356, %cst_254 {dimension_numbers = #tpu.dot_dimension_numbers<[1], [0], [0], [1], [0, 0, 1, 1], [], []>} : vector<32x32xf32>, vector<32x32xf32>, vector<32x32xf32> -> vector<32x32xf32>
    %358 = vector.extract_strided_slice %281 {offsets = [32, 0], sizes = [32, 32], strides = [1, 1]} : vector<64x32xf32> to vector<32x32xf32>
    %cst_255 = arith.constant dense<0.000000e+00> : vector<32x32xf32>
    %359 = tpu.matmul %355, %358, %cst_255 {dimension_numbers = #tpu.dot_dimension_numbers<[1], [0], [0], [1], [0, 0, 1, 1], [], []>} : vector<32x32xf32>, vector<32x32xf32>, vector<32x32xf32> -> vector<32x32xf32>
    %360 = arith.addf %357, %359 : vector<32x32xf32>
    %361 = vector.broadcast %283 : vector<1x32xf32> to vector<32x32xf32>
    %362 = arith.addf %360, %361 : vector<32x32xf32>
    %cst_256 = arith.constant 0.000000e+00 : f32
    %363 = vector.broadcast %cst_256 : f32 to vector<32x32xf32>
    %364 = arith.maximumf %362, %363 : vector<32x32xf32>
    %cst_257 = arith.constant dense<0.000000e+00> : vector<32x32xf32>
    %365 = tpu.matmul %364, %285, %cst_257 {dimension_numbers = #tpu.dot_dimension_numbers<[1], [0], [0], [1], [0, 0, 1, 1], [], []>} : vector<32x32xf32>, vector<32x32xf32>, vector<32x32xf32> -> vector<32x32xf32>
    %366 = vector.broadcast %287 : vector<1x32xf32> to vector<32x32xf32>
    %367 = arith.addf %365, %366 : vector<32x32xf32>
    %cst_258 = arith.constant 0.000000e+00 : f32
    %368 = vector.broadcast %cst_258 : f32 to vector<32x32xf32>
    %369 = arith.maximumf %367, %368 : vector<32x32xf32>
    %cst_259 = arith.constant dense<0.000000e+00> : vector<32x32xf32>
    %370 = tpu.matmul %369, %289, %cst_259 {dimension_numbers = #tpu.dot_dimension_numbers<[1], [0], [0], [1], [0, 0, 1, 1], [], []>} : vector<32x32xf32>, vector<32x32xf32>, vector<32x32xf32> -> vector<32x32xf32>
    %371 = vector.broadcast %291 : vector<1x32xf32> to vector<32x32xf32>
    %372 = arith.addf %370, %371 : vector<32x32xf32>
    %cst_260 = arith.constant dense<0.000000e+00> : vector<32xf32>
    %373 = vector.multi_reduction <add>, %372, %cst_260 [1] : vector<32x32xf32> to vector<32xf32>
    %374 = vector.shape_cast %373 : vector<32xf32> to vector<32x1xf32>
    %cst_261 = arith.constant 3.200000e+01 : f32
    %375 = vector.broadcast %cst_261 : f32 to vector<32x1xf32>
    %376 = arith.divf %374, %375 : vector<32x1xf32>
    %377 = vector.broadcast %376 : vector<32x1xf32> to vector<32x32xf32>
    %378 = arith.subf %372, %377 : vector<32x32xf32>
    %379 = arith.mulf %378, %378 : vector<32x32xf32>
    %cst_262 = arith.constant dense<0.000000e+00> : vector<32xf32>
    %380 = vector.multi_reduction <add>, %379, %cst_262 [1] : vector<32x32xf32> to vector<32xf32>
    %381 = vector.shape_cast %380 : vector<32xf32> to vector<32x1xf32>
    %cst_263 = arith.constant 3.200000e+01 : f32
    %382 = vector.broadcast %cst_263 : f32 to vector<32x1xf32>
    %383 = arith.divf %381, %382 : vector<32x1xf32>
    %384 = vector.broadcast %376 : vector<32x1xf32> to vector<32x32xf32>
    %385 = arith.subf %372, %384 : vector<32x32xf32>
    %cst_264 = arith.constant 9.99999974E-6 : f32
    %386 = vector.broadcast %cst_264 : f32 to vector<32x1xf32>
    %387 = arith.addf %383, %386 : vector<32x1xf32>
    %388 = math.rsqrt %387 : vector<32x1xf32>
    %389 = vector.broadcast %388 : vector<32x1xf32> to vector<32x32xf32>
    %390 = arith.mulf %385, %389 : vector<32x32xf32>
    %391 = vector.broadcast %293 : vector<1x32xf32> to vector<32x32xf32>
    %392 = arith.mulf %390, %391 : vector<32x32xf32>
    %393 = vector.broadcast %295 : vector<1x32xf32> to vector<32x32xf32>
    %394 = arith.addf %392, %393 : vector<32x32xf32>
    %cst_265 = arith.constant dense<0.000000e+00> : vector<16x32xf32>
    %395 = tpu.matmul %90, %394, %cst_265 {dimension_numbers = #tpu.dot_dimension_numbers<[1], [0], [0], [1], [0, 0, 1, 1], [], []>} : vector<16x32xf32>, vector<32x32xf32>, vector<16x32xf32> -> vector<16x32xf32>
    %396 = vector.extract_strided_slice %297 {offsets = [0, 0], sizes = [32, 32], strides = [1, 1]} : vector<64x32xf32> to vector<32x32xf32>
    %cst_266 = arith.constant dense<0.000000e+00> : vector<16x32xf32>
    %397 = tpu.matmul %262, %396, %cst_266 {dimension_numbers = #tpu.dot_dimension_numbers<[1], [0], [0], [1], [0, 0, 1, 1], [], []>} : vector<16x32xf32>, vector<32x32xf32>, vector<16x32xf32> -> vector<16x32xf32>
    %398 = vector.extract_strided_slice %297 {offsets = [32, 0], sizes = [32, 32], strides = [1, 1]} : vector<64x32xf32> to vector<32x32xf32>
    %cst_267 = arith.constant dense<0.000000e+00> : vector<16x32xf32>
    %399 = tpu.matmul %395, %398, %cst_267 {dimension_numbers = #tpu.dot_dimension_numbers<[1], [0], [0], [1], [0, 0, 1, 1], [], []>} : vector<16x32xf32>, vector<32x32xf32>, vector<16x32xf32> -> vector<16x32xf32>
    %400 = arith.addf %397, %399 : vector<16x32xf32>
    %401 = vector.broadcast %299 : vector<1x32xf32> to vector<16x32xf32>
    %402 = arith.addf %400, %401 : vector<16x32xf32>
    %cst_268 = arith.constant 0.000000e+00 : f32
    %403 = vector.broadcast %cst_268 : f32 to vector<16x32xf32>
    %404 = arith.maximumf %402, %403 : vector<16x32xf32>
    %cst_269 = arith.constant dense<0.000000e+00> : vector<16x32xf32>
    %405 = tpu.matmul %404, %301, %cst_269 {dimension_numbers = #tpu.dot_dimension_numbers<[1], [0], [0], [1], [0, 0, 1, 1], [], []>} : vector<16x32xf32>, vector<32x32xf32>, vector<16x32xf32> -> vector<16x32xf32>
    %406 = vector.broadcast %303 : vector<1x32xf32> to vector<16x32xf32>
    %407 = arith.addf %405, %406 : vector<16x32xf32>
    %cst_270 = arith.constant 0.000000e+00 : f32
    %408 = vector.broadcast %cst_270 : f32 to vector<16x32xf32>
    %409 = arith.maximumf %407, %408 : vector<16x32xf32>
    %cst_271 = arith.constant dense<0.000000e+00> : vector<16x32xf32>
    %410 = tpu.matmul %409, %305, %cst_271 {dimension_numbers = #tpu.dot_dimension_numbers<[1], [0], [0], [1], [0, 0, 1, 1], [], []>} : vector<16x32xf32>, vector<32x32xf32>, vector<16x32xf32> -> vector<16x32xf32>
    %411 = vector.broadcast %307 : vector<1x32xf32> to vector<16x32xf32>
    %412 = arith.addf %410, %411 : vector<16x32xf32>
    %cst_272 = arith.constant dense<0.000000e+00> : vector<16xf32>
    %413 = vector.multi_reduction <add>, %412, %cst_272 [1] : vector<16x32xf32> to vector<16xf32>
    %414 = vector.shape_cast %413 : vector<16xf32> to vector<16x1xf32>
    %cst_273 = arith.constant 3.200000e+01 : f32
    %415 = vector.broadcast %cst_273 : f32 to vector<16x1xf32>
    %416 = arith.divf %414, %415 : vector<16x1xf32>
    %417 = vector.broadcast %416 : vector<16x1xf32> to vector<16x32xf32>
    %418 = arith.subf %412, %417 : vector<16x32xf32>
    %419 = arith.mulf %418, %418 : vector<16x32xf32>
    %cst_274 = arith.constant dense<0.000000e+00> : vector<16xf32>
    %420 = vector.multi_reduction <add>, %419, %cst_274 [1] : vector<16x32xf32> to vector<16xf32>
    %421 = vector.shape_cast %420 : vector<16xf32> to vector<16x1xf32>
    %cst_275 = arith.constant 3.200000e+01 : f32
    %422 = vector.broadcast %cst_275 : f32 to vector<16x1xf32>
    %423 = arith.divf %421, %422 : vector<16x1xf32>
    %424 = vector.broadcast %416 : vector<16x1xf32> to vector<16x32xf32>
    %425 = arith.subf %412, %424 : vector<16x32xf32>
    %cst_276 = arith.constant 9.99999974E-6 : f32
    %426 = vector.broadcast %cst_276 : f32 to vector<16x1xf32>
    %427 = arith.addf %423, %426 : vector<16x1xf32>
    %428 = math.rsqrt %427 : vector<16x1xf32>
    %429 = vector.broadcast %428 : vector<16x1xf32> to vector<16x32xf32>
    %430 = arith.mulf %425, %429 : vector<16x32xf32>
    %431 = vector.broadcast %309 : vector<1x32xf32> to vector<16x32xf32>
    %432 = arith.mulf %430, %431 : vector<16x32xf32>
    %433 = vector.broadcast %311 : vector<1x32xf32> to vector<16x32xf32>
    %434 = arith.addf %432, %433 : vector<16x32xf32>
    %435 = arith.addf %434, %262 : vector<16x32xf32>
    %c0_277 = arith.constant 0 : index
    %c0_278 = arith.constant 0 : index
    %436 = vector.load %arg45[%c0_277, %c0_278] : memref<32x32xf32, #tpu.memory_space<vmem>>, vector<32x32xf32>
    %c0_279 = arith.constant 0 : index
    %c0_280 = arith.constant 0 : index
    %437 = vector.load %arg46[%c0_279, %c0_280] : memref<1x32xf32, #tpu.memory_space<vmem>>, vector<1x32xf32>
    %c0_281 = arith.constant 0 : index
    %c0_282 = arith.constant 0 : index
    %438 = vector.load %arg47[%c0_281, %c0_282] : memref<32x32xf32, #tpu.memory_space<vmem>>, vector<32x32xf32>
    %c0_283 = arith.constant 0 : index
    %c0_284 = arith.constant 0 : index
    %439 = vector.load %arg48[%c0_283, %c0_284] : memref<1x32xf32, #tpu.memory_space<vmem>>, vector<1x32xf32>
    %c0_285 = arith.constant 0 : index
    %c0_286 = arith.constant 0 : index
    %440 = vector.load %arg49[%c0_285, %c0_286] : memref<32x4xf32, #tpu.memory_space<vmem>>, vector<32x4xf32>
    %c0_287 = arith.constant 0 : index
    %c0_288 = arith.constant 0 : index
    %441 = vector.load %arg50[%c0_287, %c0_288] : memref<1x4xf32, #tpu.memory_space<vmem>>, vector<1x4xf32>
    %cst_289 = arith.constant dense<0.000000e+00> : vector<16x32xf32>
    %442 = tpu.matmul %435, %436, %cst_289 {dimension_numbers = #tpu.dot_dimension_numbers<[1], [0], [0], [1], [0, 0, 1, 1], [], []>} : vector<16x32xf32>, vector<32x32xf32>, vector<16x32xf32> -> vector<16x32xf32>
    %443 = vector.broadcast %437 : vector<1x32xf32> to vector<16x32xf32>
    %444 = arith.addf %442, %443 : vector<16x32xf32>
    %cst_290 = arith.constant 0.000000e+00 : f32
    %445 = vector.broadcast %cst_290 : f32 to vector<16x32xf32>
    %446 = arith.maximumf %444, %445 : vector<16x32xf32>
    %cst_291 = arith.constant dense<0.000000e+00> : vector<16x32xf32>
    %447 = tpu.matmul %446, %438, %cst_291 {dimension_numbers = #tpu.dot_dimension_numbers<[1], [0], [0], [1], [0, 0, 1, 1], [], []>} : vector<16x32xf32>, vector<32x32xf32>, vector<16x32xf32> -> vector<16x32xf32>
    %448 = vector.broadcast %439 : vector<1x32xf32> to vector<16x32xf32>
    %449 = arith.addf %447, %448 : vector<16x32xf32>
    %cst_292 = arith.constant 0.000000e+00 : f32
    %450 = vector.broadcast %cst_292 : f32 to vector<16x32xf32>
    %451 = arith.maximumf %449, %450 : vector<16x32xf32>
    %cst_293 = arith.constant dense<0.000000e+00> : vector<16x4xf32>
    %452 = tpu.matmul %451, %440, %cst_293 {dimension_numbers = #tpu.dot_dimension_numbers<[1], [0], [0], [1], [0, 0, 1, 1], [], []>} : vector<16x32xf32>, vector<32x4xf32>, vector<16x4xf32> -> vector<16x4xf32>
    %453 = vector.broadcast %441 : vector<1x4xf32> to vector<16x4xf32>
    %454 = arith.addf %452, %453 : vector<16x4xf32>
    %c0_294 = arith.constant 0 : index
    %c0_295 = arith.constant 0 : index
    %455 = vector.load %arg51[%c0_294, %c0_295] : memref<16x4xf32, #tpu.memory_space<vmem>>, vector<16x4xf32>
    tpu.vector_store %arg51[%c0_294, %c0_295], %454 {strides = array<i32>} : memref<16x4xf32, #tpu.memory_space<vmem>>, vector<16x4xf32>,
    return
  }
}

</mosaic_0001>

<bundles_post_ra>
// kernel: encode_process_decode_forward.1
= control target key start
LH: loop header
LB: loop body
LE: loop exit
PB: predicated region body
PF: predicated region fallthrough
CT: control target
= control target key end

     0   :  { %s6655_s6 = smov 1   ;;  %s6656_s10 = smov 2   ;;  %s7501_s0 = inlined_call_operand.smem [shape: u32[52], index: -1, kind: input, shape index: {}] }
   0x1   :  { %s6722_s5 = sld [smem:[%s7501_s0]]   ;;  %s6657_s14 = smov 3  }
   0x2   :  { %s6727_s9 = sld [smem:[%s7501_s0 + %s6655_s6]]   ;;  %s6658_s18 = smov 4  }
   0x3   :  { %s6732_s13 = sld [smem:[%s7501_s0 + %s6656_s10]]   ;;  %s6659_s22 = smov 5  }
   0x4   :  { %s6737_s17 = sld [smem:[%s7501_s0 + %s6657_s14]]   ;;  %s6660_s26 = smov 6  }
   0x5   :  { %s6742_s21 = sld [smem:[%s7501_s0 + %s6658_s18]]   ;;  %s6661_s30 = smov 7  }
   0x6   :  { %s6747_s25 = sld [smem:[%s7501_s0 + %s6659_s22]]   ;;  %s6662_s4 = smov 8  }
   0x7   :  { %s6752_s29 = sld [smem:[%s7501_s0 + %s6660_s26]]   ;;  %s6663_s10 = smov 9  }
   0x8   :  { %s6757_s3 = sld [smem:[%s7501_s0 + %s6661_s30]]   ;;  %s6664_s15 = smov 10  }
   0x9   :  { %7532 = sst [smem:[#allocation20_spill]] %s6732_s13  ;;  %s6665_s20 = smov 11  }
   0xa   :  { %7533 = sst [smem:[#allocation21_spill]] %s6737_s17  ;;  %s6666_s26 = smov 12  }
   0xb   :  { %7534 = sst [smem:[#allocation22_spill]] %s6742_s21  ;;  %s6667_s1 = smov 13  }
   0xc   :  { %s6762_s8 = sld [smem:[%s7501_s0 + %s6662_s4]]   ;;  %s6668_s7 = smov 14  }
   0xd   :  { %s6767_s14 = sld [smem:[%s7501_s0 + %s6663_s10]]   ;;  %s6670_s22 = smov 16  }
   0xe   :  { %s6772_s19 = sld [smem:[%s7501_s0 + %s6664_s15]]   ;;  %s6669_s15 = smov 15  }
   0xf   :  { %s6777_s24 = sld [smem:[%s7501_s0 + %s6665_s20]]   ;;  %s6671_s28 = smov 17  }
  0x10   :  { %s6782_s30 = sld [smem:[%s7501_s0 + %s6666_s26]]  }
  0x11   :  { %s6787_s6 = sld [smem:[%s7501_s0 + %s6667_s1]]  }
  0x12   :  { %7535 = sst [smem:[#allocation23_spill]] %s6762_s8 }
  0x13   :  { %s6792_s12 = sld [smem:[%s7501_s0 + %s6668_s7]]   ;;  %s6672_s7 = smov 18  }
  0x14   :  { %7536 = sst [smem:[#allocation24_spill]] %s6772_s19 }
  0x15   :  { %7537 = sst [smem:[#allocation25_spill]] %s6777_s24 }
  0x16   :  { %7538 = sst [smem:[#allocation26_spill]] %s6782_s30 }
  0x17   :  { %s6797_s20 = sld [smem:[%s7501_s0 + %s6669_s15]]   ;;  %s6673_s15 = smov 19  }
  0x18   :  { %s6802_s27 = sld [smem:[%s7501_s0 + %s6670_s22]]   ;;  %s6674_s22 = smov 20  }
  0x19   :  { %s6807_s4 = sld [smem:[%s7501_s0 + %s6671_s28]]   ;;  %s6675_s28 = smov 21  }
  0x1a   :  { %s6812_s21 = sld [smem:[%s7501_s0 + %s6672_s7]]   ;;  %s6676_s7 = smov 22  }
  0x1b   :  { %s6817_s30 = sld [smem:[%s7501_s0 + %s6673_s15]]   ;;  %s6677_s15 = smov 23  }
  0x1c   :  { %s6822_s24 = sld [smem:[%s7501_s0 + %s6674_s22]]   ;;  %s6678_s22 = smov 24  }
  0x1d   :  { %s6827_s13 = sld [smem:[%s7501_s0 + %s6675_s28]]   ;;  %s6679_s28 = smov 25  }
  0x1e   :  { %s6832_s17 = sld [smem:[%s7501_s0 + %s6676_s7]]   ;;  %s6680_s7 = smov 26  }
  0x1f   :  { %7539 = sst [smem:[#allocation27_spill]] %s6807_s4 }
  0x20   :  { %s6837_s19 = sld [smem:[%s7501_s0 + %s6677_s15]]   ;;  %s6681_s15 = smov 27  }
  0x21   :  { %s6842_s4 = sld [smem:[%s7501_s0 + %s6678_s22]]   ;;  %s6682_s22 = smov 28  }
  0x23   :  { %7540 = sst [smem:[#allocation28_spill]] %s6827_s13 }
  0x24   :  { %7541 = sst [smem:[#allocation29_spill]] %s6832_s17 }
  0x25   :  { %s6847_s13 = sld [smem:[%s7501_s0 + %s6679_s28]]   ;;  %s6683_s28 = smov 29  }
  0x26   :  { %7542 = sst [smem:[#allocation30_spill]] %s6837_s19 }
  0x27   :  { %7543 = sst [smem:[#allocation31_spill]] %s6842_s4 }
  0x28   :  { %s6852_s17 = sld [smem:[%s7501_s0 + %s6680_s7]]   ;;  %s6684_s7 = smov 30  }
  0x29   :  { %s6857_s19 = sld [smem:[%s7501_s0 + %s6681_s15]]   ;;  %s6685_s15 = smov 31  }
  0x2a   :  { %s6862_s4 = sld [smem:[%s7501_s0 + %s6682_s22]]   ;;  %s6686_s22 = smov 32  }
  0x2b   :  { %7544 = sst [smem:[#allocation32_spill]] %s6847_s13 }
  0x2c   :  { %s6867_s13 = sld [smem:[%s7501_s0 + %s6683_s28]]   ;;  %s6687_s28 = smov 33  }
  0x2e   :  { %7545 = sst [smem:[#allocation33_spill]] %s6852_s17 }
  0x2f   :  { %7546 = sst [smem:[#allocation34_spill]] %s6857_s19 }
  0x30   :  { %7547 = sst [smem:[#allocation35_spill]] %s6862_s4 }
  0x31   :  { %s6872_s17 = sld [smem:[%s7501_s0 + %s6684_s7]]   ;;  %s6688_s7 = smov 34  }
  0x32   :  { %7548 = sst [smem:[#allocation36_spill]] %s6867_s13 }
  0x33   :  { %s6877_s19 = sld [smem:[%s7501_s0 + %s6685_s15]]   ;;  %s6689_s15 = smov 35  }
  0x34   :  { %s6882_s4 = sld [smem:[%s7501_s0 + %s6686_s22]]   ;;  %s6690_s22 = smov 36  }
  0x35   :  { %s6887_s13 = sld [smem:[%s7501_s0 + %s6687_s28]]   ;;  %s6691_s28 = smov 37  }
  0x37   :  { %7549 = sst [smem:[#allocation37_spill]] %s6872_s17 }
  0x38   :  { %s6892_s17 = sld [smem:[%s7501_s0 + %s6688_s7]]   ;;  %s6692_s7 = smov 38  }
  0x39   :  { %7550 = sst [smem:[#allocation38_spill]] %s6877_s19 }
  0x3a   :  { %7551 = sst [smem:[#allocation39_spill]] %s6882_s4 }
  0x3b   :  { %7552 = sst [smem:[#allocation40_spill]] %s6887_s13 }
  0x3c   :  { %s6897_s19 = sld [smem:[%s7501_s0 + %s6689_s15]]   ;;  %s6693_s15 = smov 39  }
  0x3d   :  { %s6902_s4 = sld [smem:[%s7501_s0 + %s6690_s22]]   ;;  %s6694_s22 = smov 40  }
  0x3e   :  { %7553 = sst [smem:[#allocation41_spill]] %s6892_s17 }
  0x3f   :  { %s6907_s13 = sld [smem:[%s7501_s0 + %s6691_s28]]   ;;  %s6695_s28 = smov 41  }
  0x40   :  { %s6912_s17 = sld [smem:[%s7501_s0 + %s6692_s7]]   ;;  %s6696_s7 = smov 42  }
  0x42   :  { %7554 = sst [smem:[#allocation42_spill]] %s6897_s19 }
  0x43   :  { %7555 = sst [smem:[#allocation43_spill]] %s6902_s4 }
  0x44   :  { %s6917_s19 = sld [smem:[%s7501_s0 + %s6693_s15]]   ;;  %s6697_s15 = smov 43  }
  0x45   :  { %7556 = sst [smem:[#allocation44_spill]] %s6907_s13 }
  0x46   :  { %7557 = sst [smem:[#allocation45_spill]] %s6912_s17 }
  0x47   :  { %s6922_s4 = sld [smem:[%s7501_s0 + %s6694_s22]]   ;;  %s6698_s22 = smov 44  }
  0x48   :  { %s6927_s13 = sld [smem:[%s7501_s0 + %s6695_s28]]   ;;  %s6699_s28 = smov 45  }
  0x49   :  { %s6932_s17 = sld [smem:[%s7501_s0 + %s6696_s7]]   ;;  %s6700_s7 = smov 46  }
  0x4a   :  { %7558 = sst [smem:[#allocation46_spill]] %s6917_s19 }
  0x4b   :  { %s6937_s19 = sld [smem:[%s7501_s0 + %s6697_s15]]   ;;  %s6701_s15 = smov 47  }
  0x4d   :  { %7559 = sst [smem:[#allocation47_spill]] %s6922_s4 }
  0x4e   :  { %7560 = sst [smem:[#allocation48_spill]] %s6927_s13 }
  0x4f   :  { %7561 = sst [smem:[#allocation49_spill]] %s6932_s17 }
  0x50   :  { %s6942_s4 = sld [smem:[%s7501_s0 + %s6698_s22]]   ;;  %s6702_s22 = smov 48  }
  0x51   :  { %7562 = sst [smem:[#allocation50_spill]] %s6937_s19 }
  0x52   :  { %s6947_s13 = sld [smem:[%s7501_s0 + %s6699_s28]]   ;;  %s6703_s28 = smov 49  }
  0x53   :  { %s6952_s17 = sld [smem:[%s7501_s0 + %s6700_s7]]   ;;  %s6704_s7 = smov 50  }
  0x54   :  { %s6957_s19 = sld [smem:[%s7501_s0 + %s6701_s15]]   ;;  %s6705_s15 = smov 51  }
  0x55   :  { %s6972_s8 = sld [smem:[%s7501_s0 + %s6704_s7]]  }
  0x56   :  { %7563 = sst [smem:[#allocation51_spill]] %s6942_s4 }
  0x57   :  { %s6962_s4 = sld [smem:[%s7501_s0 + %s6702_s22]]  }
  0x58   :  { %7564 = sst [smem:[#allocation52_spill]] %s6947_s13 }
  0x59   :  { %s6967_s13 = sld [smem:[%s7501_s0 + %s6703_s28]]  }
  0x5a   :  { %7565 = sst [smem:[#allocation53_spill]] %s6957_s19 }
  0x5b   :  { %s6977_s19 = sld [smem:[%s7501_s0 + %s6705_s15]]  }
  0x5c   :  { %108 = vsyncpa [#allocation3], 0 }
  0x5d   :  { %109 = vsyncpa [#allocation5], 0 }
  0x5e   :  { %110 = vsyncpa [#allocation8], 0 }
  0x5f   :  { %111 = vsyncpa [#allocation11], 0 }
  0x60   :  { %112 = vsyncpa [#allocation14], 0  ;;  %s6706_s22 = smov [#allocation4]   ;;  %s6707_s26 = smov [#allocation7]  }
  0x61   :  { %s159_s23 = sshll.u32 %s6706_s22, 4  ;;  %s181_s28 = sshll.u32 %s6707_s26, 4  ;;  %s160_s23 = int_to_ptr.vmem [resolvable:$true] %s159_s23  ;;  %s182_s28 = int_to_ptr.vmem [resolvable:$true] %s181_s28 }
  0x62   :  { %s6469_s1 = scalar_lea.hbm %s6802_s27, 16 }
  0x63   :  { %p6470_p0 = scmp.ne.s32.totalorder %s6802_s27, %s6469_s1  ;;  %p6473_p1 = scmp.lt.u32.totalorder %s6469_s1, %s6802_s27 }
  0x65   :  { %p6475_p2 = pnand %p6473_p1, %p6470_p0 }
  0x67   :  { %6478 = shalt.err (!%p6475_p2)
}
  0x68   :  { %s6479_s0 = scalar_lea.vmem %s160_s23, 16  ;;  %s6483_s2 = scalar_lea.vmem %s160_s23, 32 }
  0x69   :  { %p6480_p3 = scmp.ne.s32.totalorder %s160_s23, %s6479_s0  ;;  %p6484_p4 = scmp.lt.s32.totalorder %s160_s23, %s160_s23 }
  0x6a   :  { %p6485_p5 = scmp.lt.s32.totalorder %s6483_s2, %s6479_s0 }
  0x6c   :  { %p6486_p6 = por %p6485_p5, %p6484_p4 }
  0x6e   :  { %p6487_p7 = pnand %p6486_p6, %p6480_p3 }
  0x70   :  { %6490 = shalt.err (!%p6487_p7)
}
  0x71   :  { %162 = dma.hbm_to_vmem [thread:$0]  %s6802_s27, 16, %s160_s23, [#allocation5]  }
  0x72   :  { %s6491_s7 = scalar_lea.hbm %s6817_s30, 16 }
  0x73   :  { %p6492_p8 = scmp.ne.s32.totalorder %s6817_s30, %s6491_s7  ;;  %p6495_p9 = scmp.lt.u32.totalorder %s6491_s7, %s6817_s30 }
  0x75   :  { %p6497_p10 = pnand %p6495_p9, %p6492_p8 }
  0x77   :  { %6500 = shalt.err (!%p6497_p10)
}
  0x78   :  { %s6501_s10 = scalar_lea.vmem %s182_s28, 16  ;;  %s6505_s11 = scalar_lea.vmem %s182_s28, 32 }
  0x79   :  { %p6502_p11 = scmp.ne.s32.totalorder %s182_s28, %s6501_s10  ;;  %p6506_p12 = scmp.lt.s32.totalorder %s182_s28, %s182_s28 }
  0x7a   :  { %p6507_p13 = scmp.lt.s32.totalorder %s6505_s11, %s6501_s10 }
  0x7c   :  { %p6508_p0 = por %p6507_p13, %p6506_p12 }
  0x7e   :  { %p6509_p1 = pnand %p6508_p0, %p6502_p11 }
  0x80   :  { %6512 = shalt.err (!%p6509_p1)
}
  0x81   :  { %184 = dma.hbm_to_vmem [thread:$0]  %s6817_s30, 16, %s182_s28, [#allocation8]  }
  0x82   :  { %s6708_s15 = smov [#allocation10]   ;;  %s6709_s16 = smov [#allocation2]  }
  0x83   :  { %s251_s27 = sshll.u32 %s6708_s15, 4  ;;  %s147_s18 = sshll.u32 %s6709_s16, 4  ;;  %s252_s27 = int_to_ptr.vmem [resolvable:$true] %s251_s27  ;;  %s148_s18 = int_to_ptr.vmem [resolvable:$true] %s147_s18 }
  0x84   :  { %s6513_s22 = scalar_lea.hbm %s6952_s17, 16 }
  0x85   :  { %p6514_p2 = scmp.ne.s32.totalorder %s6952_s17, %s6513_s22  ;;  %p6517_p3 = scmp.lt.u32.totalorder %s6513_s22, %s6952_s17 }
  0x87   :  { %p6519_p4 = pnand %p6517_p3, %p6514_p2 }
  0x89   :  { %6522 = shalt.err (!%p6519_p4)
}
  0x8a   :  { %s6523_s23 = scalar_lea.vmem %s252_s27, 16  ;;  %s6527_s26 = scalar_lea.vmem %s252_s27, 32 }
  0x8b   :  { %p6524_p5 = scmp.ne.s32.totalorder %s252_s27, %s6523_s23  ;;  %p6528_p6 = scmp.lt.s32.totalorder %s252_s27, %s252_s27 }
  0x8c   :  { %p6529_p7 = scmp.lt.s32.totalorder %s6527_s26, %s6523_s23 }
  0x8e   :  { %p6530_p8 = por %p6529_p7, %p6528_p6 }
  0x90   :  { %p6531_p9 = pnand %p6530_p8, %p6524_p5 }
  0x92   :  { %6534 = shalt.err (!%p6531_p9)
}
  0x93   :  { %254 = dma.hbm_to_vmem [thread:$0]  %s6952_s17, 16, %s252_s27, [#allocation11]  }
  0x94   :  { %s6535_s30 = scalar_lea.hbm %s6792_s12, 16 }
  0x95   :  { %p6536_p10 = scmp.ne.s32.totalorder %s6792_s12, %s6535_s30  ;;  %p6539_p11 = scmp.lt.u32.totalorder %s6535_s30, %s6792_s12 }
  0x97   :  { %p6541_p12 = pnand %p6539_p11, %p6536_p10 }
  0x99   :  { %6544 = shalt.err (!%p6541_p12)
}
  0x9a   :  { %s6545_s28 = scalar_lea.vmem %s148_s18, 16  ;;  %s6549_s1 = scalar_lea.vmem %s148_s18, 32 }
  0x9b   :  { %p6546_p13 = scmp.ne.s32.totalorder %s148_s18, %s6545_s28  ;;  %p6550_p0 = scmp.lt.s32.totalorder %s148_s18, %s148_s18 }
  0x9c   :  { %p6551_p1 = scmp.lt.s32.totalorder %s6549_s1, %s6545_s28 }
  0x9e   :  { %p6552_p2 = por %p6551_p1, %p6550_p0 }
  0xa0   :  { %p6553_p3 = pnand %p6552_p2, %p6546_p13 }
  0xa2   :  { %6556 = shalt.err (!%p6553_p3)
}
  0xa3   :  { %150 = dma.hbm_to_vmem [thread:$0]  %s6792_s12, 16, %s148_s18, [#allocation3]  }
  0xa4   :  { %s6710_s0 = smov [#allocation6]   ;;  %s6711_s2 = smov [#allocation9]  }
  0xa5   :  { %s171_s17 = sshll.u32 %s6710_s0, 4  ;;  %s191_s7 = sshll.u32 %s6711_s2, 4  ;;  %s172_s17 = int_to_ptr.vmem [resolvable:$true] %s171_s17  ;;  %s192_s7 = int_to_ptr.vmem [resolvable:$true] %s191_s7 }
  0xa6   :  { %s6557_s10 = scalar_lea.hbm %s6812_s21, 16 }
  0xa7   :  { %p6558_p4 = scmp.ne.s32.totalorder %s6812_s21, %s6557_s10  ;;  %p6561_p5 = scmp.lt.u32.totalorder %s6557_s10, %s6812_s21 }
  0xa9   :  { %p6563_p6 = pnand %p6561_p5, %p6558_p4 }
  0xab   :  { %6566 = shalt.err (!%p6563_p6)
}
  0xac   :  { %s6567_s11 = scalar_lea.vmem %s172_s17, 16  ;;  %s6571_s15 = scalar_lea.vmem %s172_s17, 32 }
  0xad   :  { %p6568_p7 = scmp.ne.s32.totalorder %s172_s17, %s6567_s11  ;;  %p6572_p8 = scmp.lt.s32.totalorder %s172_s17, %s172_s17 }
  0xae   :  { %p6573_p9 = scmp.lt.s32.totalorder %s6571_s15, %s6567_s11 }
  0xb0   :  { %p6574_p10 = por %p6573_p9, %p6572_p8 }
  0xb2   :  { %p6575_p11 = pnand %p6574_p10, %p6568_p7 }
  0xb4   :  { %6578 = shalt.err (!%p6575_p11)
}
  0xb5   :  { %174 = dma.hbm_to_vmem [thread:$0]  %s6812_s21, 16, %s172_s17, [#allocation5]  }
  0xb6   :  { %s6579_s12 = scalar_lea.hbm %s6822_s24, 16 }
  0xb7   :  { %p6580_p12 = scmp.ne.s32.totalorder %s6822_s24, %s6579_s12  ;;  %p6583_p13 = scmp.lt.u32.totalorder %s6579_s12, %s6822_s24 }
  0xb9   :  { %p6585_p0 = pnand %p6583_p13, %p6580_p12 }
  0xbb   :  { %6588 = shalt.err (!%p6585_p0)
}
  0xbc   :  { %s6589_s27 = scalar_lea.vmem %s192_s7, 16  ;;  %s6593_s16 = scalar_lea.vmem %s192_s7, 32 }
  0xbd   :  { %p6590_p1 = scmp.ne.s32.totalorder %s192_s7, %s6589_s27  ;;  %p6594_p2 = scmp.lt.s32.totalorder %s192_s7, %s192_s7 }
  0xbe   :  { %p6595_p3 = scmp.lt.s32.totalorder %s6593_s16, %s6589_s27 }
  0xc0   :  { %p6596_p4 = por %p6595_p3, %p6594_p2 }
  0xc2   :  { %p6597_p5 = pnand %p6596_p4, %p6590_p1 }
  0xc4   :  { %6600 = shalt.err (!%p6597_p5)
}
  0xc5   :  { %194 = dma.hbm_to_vmem [thread:$0]  %s6822_s24, 16, %s192_s7, [#allocation8]  }
  0xc6   :  { %s6712_s18 = smov [#allocation12]   ;;  %s6713_s22 = smov [#allocation13]  }
  0xc7   :  { %s263_s21 = sshll.u32 %s6712_s18, 4  ;;  %s275_s23 = sshll.u32 %s6713_s22, 4  ;;  %s264_s21 = int_to_ptr.vmem [resolvable:$true] %s263_s21  ;;  %s276_s23 = int_to_ptr.vmem [resolvable:$true] %s275_s23 }
  0xc8   :  { %s6601_s26 = scalar_lea.hbm %s6962_s4, 16 }
  0xc9   :  { %p6602_p6 = scmp.ne.s32.totalorder %s6962_s4, %s6601_s26  ;;  %p6605_p7 = scmp.lt.u32.totalorder %s6601_s26, %s6962_s4 }
  0xcb   :  { %p6607_p8 = pnand %p6605_p7, %p6602_p6 }
  0xcd   :  { %6610 = shalt.err (!%p6607_p8)
}
  0xce   :  { %s6611_s30 = scalar_lea.vmem %s264_s21, 16  ;;  %s6615_s28 = scalar_lea.vmem %s264_s21, 32 }
  0xcf   :  { %p6612_p9 = scmp.ne.s32.totalorder %s264_s21, %s6611_s30  ;;  %p6616_p10 = scmp.lt.s32.totalorder %s264_s21, %s264_s21 }
  0xd0   :  { %p6617_p11 = scmp.lt.s32.totalorder %s6615_s28, %s6611_s30 }
  0xd2   :  { %p6618_p12 = por %p6617_p11, %p6616_p10 }
  0xd4   :  { %p6619_p13 = pnand %p6618_p12, %p6612_p9 }
  0xd6   :  { %6622 = shalt.err (!%p6619_p13)
}
  0xd7   :  { %266 = dma.hbm_to_vmem [thread:$0]  %s6962_s4, 16, %s264_s21, [#allocation11]  }
  0xd8   :  { %s6623_s24 = scalar_lea.hbm %s6972_s8, 16 }
  0xd9   :  { %p6624_p0 = scmp.ne.s32.totalorder %s6972_s8, %s6623_s24  ;;  %p6627_p1 = scmp.lt.u32.totalorder %s6623_s24, %s6972_s8 }
  0xdb   :  { %p6629_p2 = pnand %p6627_p1, %p6624_p0 }
  0xdd   :  { %6632 = shalt.err (!%p6629_p2)
}
  0xde   :  { %s6633_s1 = scalar_lea.vmem %s276_s23, 16  ;;  %s6637_s0 = scalar_lea.vmem %s276_s23, 32 }
  0xdf   :  { %p6634_p3 = scmp.ne.s32.totalorder %s276_s23, %s6633_s1  ;;  %p6638_p4 = scmp.lt.s32.totalorder %s276_s23, %s276_s23 }
  0xe0   :  { %p6639_p5 = scmp.lt.s32.totalorder %s6637_s0, %s6633_s1 }
  0xe2   :  { %p6640_p6 = por %p6639_p5, %p6638_p4 }
  0xe4   :  { %p6641_p7 = pnand %p6640_p6, %p6634_p3 }
  0xe6   :  { %6644 = shalt.err (!%p6641_p7)
}
  0xe7   :  { %278 = dma.hbm_to_vmem [thread:$0]  %s6972_s8, 16, %s276_s23, [#allocation14]  }
  0xe8   :  { %6645 = dma.done.wait [#allocation3], 16  }
  0xe9   :  { %6646 = vsyncadd [#allocation3], 4294967280 }
  0xea   :  { %6647 = dma.done.wait [#allocation5], 32  }
  0xeb   :  { %6648 = vsyncadd [#allocation5], 4294967264 }
  0xec   :  { %6649 = dma.done.wait [#allocation8], 32  }
  0xed   :  { %6650 = vsyncadd [#allocation8], 4294967264 }
  0xee   :  { %6651 = dma.done.wait [#allocation11], 32  }
  0xef   :  { %6652 = vsyncadd [#allocation11], 4294967264 }
  0xf0   :  { %6653 = dma.done.wait [#allocation14], 16  }
  0xf1   :  { %6654 = vsyncadd [#allocation14], 4294967280  ;;  %vm332_vm0 = vcmask 1044480   ;;  %vm325_vm1 = vcmask 39936   ;;  %v305_v0 = vld [vmem:[%s6747_s25] sm:$0x1f] }
  0xf2   :  { %v303_v1 = vld [vmem:[%s6722_s5] sm:$0xff]  ;;  %v304_v2 = vld [vmem:[%s6722_s5 + $0x8] sm:$0xff]  ;;  %5529 = vmatprep.subr.msk.mxu1 %vm332_vm0, %v305_v0  ;;  %v309_v6 = vld [vmem:[%s6757_s3 + $0x10] sm:$0xff]  ;;  %vm670_vm2 = vcmask 1042432   ;;  %vm419_vm3 = vcmask 261120   ;;  %vm657_vm4 = vcmask 23552  }
  0xf3   :  { %5531 = vmatprep.mubr.msk.f32.mxu1 %vm325_vm1, %v303_v1  ;;  %v307_v3 = vld [vmem:[%s6757_s3] sm:$0xff]  ;;  %v308_v4 = vld [vmem:[%s6757_s3 + $0x8] sm:$0xff]  ;;  %5530 = vmatpush3.msk.msra.mxu1 %vm332_vm0, %v305_v0  ;;  %v310_v7 = vld [vmem:[%s6757_s3 + $0x18] sm:$0xff]  ;;  %s7566_s5 = sld [smem:[#allocation23_spill]]  ;;  %s7568_s25 = sld [smem:[#allocation24_spill]]  ;;  %vm1122_vm5 = vcmask 130048  }
  0xf4   :  { %v6027_v5 = vpack.c.bf16 %v308_v4, %v307_v3  ;;  %5532 = vmatmul.mubr.msk.f32.vlgmr.msra.gmra.mrb[0].mxu1 %vm325_vm1, %v304_v2  ;;  %v6031_v8 = vpack.c.bf16 %v310_v7, %v309_v6  ;;  %v637_v9 = vld [vmem:[%s6787_s6] sm:$0x7]  ;;  %v313_v11 = vld [vmem:[%s6767_s14 + $0x8] sm:$0xff]  ;;  %v635_v22 = vld [vmem:[%s6727_s9 + $0x10] sm:$0xff]  ;;  %s7570_s3 = sld [smem:[#allocation20_spill]]  ;;  %s7571_s8 = sld [smem:[#allocation25_spill]] }
  0xf5   :  { %v312_v10 = vld [vmem:[%s6767_s14] sm:$0xff]  ;;  %v634_v21 = vld [vmem:[%s6727_s9 + $0x8] sm:$0xff]  ;;  %v636_v23 = vld [vmem:[%s6727_s9 + $0x18] sm:$0xff]  ;;  %s7573_s6 = sld [smem:[#allocation28_spill]]  ;;  %s7575_s4 = sld [smem:[#allocation32_spill]]  ;;  %vm4940_vm6 = vcmask 31744  }
  0xf6   :  { %6028 = vmatprep.subr.bf16.mxu1 %v6027_v5  ;;  %v6035_v12 = vpack.c.bf16 %v313_v11, %v312_v10  ;;  %v5003_v13 = vld [vmem:[%s6752_s29] ss:$0 sm:$0xff]  ;;  %v314_v24 = vld [vmem:[%s6767_s14 + $0x10] sm:$0xff]  ;;  %v315_v25 = vld [vmem:[%s6767_s14 + $0x18] sm:$0xff]  ;;  %s7569_s29 = sld [smem:[#allocation21_spill]]  ;;  %s7572_s14 = sld [smem:[#allocation26_spill]] }
  0xf7   :  { %6030 = vmatpush3.bf16.msra.mxu1 %v6027_v5  ;;  %v633_v20 = vld [vmem:[%s6727_s9] sm:$0xff]  ;;  %v6039_v26 = vpack.c.bf16 %v315_v25, %v314_v24  ;;  %v640_v28 = vld [vmem:[%s6797_s20 + $0x8] sm:$0xff]  ;;  %v641_v35 = vld [vmem:[%s6797_s20 + $0x10] sm:$0xff]  ;;  %s7567_s9 = sld [smem:[#allocation27_spill]]  ;;  %s7576_s17 = sld [smem:[#allocation29_spill]] }
  0xf8   :  { %6032 = vmatprep.subr.bf16.mxu1 %v6031_v8  ;;  %6036 = vmatprep.subr.bf16.mxu0 %v6035_v12  ;;  %v639_v27 = vld [vmem:[%s6797_s20] sm:$0xff]  ;;  %v642_v36 = vld [vmem:[%s6797_s20 + $0x18] sm:$0xff]  ;;  %s7574_s20 = sld [smem:[#allocation30_spill]]  ;;  %s7577_s2 = sld [smem:[#allocation31_spill]] }
  0xf9   :  { %6038 = vmatpush3.bf16.msra.mxu0 %v6035_v12  ;;  %v6043_v29 = vpack.c.bf16 %v640_v28, %v639_v27  ;;  %v5007_v30 = vld [vmem:[%s7566_s5] ss:$0 sm:$0xff]  ;;  %v6047_v42 = vpack.c.bf16 %v642_v36, %v641_v35  ;;  %v5021_v1 = vld [vmem:[#allocation4] ss:$0 sm:$0xff]  ;;  %v5026_v27 = vld [vmem:[#allocation6] ss:$0 sm:$0xff] }
  0xfa   :  { %6040 = vmatprep.subr.bf16.mxu0 %v6039_v26  ;;  %v5015_v37 = vld [vmem:[#allocation2] ss:$0 sm:$0xff]  ;;  %s7578_s7 = sld [smem:[#allocation33_spill]]  ;;  %s7579_s10 = sld [smem:[#allocation36_spill]] }
  0xfb   :  { %6034 = vmatpush3.bf16.msra.mxu1 %v6031_v8  ;;  %v5010_v59 = vld [vmem:[%s7568_s25] ss:$0 sm:$0xff]  ;;  %s7580_s11 = sld [smem:[#allocation38_spill]]  ;;  %s7581_s15 = sld [smem:[#allocation34_spill]] }
  0xfc   :  { %5556 = vmatprep.subr.msk.mxu1 %vm670_vm2, %v637_v9  ;;  %v1049_v25 = vld [vmem:[%s7569_s29] sm:$0xff]  ;;  %s7582_s12 = sld [smem:[#allocation35_spill]]  ;;  %s7583_s27 = sld [smem:[#allocation40_spill]] }
  0xfd   :  { %6042 = vmatpush3.bf16.msra.mxu0 %v6039_v26  ;;  %v644_v53 = vld [vmem:[%s7567_s9] sm:$0xff]  ;;  %v645_v54 = vld [vmem:[%s7567_s9 + $0x8] sm:$0xff]  ;;  %v646_v56 = vld [vmem:[%s7567_s9 + $0x10] sm:$0xff]  ;;  %s7584_s16 = sld [smem:[#allocation37_spill]]  ;;  %s7585_s18 = sld [smem:[#allocation39_spill]] }
  0xfe   :  { %6044 = vmatprep.subr.bf16.mxu0 %v6043_v29  ;;  %v6051_v55 = vpack.c.bf16 %v645_v54, %v644_v53  ;;  %v647_v57 = vld [vmem:[%s7567_s9 + $0x18] sm:$0xff]  ;;  %v7059_v26 = vld [vmem:[%s7570_s3] sm:$0xff]  ;;  %s7586_s21 = sld [smem:[#allocation41_spill]]  ;;  %s7587_s22 = sld [smem:[#allocation22_spill]] }
  0xff   :  { %v6055_v58 = vpack.c.bf16 %v647_v57, %v646_v56  ;;  %v1050_v57 = vld [vmem:[%s7569_s29 + $0x8] sm:$0xff]  ;;  %s7588_s23 = sld [smem:[#allocation44_spill]]  ;;  %s7589_s26 = sld [smem:[#allocation42_spill]] }
 0x100   :  { %s7590_s30 = sld [smem:[#allocation43_spill]]  ;;  %s7591_s28 = sld [smem:[#allocation46_spill]] }
 0x101   :  { %s7592_s24 = sld [smem:[#allocation48_spill]]  ;;  %s7593_s1 = sld [smem:[#allocation45_spill]] }
 0x102   :  { %s7594_s0 = sld [smem:[#allocation47_spill]]  ;;  %s7595_s5 = sld [smem:[#allocation49_spill]] }
 0x103   :  { %s7596_s9 = sld [smem:[#allocation50_spill]]  ;;  %s7597_s25 = sld [smem:[#allocation51_spill]] }
 0x1c7   :  { %v5533_v14 = vpop.f32.mrb[0].mxu1 }
 0x1c8   :  { %v408_v15 = vadd.f32 %v5533_v14, %v5003_v13  ;;  %v402_v16 = vpop.f32.mrb[1].mxu1 }
 0x1c9   :  { %v403_v17 = vadd.f32 %v5003_v13, %v402_v16 }
 0x1ca   :  { %v412_v19 = vmax.f32 %v408_v15, 0.0 }
 0x1cb   :  { %v411_v18 = vmax.f32 %v403_v17, 0.0 }
 0x1cd   :  { %5542 = vmatprep.mubr.msk.f32.mxu1 %vm419_vm3, %v411_v18 }
 0x1ce   :  { %5543 = vmatmul.mubr.msk.f32.vlgmr.msra.gmra.mrb[2].mxu1 %vm419_vm3, %v412_v19 }
 0x1cf   :  { %5557 = vmatpush3.msk.msra.mxu1 %vm670_vm2, %v637_v9  ;;  %5558 = vmatprep.mubr.msk.f32.mxu1 %vm657_vm4, %v633_v20 }
 0x1d0   :  { %6052 = vmatprep.subr.bf16.mxu1 %v6051_v55 }
 0x1d2   :  { %5559 = vmatmul.mubr.msk.f32.vlgmr.msra.gmra.mrb[4].mxu1 %vm657_vm4, %v634_v21 }
 0x1d3   :  { %5561 = vmatprep.mubr.msk.f32.mxu1 %vm657_vm4, %v635_v22  ;;  %6054 = vmatpush3.bf16.msra.mxu1 %v6051_v55 }
 0x1d4   :  { %6056 = vmatprep.subr.bf16.mxu1 %v6055_v58 }
 0x1d6   :  { %5562 = vmatmul.mubr.msk.f32.gmra.mrb[6].mxu1 %vm657_vm4, %v636_v23 }
 0x1d7   :  { %6058 = vmatpush3.bf16.msra.mxu1 %v6055_v58  ;;  %v1046_v58 = vld [vmem:[%s7570_s3 + $0x8] sm:$0xff] }
 0x2a1   :  { %v5544_v31 = vpop.f32.mrb[2].mxu1 }
 0x2a2   :  { %v498_v32 = vadd.f32 %v5544_v31, %v5007_v30  ;;  %v492_v33 = vpop.f32.mrb[3].mxu1 }
 0x2a3   :  { %v493_v34 = vadd.f32 %v5007_v30, %v492_v33 }
 0x2a4   :  { %v502_v40 = vmax.f32 %v498_v32, 0.0 }
 0x2a5   :  { %v501_v38 = vmax.f32 %v493_v34, 0.0  ;;  %v5560_v39 = vpop.f32.mrb[4].mxu1 }
 0x2a6   :  { %v740_v41 = vpop.f32.mrb[5].mxu1  ;;  %v746_v44 = vadd.f32 %v5560_v39, %v5015_v37 }
 0x2a7   :  { %5553 = vmatprep.mubr.msk.f32.mxu0 %vm419_vm3, %v501_v38  ;;  %v741_v43 = vadd.f32 %v5015_v37, %v740_v41 }
 0x2a8   :  { %5554 = vmatmul.mubr.msk.f32.vlgmr.msra.gmra.mrb[0].mxu0 %vm419_vm3, %v502_v40  ;;  %v760_v49 = vmax.f32 %v746_v44, 0.0 }
 0x2a9   :  { %6046 = vmatpush3.bf16.msra.mxu0 %v6043_v29  ;;  %v759_v45 = vmax.f32 %v741_v43, 0.0  ;;  %v5563_v46 = vpop.f32.mrb[6].mxu1 }
 0x2aa   :  { %6048 = vmatprep.subr.bf16.mxu0 %v6047_v42  ;;  %v750_v47 = vpop.f32.mrb[7].mxu1  ;;  %v756_v50 = vadd.f32 %v5563_v46, %v5015_v37 }
 0x2ab   :  { %v751_v48 = vadd.f32 %v5015_v37, %v750_v47  ;;  %5572 = vmatprep.mubr.msk.f32.mxu0 %vm419_vm3, %v759_v45 }
 0x2ac   :  { %v762_v52 = vmax.f32 %v756_v50, 0.0 }
 0x2ad   :  { %6050 = vmatpush3.bf16.msra.mxu0 %v6047_v42  ;;  %v761_v51 = vmax.f32 %v751_v48, 0.0  ;;  %v5013_v48 = vld [vmem:[%s7571_s8] ss:$0 sm:$0xff] }
 0x2b0   :  { %5573 = vmatmul.mubr.msk.f32.vlgmr.msra.gmra.mrb[2].mxu0 %vm419_vm3, %v760_v49 }
 0x2b1   :  { %5575 = vmatprep.mubr.msk.f32.mxu0 %vm419_vm3, %v761_v51 }
 0x2b4   :  { %5576 = vmatmul.mubr.msk.f32.gmra.mrb[4].mxu0 %vm419_vm3, %v762_v52  ;;  %v5014_v52 = vld [vmem:[%s7572_s14] ss:$0 sm:$0xff] }
 0x2b5   :  { %5596 = vmatprep.mubr.msk.f32.mxu0 %vm1122_vm5, %v7059_v26 }
 0x37b   :  { %v5555_v60 = vpop.f32.mrb[0].mxu0 }
 0x37c   :  { %v581_v61 = vpop.f32.mrb[1].mxu0  ;;  %v587_v63 = vadd.f32 %v5555_v60, %v5010_v59  ;;  %v1047_v60 = vld [vmem:[%s7570_s3 + $0x10] sm:$0xff] }
 0x37d   :  { %v582_v62 = vadd.f32 %v5010_v59, %v581_v61  ;;  %v1051_v59 = vld [vmem:[%s7569_s29 + $0x10] sm:$0xff]  ;;  %v1052_v61 = vld [vmem:[%s7569_s29 + $0x18] sm:$0xff] }
 0x37e   :  { %v593_v3 = vsel %vm419_vm3, %v587_v63, 0.0 }
 0x37f   :  { %v590_v0 = vsel %vm419_vm3, %v582_v62, 0.0 }
 0x380   :  { %591 = vadd.xlane.f32.xlu0 %v590_v0 }
 0x383   :  { %v5574_v2 = vpop.f32.mrb[2].mxu0 }
 0x384   :  { %v853_v4 = vadd.f32 %v5574_v2, %v5021_v1  ;;  %v847_v5 = vpop.f32.mrb[3].mxu0  ;;  %594 = vadd.xlane.f32.xlu0 %v593_v3 }
 0x385   :  { %v848_v6 = vadd.f32 %v5021_v1, %v847_v5 }
 0x386   :  { %v867_v7 = vmax.f32 %v853_v4, 0.0 }
 0x387   :  { %v866_v8 = vmax.f32 %v848_v6, 0.0  ;;  %v5577_v9 = vpop.f32.mrb[4].mxu0 }
 0x388   :  { %v863_v10 = vadd.f32 %v5577_v9, %v5021_v1  ;;  %v857_v11 = vpop.f32.mrb[5].mxu0 }
 0x389   :  { %v858_v12 = vadd.f32 %v5021_v1, %v857_v11  ;;  %5586 = vmatprep.mubr.msk.f32.mxu1 %vm419_vm3, %v866_v8 }
 0x38a   :  { %v869_v13 = vmax.f32 %v863_v10, 0.0  ;;  %5587 = vmatmul.mubr.msk.f32.vlgmr.msra.gmra.mrb[8].mxu1 %vm419_vm3, %v867_v7 }
 0x38b   :  { %v868_v14 = vmax.f32 %v858_v12, 0.0 }
 0x38d   :  { %5589 = vmatprep.mubr.msk.f32.mxu1 %vm419_vm3, %v868_v14 }
 0x38e   :  { %5590 = vmatmul.mubr.msk.f32.gmra.mrb[10].mxu1 %vm419_vm3, %v869_v13 }
 0x38f   :  { %5606 = vmatprep.mubr.msk.f32.mxu1 %vm1122_vm5, %v1049_v25  ;;  %v1055_v25 = vld [vmem:[%s7573_s6] sm:$0xff] }
 0x40d   :  { %v592_v15 = vpop.xlane.xlu0 %591 }
 0x40e   :  { %v597_v16 = vmul.f32 0.03125, %v592_v15 }
 0x410   :  { %v599_v17 = vsub.f32 %v582_v62, %v597_v16  ;;  %v1048_v62 = vld [vmem:[%s7570_s3 + $0x18] sm:$0xff] }
 0x411   :  { %v595_v18 = vpop.xlane.xlu0 %594 }
 0x412   :  { %v598_v19 = vmul.f32 0.03125, %v595_v18  ;;  %v601_v20 = vmul.f32 %v599_v17, %v599_v17 }
 0x414   :  { %v600_v21 = vsub.f32 %v587_v63, %v598_v19  ;;  %v603_v22 = vsel %vm419_vm3, %v601_v20, 0.0  ;;  %v1059_v19 = vld [vmem:[%s7573_s6 + $0x20] sm:$0xff]  ;;  %v1060_v20 = vld [vmem:[%s7573_s6 + $0x28] sm:$0xff] }
 0x415   :  { %604 = vadd.xlane.f32.xlu1 %v603_v22  ;;  %v1061_v22 = vld [vmem:[%s7573_s6 + $0x30] sm:$0xff] }
 0x416   :  { %v602_v23 = vmul.f32 %v600_v21, %v600_v21 }
 0x418   :  { %v606_v24 = vsel %vm419_vm3, %v602_v23, 0.0  ;;  %v1062_v23 = vld [vmem:[%s7573_s6 + $0x38] sm:$0xff] }
 0x419   :  { %607 = vadd.xlane.f32.xlu1 %v606_v24  ;;  %v6071_v24 = vpack.c.bf16 %v1062_v23, %v1061_v22  ;;  %v5053_v23 = vld [vmem:[%s7576_s17] ss:$0 sm:$0xff] }
 0x45d   :  { %v5588_v28 = vpop.f32.mrb[8].mxu1 }
 0x45e   :  { %v960_v29 = vadd.f32 %v5588_v28, %v5026_v27  ;;  %v954_v30 = vpop.f32.mrb[9].mxu1 }
 0x45f   :  { %v955_v31 = vadd.f32 %v5026_v27, %v954_v30  ;;  %v1069_v30 = vld [vmem:[%s7574_s20 + $0x8] sm:$0xff] }
 0x460   :  { %v976_v32 = vsel %vm419_vm3, %v960_v29, 0.0 }
 0x461   :  { %v5591_v33 = vpop.f32.mrb[10].mxu1  ;;  %977 = vadd.xlane.f32.xlu1 %v976_v32  ;;  %v973_v34 = vsel %vm419_vm3, %v955_v31, 0.0 }
 0x462   :  { %v970_v35 = vadd.f32 %v5591_v33, %v5026_v27  ;;  %v964_v36 = vpop.f32.mrb[11].mxu1  ;;  %974 = vadd.xlane.f32.xlu0 %v973_v34 }
 0x463   :  { %v965_v37 = vadd.f32 %v5026_v27, %v964_v36  ;;  %v1056_v27 = vld [vmem:[%s7573_s6 + $0x8] sm:$0xff] }
 0x464   :  { %v982_v38 = vsel %vm419_vm3, %v970_v35, 0.0  ;;  %v6075_v28 = vpack.c.bf16 %v1056_v27, %v1055_v25 }
 0x465   :  { %983 = vadd.xlane.f32.xlu1 %v982_v38  ;;  %v979_v39 = vsel %vm419_vm3, %v965_v37, 0.0 }
 0x466   :  { %980 = vadd.xlane.f32.xlu0 %v979_v39 }
 0x4a2   :  { %v605_v40 = vpop.xlane.xlu1 %604 }
 0x4a3   :  { %v609_v41 = vmul.f32 0.03125, %v605_v40 }
 0x4a5   :  { %v611_v42 = vadd.f32 1e-05, %v609_v41 }
 0x4a6   :  { %v608_v43 = vpop.xlane.xlu1 %607 }
 0x4a7   :  { %6410 = vrsqrt.f32 %v611_v42  ;;  %v610_v44 = vmul.f32 0.03125, %v608_v43 }
 0x4a9   :  { %v612_v45 = vadd.f32 1e-05, %v610_v44  ;;  %v1057_v44 = vld [vmem:[%s7573_s6 + $0x10] sm:$0xff] }
 0x4ab   :  { %6412 = vrsqrt.f32 %v612_v45  ;;  %v1058_v45 = vld [vmem:[%s7573_s6 + $0x18] sm:$0xff] }
 0x4b1   :  { %v6411_v46 = vpop.eup %6410 }
 0x4b2   :  { %v615_v47 = vmul.f32 %v6411_v46, %v599_v17 }
 0x4b4   :  { %v623_v51 = vmul.f32 %v5013_v48, %v615_v47 }
 0x4b5   :  { %v6413_v49 = vpop.eup %6412 }
 0x4b6   :  { %v616_v50 = vmul.f32 %v6413_v49, %v600_v21  ;;  %v7069_v54 = vadd.f32 %v5014_v52, %v623_v51  ;;  %v6067_v21 = vpack.c.bf16 %v1060_v20, %v1059_v19  ;;  %v6079_v49 = vpack.c.bf16 %v1058_v45, %v1057_v44  ;;  %v1063_v51 = vld [vmem:[%s7573_s6 + $0x40] sm:$0xff] }
 0x4b7   :  { %v1073_v20 = vld [vmem:[%s7575_s4] sm:$0xff] }
 0x4b8   :  { %v624_v53 = vmul.f32 %v5013_v48, %v616_v50 }
 0x4ba   :  { %v7071_v55 = vadd.f32 %v5014_v52, %v624_v53  ;;  %v1064_v52 = vld [vmem:[%s7573_s6 + $0x48] sm:$0xff] }
 0x4bc   :  { %v6059_v56 = vpack.c.bf16 %v7071_v55, %v7069_v54 }
 0x4be   :  { %6060 = vmatprep.subr.bf16.mxu0 %v6059_v56  ;;  %6064 = vmatprep.subr.bf16.mxu1 %v6059_v56 }
 0x4bf   :  { %6062 = vmatpush3.bf16.msra.mxu0 %v6059_v56  ;;  %6066 = vmatpush3.bf16.msra.mxu1 %v6059_v56 }
 0x4c0   :  { %6068 = vmatprep.subr.bf16.mxu0 %v6067_v21 }
 0x4c2   :  { %5607 = vmatmul.mubr.msk.f32.vlgmr.msra.gmra.mrb[12].mxu1 %vm1122_vm5, %v1050_v57  ;;  %5597 = vmatmul.mubr.msk.f32.vlgmr.msra.gmra.mrb[6].mxu0 %vm1122_vm5, %v1046_v58 }
 0x4c3   :  { %5609 = vmatprep.mubr.msk.f32.mxu1 %vm1122_vm5, %v1051_v59  ;;  %5599 = vmatprep.mubr.msk.f32.mxu0 %vm1122_vm5, %v1047_v60  ;;  %v6083_v59 = vpack.c.bf16 %v1064_v52, %v1063_v51 }
 0x4c4   :  { %6070 = vmatpush3.bf16.msra.mxu0 %v6067_v21  ;;  %v1074_v21 = vld [vmem:[%s7575_s4 + $0x8] sm:$0xff] }
 0x4c5   :  { %6072 = vmatprep.subr.bf16.mxu0 %v6071_v24  ;;  %v6099_v22 = vpack.c.bf16 %v1074_v21, %v1073_v20 }
 0x4c6   :  { %5610 = vmatmul.mubr.msk.f32.gmra.mrb[14].mxu1 %vm1122_vm5, %v1052_v61  ;;  %5600 = vmatmul.mubr.msk.f32.gmra.mrb[8].mxu0 %vm1122_vm5, %v1048_v62  ;;  %v1065_v62 = vld [vmem:[%s7573_s6 + $0x50] sm:$0xff] }
 0x4c8   :  { %6074 = vmatpush3.bf16.msra.mxu0 %v6071_v24 }
 0x4c9   :  { %6076 = vmatprep.subr.bf16.mxu0 %v6075_v28 }
 0x4ee   :  { %v978_v63 = vpop.xlane.xlu1 %977 }
 0x4ef   :  { %v986_v0 = vmul.f32 0.03125, %v978_v63  ;;  %v975_v1 = vpop.xlane.xlu0 %974  ;;  %v1066_v63 = vld [vmem:[%s7573_s6 + $0x58] sm:$0xff] }
 0x4f0   :  { %v985_v2 = vmul.f32 0.03125, %v975_v1 }
 0x4f1   :  { %v7087_v3 = vsub.f32 %v960_v29, %v986_v0  ;;  %v1068_v29 = vld [vmem:[%s7574_s20] sm:$0xff] }
 0x4f2   :  { %v7089_v4 = vsub.f32 %v955_v31, %v985_v2  ;;  %v984_v5 = vpop.xlane.xlu1 %983  ;;  %v6091_v31 = vpack.c.bf16 %v1069_v30, %v1068_v29  ;;  %v5031_v2 = vld [vmem:[#allocation7] ss:$0 sm:$0xff] }
 0x4f3   :  { %v988_v6 = vmul.f32 0.03125, %v984_v5  ;;  %v981_v7 = vpop.xlane.xlu0 %980  ;;  %v994_v8 = vmul.f32 %v7087_v3, %v7087_v3 }
 0x4f4   :  { %v987_v9 = vmul.f32 0.03125, %v981_v7  ;;  %v993_v10 = vmul.f32 %v7089_v4, %v7089_v4  ;;  %6092 = vmatprep.subr.bf16.mxu1 %v6091_v31 }
 0x4f5   :  { %v7095_v11 = vsub.f32 %v970_v35, %v988_v6  ;;  %v1000_v12 = vsel %vm419_vm3, %v994_v8, 0.0  ;;  %6094 = vmatpush3.bf16.msra.mxu1 %v6091_v31  ;;  %v6087_v6 = vpack.c.bf16 %v1066_v63, %v1065_v62 }
 0x4f6   :  { %v7098_v13 = vsub.f32 %v965_v37, %v987_v9  ;;  %1001 = vadd.xlane.f32.xlu1 %v1000_v12  ;;  %v997_v14 = vsel %vm419_vm3, %v993_v10, 0.0 }
 0x4f7   :  { %998 = vadd.xlane.f32.xlu0 %v997_v14  ;;  %v996_v15 = vmul.f32 %v7095_v11, %v7095_v11 }
 0x4f8   :  { %v995_v16 = vmul.f32 %v7098_v13, %v7098_v13 }
 0x4f9   :  { %v1006_v17 = vsel %vm419_vm3, %v996_v15, 0.0 }
 0x4fa   :  { %1007 = vadd.xlane.f32.xlu1 %v1006_v17  ;;  %v1003_v18 = vsel %vm419_vm3, %v995_v16, 0.0  ;;  %v1070_v17 = vld [vmem:[%s7574_s20 + $0x10] sm:$0xff] }
 0x4fb   :  { %1004 = vadd.xlane.f32.xlu0 %v1003_v18  ;;  %v1071_v18 = vld [vmem:[%s7574_s20 + $0x18] sm:$0xff] }
 0x4fc   :  { %v6095_v19 = vpack.c.bf16 %v1071_v18, %v1070_v17 }
 0x4fe   :  { %6096 = vmatprep.subr.bf16.mxu1 %v6095_v19 }
 0x4ff   :  { %6098 = vmatpush3.bf16.msra.mxu1 %v6095_v19 }
 0x500   :  { %6100 = vmatprep.subr.bf16.mxu1 %v6099_v22 }
 0x583   :  { %v1002_v32 = vpop.xlane.xlu1 %1001 }
 0x584   :  { %v999_v33 = vpop.xlane.xlu0 %998  ;;  %v1010_v36 = vmul.f32 0.03125, %v1002_v32 }
 0x585   :  { %v1009_v34 = vmul.f32 0.03125, %v999_v33 }
 0x586   :  { %v1014_v40 = vadd.f32 1e-05, %v1010_v36 }
 0x587   :  { %v1013_v37 = vadd.f32 1e-05, %v1009_v34  ;;  %v1008_v38 = vpop.xlane.xlu1 %1007 }
 0x588   :  { %v1005_v35 = vpop.xlane.xlu0 %1004  ;;  %v1012_v41 = vmul.f32 0.03125, %v1008_v38  ;;  %v1076_v38 = vld [vmem:[%s7575_s4 + $0x18] sm:$0xff] }
 0x589   :  { %v1011_v39 = vmul.f32 0.03125, %v1005_v35  ;;  %6414 = vrsqrt.f32 %v1013_v37  ;;  %v1075_v37 = vld [vmem:[%s7575_s4 + $0x10] sm:$0xff] }
 0x58a   :  { %6416 = vrsqrt.f32 %v1014_v40  ;;  %v1016_v43 = vadd.f32 1e-05, %v1012_v41  ;;  %v5054_v40 = vld [vmem:[%s7577_s2] ss:$0 sm:$0xff] }
 0x58b   :  { %v1015_v42 = vadd.f32 1e-05, %v1011_v39  ;;  %v6103_v39 = vpack.c.bf16 %v1076_v38, %v1075_v37  ;;  %v1087_v37 = vld [vmem:[%s7579_s10 + $0x38] sm:$0xff] }
 0x58d   :  { %6418 = vrsqrt.f32 %v1015_v42 }
 0x58e   :  { %6420 = vrsqrt.f32 %v1016_v43 }
 0x593   :  { %v6415_v53 = vpop.eup %6414 }
 0x594   :  { %v6417_v61 = vpop.eup %6416  ;;  %v1021_v0 = vmul.f32 %v6415_v53, %v7089_v4  ;;  %v5032_v4 = vld [vmem:[#allocation9] ss:$0 sm:$0xff] }
 0x595   :  { %v5608_v46 = vpop.f32.mrb[12].mxu1  ;;  %v7117_v47 = vpop.f32.mrb[6].mxu0  ;;  %v1022_v5 = vmul.f32 %v6417_v61, %v7087_v3 }
 0x596   :  { %v1298_v48 = vpop.f32.mrb[13].mxu1  ;;  %v7119_v50 = vpop.f32.mrb[7].mxu0  ;;  %v1031_v8 = vmul.f32 %v5031_v2, %v1021_v0 }
 0x597   :  { %5620 = vmatprep.mubr.msk.f32.mxu0 %vm419_vm3, %v1298_v48  ;;  %v6419_v1 = vpop.eup %6418  ;;  %v1032_v10 = vmul.f32 %v5031_v2, %v1022_v5 }
 0x598   :  { %5621 = vmatmul.mubr.msk.f32.vlgmr.msra.gmra.mrb[10].mxu0 %vm419_vm3, %v5608_v46  ;;  %v6421_v7 = vpop.eup %6420  ;;  %v1023_v9 = vmul.f32 %v6419_v1, %v7098_v13  ;;  %v7143_v12 = vadd.f32 %v5032_v4, %v1031_v8 }
 0x599   :  { %v5611_v56 = vpop.f32.mrb[14].mxu1  ;;  %6078 = vmatpush3.bf16.msra.mxu0 %v6075_v28  ;;  %v7125_v57 = vpop.f32.mrb[8].mxu0  ;;  %v1024_v3 = vmul.f32 %v6421_v7, %v7095_v11  ;;  %v7149_v13 = vadd.f32 %v5032_v4, %v1032_v10 }
 0x59a   :  { %v1308_v58 = vpop.f32.mrb[15].mxu1  ;;  %6080 = vmatprep.subr.bf16.mxu0 %v6079_v49  ;;  %v7127_v60 = vpop.f32.mrb[9].mxu0  ;;  %v1033_v14 = vmul.f32 %v5031_v2, %v1023_v9 }
 0x59b   :  { %5623 = vmatprep.mubr.msk.f32.mxu0 %vm419_vm3, %v1308_v58  ;;  %v1034_v15 = vmul.f32 %v5031_v2, %v1024_v3  ;;  %v5059_v58 = vld [vmem:[%s7578_s7] ss:$0 sm:$0xff] }
 0x59c   :  { %5624 = vmatmul.mubr.msk.f32.gmra.mrb[12].mxu0 %vm419_vm3, %v5611_v56  ;;  %v7151_v16 = vadd.f32 %v5032_v4, %v1033_v14 }
 0x59d   :  { %6082 = vmatpush3.bf16.msra.mxu0 %v6079_v49  ;;  %5634 = vmatprep.mubr.msk.f32.mxu0 %vm419_vm3, %v7119_v50  ;;  %v7157_v11 = vadd.f32 %v5032_v4, %v1034_v15 }
 0x59e   :  { %6084 = vmatprep.subr.bf16.mxu0 %v6083_v59 }
 0x5a0   :  { %5635 = vmatmul.mubr.msk.f32.vlgmr.msra.gmra.mrb[10].mxu0 %vm419_vm3, %v7117_v47 }
 0x5a1   :  { %6086 = vmatpush3.bf16.msra.mxu0 %v6083_v59  ;;  %5637 = vmatprep.mubr.msk.f32.mxu0 %vm419_vm3, %v7127_v60 }
 0x5a2   :  { %6088 = vmatprep.subr.bf16.mxu0 %v6087_v6 }
 0x5a4   :  { %5638 = vmatmul.mubr.msk.f32.gmra.mrb[12].mxu0 %vm419_vm3, %v7125_v57 }
 0x5a5   :  { %6090 = vmatpush3.bf16.msra.mxu0 %v6087_v6  ;;  %5648 = vmatprep.mubr.msk.f32.mxu0 %vm419_vm3, %v7143_v12 }
 0x5a8   :  { %5649 = vmatmul.mubr.msk.f32.vlgmr.msra.gmra.mrb[10].mxu0 %vm419_vm3, %v7149_v13 }
 0x5a9   :  { %5651 = vmatprep.mubr.msk.f32.mxu0 %vm419_vm3, %v7151_v16 }
 0x5ac   :  { %5652 = vmatmul.mubr.msk.f32.gmra.mrb[12].mxu0 %vm419_vm3, %v7157_v11 }
 0x67b   :  { %v5650_v24 = vpop.f32.mrb[10].mxu0 }
 0x67c   :  { %v1619_v25 = vadd.f32 %v5650_v24, %v5053_v23  ;;  %v1589_v27 = vpop.f32.mrb[11].mxu0 }
 0x67d   :  { %v1618_v28 = vadd.f32 %v5053_v23, %v1589_v27 }
 0x67e   :  { %v1623_v31 = vmax.f32 %v1619_v25, 0.0 }
 0x67f   :  { %v1622_v29 = vmax.f32 %v1618_v28, 0.0  ;;  %v5653_v30 = vpop.f32.mrb[12].mxu0 }
 0x680   :  { %v1621_v32 = vadd.f32 %v5653_v30, %v5053_v23  ;;  %v1599_v33 = vpop.f32.mrb[13].mxu0 }
 0x681   :  { %v1620_v34 = vadd.f32 %v5053_v23, %v1599_v33  ;;  %5662 = vmatprep.mubr.msk.f32.mxu1 %vm419_vm3, %v1622_v29  ;;  %v1084_v33 = vld [vmem:[%s7579_s10 + $0x20] sm:$0xff] }
 0x682   :  { %5663 = vmatmul.mubr.msk.f32.vlgmr.msra.gmra.mrb[16].mxu1 %vm419_vm3, %v1623_v31  ;;  %v1625_v36 = vmax.f32 %v1621_v32, 0.0 }
 0x683   :  { %v1624_v35 = vmax.f32 %v1620_v34, 0.0  ;;  %6102 = vmatpush3.bf16.msra.mxu1 %v6099_v22  ;;  %v1085_v34 = vld [vmem:[%s7579_s10 + $0x28] sm:$0xff] }
 0x684   :  { %6104 = vmatprep.subr.bf16.mxu1 %v6103_v39 }
 0x685   :  { %5665 = vmatprep.mubr.msk.f32.mxu1 %vm419_vm3, %v1624_v35  ;;  %v6107_v35 = vpack.c.bf16 %v1085_v34, %v1084_v33 }
 0x686   :  { %5666 = vmatmul.mubr.msk.f32.gmra.mrb[18].mxu1 %vm419_vm3, %v1625_v36  ;;  %v1086_v36 = vld [vmem:[%s7579_s10 + $0x30] sm:$0xff] }
 0x687   :  { %6106 = vmatpush3.bf16.msra.mxu1 %v6103_v39  ;;  %v6111_v38 = vpack.c.bf16 %v1087_v37, %v1086_v36  ;;  %v1080_v39 = vld [vmem:[%s7579_s10] sm:$0xff] }
 0x688   :  { %6108 = vmatprep.subr.bf16.mxu1 %v6107_v35 }
 0x755   :  { %v5664_v41 = vpop.f32.mrb[16].mxu1 }
 0x756   :  { %v1716_v42 = vadd.f32 %v5664_v41, %v5054_v40  ;;  %v1710_v43 = vpop.f32.mrb[17].mxu1 }
 0x757   :  { %v1711_v44 = vadd.f32 %v5054_v40, %v1710_v43  ;;  %v1090_v43 = vld [vmem:[%s7580_s11 + $0x8] sm:$0xff] }
 0x758   :  { %v1730_v48 = vmax.f32 %v1716_v42, 0.0  ;;  %v1089_v42 = vld [vmem:[%s7580_s11] sm:$0xff] }
 0x759   :  { %v1729_v45 = vmax.f32 %v1711_v44, 0.0  ;;  %v5667_v46 = vpop.f32.mrb[18].mxu1  ;;  %v6123_v44 = vpack.c.bf16 %v1090_v43, %v1089_v42  ;;  %v5075_v43 = vld [vmem:[%s7585_s18] ss:$0 sm:$0xff] }
 0x75a   :  { %v1726_v49 = vadd.f32 %v5667_v46, %v5054_v40  ;;  %v1720_v51 = vpop.f32.mrb[19].mxu1 }
 0x75b   :  { %v1721_v52 = vadd.f32 %v5054_v40, %v1720_v51  ;;  %5676 = vmatprep.mubr.msk.f32.mxu1 %vm419_vm3, %v1729_v45  ;;  %v1081_v40 = vld [vmem:[%s7579_s10 + $0x8] sm:$0xff]  ;;  %6124 = vmatprep.subr.bf16.mxu0 %v6123_v44 }
 0x75c   :  { %5677 = vmatmul.mubr.msk.f32.vlgmr.msra.gmra.mrb[20].mxu1 %vm419_vm3, %v1730_v48  ;;  %v1732_v56 = vmax.f32 %v1726_v49, 0.0  ;;  %v6115_v41 = vpack.c.bf16 %v1081_v40, %v1080_v39  ;;  %6126 = vmatpush3.bf16.msra.mxu0 %v6123_v44  ;;  %v1096_v40 = vld [vmem:[%s7583_s27 + $0x10] sm:$0xff] }
 0x75d   :  { %v1731_v53 = vmax.f32 %v1721_v52, 0.0  ;;  %6110 = vmatpush3.bf16.msra.mxu1 %v6107_v35 }
 0x75e   :  { %6112 = vmatprep.subr.bf16.mxu1 %v6111_v38 }
 0x75f   :  { %5679 = vmatprep.mubr.msk.f32.mxu1 %vm419_vm3, %v1731_v53 }
 0x760   :  { %5680 = vmatmul.mubr.msk.f32.gmra.mrb[22].mxu1 %vm419_vm3, %v1732_v56 }
 0x761   :  { %6114 = vmatpush3.bf16.msra.mxu1 %v6111_v38 }
 0x762   :  { %6116 = vmatprep.subr.bf16.mxu1 %v6115_v41 }
 0x82f   :  { %v5678_v59 = vpop.f32.mrb[20].mxu1 }
 0x830   :  { %v1823_v61 = vadd.f32 %v5678_v59, %v5059_v58  ;;  %v1817_v62 = vpop.f32.mrb[21].mxu1 }
 0x831   :  { %v1818_v63 = vadd.f32 %v5059_v58, %v1817_v62 }
 0x832   :  { %v1839_v0 = vsel %vm419_vm3, %v1823_v61, 0.0 }
 0x833   :  { %1840 = vadd.xlane.f32.xlu1 %v1839_v0  ;;  %v5681_v1 = vpop.f32.mrb[22].mxu1  ;;  %v1836_v2 = vsel %vm419_vm3, %v1818_v63, 0.0  ;;  %v5064_v0 = vld [vmem:[%s7581_s15] ss:$0 sm:$0xff] }
 0x834   :  { %v1833_v5 = vadd.f32 %v5681_v1, %v5059_v58  ;;  %1837 = vadd.xlane.f32.xlu0 %v1836_v2  ;;  %v1827_v6 = vpop.f32.mrb[23].mxu1 }
 0x835   :  { %v1828_v7 = vadd.f32 %v5059_v58, %v1827_v6  ;;  %v5065_v6 = vld [vmem:[%s7582_s12] ss:$0 sm:$0xff] }
 0x836   :  { %v1845_v8 = vsel %vm419_vm3, %v1833_v5, 0.0 }
 0x837   :  { %1846 = vadd.xlane.f32.xlu1 %v1845_v8  ;;  %v1842_v9 = vsel %vm419_vm3, %v1828_v7, 0.0 }
 0x838   :  { %1843 = vadd.xlane.f32.xlu0 %v1842_v9 }
 0x8c0   :  { %v1841_v4 = vpop.xlane.xlu1 %1840 }
 0x8c1   :  { %v1849_v10 = vmul.f32 0.03125, %v1841_v4  ;;  %v1838_v3 = vpop.xlane.xlu0 %1837  ;;  %v1082_v4 = vld [vmem:[%s7579_s10 + $0x10] sm:$0xff] }
 0x8c2   :  { %v1848_v14 = vmul.f32 0.03125, %v1838_v3 }
 0x8c3   :  { %v1853_v15 = vsub.f32 %v1823_v61, %v1849_v10  ;;  %v1083_v10 = vld [vmem:[%s7579_s10 + $0x18] sm:$0xff] }
 0x8c4   :  { %v1852_v17 = vsub.f32 %v1818_v63, %v1848_v14  ;;  %v1847_v18 = vpop.xlane.xlu1 %1846 }
 0x8c5   :  { %v1851_v19 = vmul.f32 0.03125, %v1847_v18  ;;  %v1844_v20 = vpop.xlane.xlu0 %1843  ;;  %v1857_v21 = vmul.f32 %v1853_v15, %v1853_v15 }
 0x8c6   :  { %v1850_v22 = vmul.f32 0.03125, %v1844_v20  ;;  %v1856_v23 = vmul.f32 %v1852_v17, %v1852_v17 }
 0x8c7   :  { %v1855_v24 = vsub.f32 %v1833_v5, %v1851_v19  ;;  %v1863_v25 = vsel %vm419_vm3, %v1857_v21, 0.0 }
 0x8c8   :  { %v1854_v27 = vsub.f32 %v1828_v7, %v1850_v22  ;;  %1864 = vadd.xlane.f32.xlu1 %v1863_v25  ;;  %v1860_v28 = vsel %vm419_vm3, %v1856_v23, 0.0  ;;  %v6119_v22 = vpack.c.bf16 %v1083_v10, %v1082_v4  ;;  %v1092_v25 = vld [vmem:[%s7580_s11 + $0x18] sm:$0xff] }
 0x8c9   :  { %1861 = vadd.xlane.f32.xlu0 %v1860_v28  ;;  %v1859_v29 = vmul.f32 %v1855_v24, %v1855_v24  ;;  %v1094_v28 = vld [vmem:[%s7583_s27] sm:$0xff] }
 0x8ca   :  { %v1858_v30 = vmul.f32 %v1854_v27, %v1854_v27 }
 0x8cb   :  { %v1869_v31 = vsel %vm419_vm3, %v1859_v29, 0.0  ;;  %v1095_v29 = vld [vmem:[%s7583_s27 + $0x8] sm:$0xff] }
 0x8cc   :  { %1870 = vadd.xlane.f32.xlu1 %v1869_v31  ;;  %v1866_v32 = vsel %vm419_vm3, %v1858_v30, 0.0  ;;  %v6131_v30 = vpack.c.bf16 %v1095_v29, %v1094_v28  ;;  %v5074_v31 = vld [vmem:[%s7584_s16] ss:$0 sm:$0xff] }
 0x8cd   :  { %1867 = vadd.xlane.f32.xlu0 %v1866_v32 }
 0x955   :  { %v1865_v45 = vpop.xlane.xlu1 %1864 }
 0x956   :  { %v1873_v46 = vmul.f32 0.03125, %v1865_v45  ;;  %v1862_v48 = vpop.xlane.xlu0 %1861 }
 0x957   :  { %v1872_v49 = vmul.f32 0.03125, %v1862_v48 }
 0x958   :  { %v1877_v51 = vadd.f32 1e-05, %v1873_v46 }
 0x959   :  { %v1876_v52 = vadd.f32 1e-05, %v1872_v49  ;;  %v1871_v53 = vpop.xlane.xlu1 %1870 }
 0x95a   :  { %6422 = vrsqrt.f32 %v1877_v51  ;;  %v1875_v56 = vmul.f32 0.03125, %v1871_v53  ;;  %v1868_v58 = vpop.xlane.xlu0 %1867 }
 0x95b   :  { %6424 = vrsqrt.f32 %v1876_v52  ;;  %v1874_v59 = vmul.f32 0.03125, %v1868_v58 }
 0x95c   :  { %v1879_v61 = vadd.f32 1e-05, %v1875_v56 }
 0x95d   :  { %v1878_v62 = vadd.f32 1e-05, %v1874_v59 }
 0x95e   :  { %6426 = vrsqrt.f32 %v1879_v61 }
 0x95f   :  { %6428 = vrsqrt.f32 %v1878_v62  ;;  %v5080_v62 = vld [vmem:[%s7586_s21] ss:$0 sm:$0xff] }
 0x964   :  { %v6423_v63 = vpop.eup %6422 }
 0x965   :  { %v6425_v1 = vpop.eup %6424  ;;  %v1885_v2 = vmul.f32 %v6423_v63, %v1853_v15 }
 0x966   :  { %v1884_v5 = vmul.f32 %v6425_v1, %v1852_v17 }
 0x967   :  { %v1895_v7 = vmul.f32 %v5064_v0, %v1885_v2 }
 0x968   :  { %v6427_v8 = vpop.eup %6426  ;;  %v1894_v9 = vmul.f32 %v5064_v0, %v1884_v5 }
 0x969   :  { %v6429_v3 = vpop.eup %6428  ;;  %v1887_v14 = vmul.f32 %v6427_v8, %v1855_v24  ;;  %v7200_v20 = vadd.f32 %v5065_v6, %v1895_v7  ;;  %v1091_v24 = vld [vmem:[%s7580_s11 + $0x10] sm:$0xff] }
 0x96a   :  { %v7198_v18 = vadd.f32 %v5065_v6, %v1894_v9  ;;  %v1886_v19 = vmul.f32 %v6429_v3, %v1854_v27  ;;  %v6127_v27 = vpack.c.bf16 %v1092_v25, %v1091_v24 }
 0x96b   :  { %v1897_v21 = vmul.f32 %v5064_v0, %v1887_v14 }
 0x96c   :  { %5690 = vmatprep.mubr.msk.f32.mxu1 %vm419_vm3, %v7198_v18  ;;  %v1896_v15 = vmul.f32 %v5064_v0, %v1886_v19  ;;  %6128 = vmatprep.subr.bf16.mxu0 %v6127_v27 }
 0x96d   :  { %5691 = vmatmul.mubr.msk.f32.vlgmr.msra.gmra.mrb[24].mxu1 %vm419_vm3, %v7200_v20  ;;  %v7208_v23 = vadd.f32 %v5065_v6, %v1897_v21  ;;  %6130 = vmatpush3.bf16.msra.mxu0 %v6127_v27 }
 0x96e   :  { %6118 = vmatpush3.bf16.msra.mxu1 %v6115_v41  ;;  %v7206_v17 = vadd.f32 %v5065_v6, %v1896_v15  ;;  %6132 = vmatprep.subr.bf16.mxu0 %v6131_v30  ;;  %v1097_v41 = vld [vmem:[%s7583_s27 + $0x18] sm:$0xff] }
 0x96f   :  { %6120 = vmatprep.subr.bf16.mxu1 %v6119_v22  ;;  %v6135_v42 = vpack.c.bf16 %v1097_v41, %v1096_v40  ;;  %v1108_v41 = vld [vmem:[%s7588_s23 + $0x38] sm:$0xff] }
 0x970   :  { %5693 = vmatprep.mubr.msk.f32.mxu1 %vm419_vm3, %v7206_v17 }
 0x971   :  { %5694 = vmatmul.mubr.msk.f32.gmra.mrb[26].mxu1 %vm419_vm3, %v7208_v23 }
 0x972   :  { %6122 = vmatpush3.bf16.msra.mxu1 %v6119_v22  ;;  %5704 = vmatprep.mubr.msk.f32.mxu1 %vm419_vm3, %v7119_v50 }
 0x975   :  { %5705 = vmatmul.mubr.msk.f32.vlgmr.msra.gmra.mrb[24].mxu1 %vm419_vm3, %v7117_v47 }
 0x976   :  { %5707 = vmatprep.mubr.msk.f32.mxu1 %vm419_vm3, %v7127_v60 }
 0x979   :  { %5708 = vmatmul.mubr.msk.f32.gmra.mrb[26].mxu1 %vm419_vm3, %v7125_v57 }
 0xa48   :  { %v5706_v50 = vpop.f32.mrb[24].mxu1 }
 0xa49   :  { %v2097_v32 = vadd.f32 %v5706_v50, %v5074_v31  ;;  %v2071_v47 = vpop.f32.mrb[25].mxu1 }
 0xa4a   :  { %v2096_v33 = vadd.f32 %v5074_v31, %v2071_v47 }
 0xa4b   :  { %v2101_v35 = vmax.f32 %v2097_v32, 0.0 }
 0xa4c   :  { %v2100_v60 = vmax.f32 %v2096_v33, 0.0  ;;  %v5709_v34 = vpop.f32.mrb[26].mxu1 }
 0xa4d   :  { %v2099_v57 = vadd.f32 %v5709_v34, %v5074_v31  ;;  %v2081_v36 = vpop.f32.mrb[27].mxu1 }
 0xa4e   :  { %v2098_v37 = vadd.f32 %v5074_v31, %v2081_v36  ;;  %5718 = vmatprep.mubr.msk.f32.mxu0 %vm419_vm3, %v2100_v60  ;;  %v7248_v36 = vld [vmem:[%s7587_s22] sm:$0xff] }
 0xa4f   :  { %5719 = vmatmul.mubr.msk.f32.vlgmr.msra.gmra.mrb[14].mxu0 %vm419_vm3, %v2101_v35  ;;  %v2103_v39 = vmax.f32 %v2099_v57, 0.0  ;;  %5746 = vmatprep.mubr.msk.f32.mxu1 %vm419_vm3, %v7248_v36 }
 0xa50   :  { %v2102_v38 = vmax.f32 %v2098_v37, 0.0  ;;  %6134 = vmatpush3.bf16.msra.mxu0 %v6131_v30  ;;  %v1105_v37 = vld [vmem:[%s7588_s23 + $0x20] sm:$0xff] }
 0xa51   :  { %6136 = vmatprep.subr.bf16.mxu0 %v6135_v42 }
 0xa52   :  { %5721 = vmatprep.mubr.msk.f32.mxu0 %vm419_vm3, %v2102_v38  ;;  %v1106_v38 = vld [vmem:[%s7588_s23 + $0x28] sm:$0xff] }
 0xa53   :  { %5722 = vmatmul.mubr.msk.f32.gmra.mrb[16].mxu0 %vm419_vm3, %v2103_v39  ;;  %v1107_v39 = vld [vmem:[%s7588_s23 + $0x30] sm:$0xff]  ;;  %v6147_v40 = vpack.c.bf16 %v1106_v38, %v1105_v37  ;;  %v1115_v38 = vld [vmem:[%s7592_s24] sm:$0xff] }
 0xa54   :  { %6138 = vmatpush3.bf16.msra.mxu0 %v6135_v42  ;;  %v6151_v42 = vpack.c.bf16 %v1108_v41, %v1107_v39  ;;  %v1116_v39 = vld [vmem:[%s7592_s24 + $0x8] sm:$0xff]  ;;  %v5093_v41 = vld [vmem:[%s7593_s1] ss:$0 sm:$0xff] }
 0xa55   :  { %6148 = vmatprep.subr.bf16.mxu0 %v6147_v40 }
 0xb22   :  { %v5720_v44 = vpop.f32.mrb[14].mxu0 }
 0xb23   :  { %v2194_v45 = vadd.f32 %v5720_v44, %v5075_v43  ;;  %v2188_v46 = vpop.f32.mrb[15].mxu0 }
 0xb24   :  { %v2189_v48 = vadd.f32 %v5075_v43, %v2188_v46 }
 0xb25   :  { %v2208_v52 = vmax.f32 %v2194_v45, 0.0 }
 0xb26   :  { %v2207_v49 = vmax.f32 %v2189_v48, 0.0  ;;  %v5723_v51 = vpop.f32.mrb[16].mxu0 }
 0xb27   :  { %v2204_v53 = vadd.f32 %v5723_v51, %v5075_v43  ;;  %v2198_v56 = vpop.f32.mrb[17].mxu0 }
 0xb28   :  { %v2199_v58 = vadd.f32 %v5075_v43, %v2198_v56  ;;  %5732 = vmatprep.mubr.msk.f32.mxu0 %vm419_vm3, %v2207_v49 }
 0xb29   :  { %5733 = vmatmul.mubr.msk.f32.vlgmr.msra.gmra.mrb[18].mxu0 %vm419_vm3, %v2208_v52  ;;  %v2210_v61 = vmax.f32 %v2204_v53, 0.0 }
 0xb2a   :  { %v2209_v59 = vmax.f32 %v2199_v58, 0.0  ;;  %6150 = vmatpush3.bf16.msra.mxu0 %v6147_v40  ;;  %v6171_v40 = vpack.c.bf16 %v1116_v39, %v1115_v38 }
 0xb2b   :  { %6152 = vmatprep.subr.bf16.mxu0 %v6151_v42 }
 0xb2c   :  { %5735 = vmatprep.mubr.msk.f32.mxu0 %vm419_vm3, %v2209_v59 }
 0xb2d   :  { %5736 = vmatmul.mubr.msk.f32.gmra.mrb[20].mxu0 %vm419_vm3, %v2210_v61 }
 0xb2e   :  { %6154 = vmatpush3.bf16.msra.mxu0 %v6151_v42 }
 0xbfc   :  { %v5734_v63 = vpop.f32.mrb[18].mxu0 }
 0xbfd   :  { %v2301_v0 = vadd.f32 %v5734_v63, %v5080_v62  ;;  %v2295_v1 = vpop.f32.mrb[19].mxu0 }
 0xbfe   :  { %v2296_v2 = vadd.f32 %v5080_v62, %v2295_v1  ;;  %v5086_v1 = vld [vmem:[%s7590_s30] ss:$0 sm:$0xff] }
 0xbff   :  { %v2317_v5 = vsel %vm419_vm3, %v2301_v0, 0.0 }
 0xc00   :  { %2318 = vadd.xlane.f32.xlu1 %v2317_v5  ;;  %v5737_v6 = vpop.f32.mrb[20].mxu0  ;;  %v2314_v7 = vsel %vm419_vm3, %v2296_v2, 0.0 }
 0xc01   :  { %v2311_v8 = vadd.f32 %v5737_v6, %v5080_v62  ;;  %2315 = vadd.xlane.f32.xlu0 %v2314_v7  ;;  %v2305_v9 = vpop.f32.mrb[21].mxu0 }
 0xc02   :  { %v2306_v4 = vadd.f32 %v5080_v62, %v2305_v9  ;;  %v5085_v62 = vld [vmem:[%s7589_s26] ss:$0 sm:$0xff] }
 0xc03   :  { %v2323_v10 = vsel %vm419_vm3, %v2311_v8, 0.0 }
 0xc04   :  { %2324 = vadd.xlane.f32.xlu1 %v2323_v10  ;;  %v2320_v3 = vsel %vm419_vm3, %v2306_v4, 0.0 }
 0xc05   :  { %2321 = vadd.xlane.f32.xlu0 %v2320_v3 }
 0xc8d   :  { %v2319_v14 = vpop.xlane.xlu1 %2318 }
 0xc8e   :  { %v2327_v19 = vmul.f32 0.03125, %v2319_v14  ;;  %v2316_v21 = vpop.xlane.xlu0 %2315 }
 0xc8f   :  { %v2326_v22 = vmul.f32 0.03125, %v2316_v21 }
 0xc90   :  { %v2331_v15 = vsub.f32 %v2301_v0, %v2327_v19 }
 0xc91   :  { %v2330_v24 = vsub.f32 %v2296_v2, %v2326_v22  ;;  %v2325_v25 = vpop.xlane.xlu1 %2324 }
 0xc92   :  { %v2329_v27 = vmul.f32 0.03125, %v2325_v25  ;;  %v2322_v28 = vpop.xlane.xlu0 %2321  ;;  %v2335_v29 = vmul.f32 %v2331_v15, %v2331_v15  ;;  %v7259_v25 = vld [vmem:[%s7587_s22 + $0x8] sm:$0xff] }
 0xc93   :  { %v2328_v30 = vmul.f32 0.03125, %v2322_v28  ;;  %v2334_v31 = vmul.f32 %v2330_v24, %v2330_v24  ;;  %v1102_v28 = vld [vmem:[%s7588_s23 + $0x8] sm:$0xff] }
 0xc94   :  { %v2333_v50 = vsub.f32 %v2311_v8, %v2329_v27  ;;  %v2341_v32 = vsel %vm419_vm3, %v2335_v29, 0.0  ;;  %v1101_v27 = vld [vmem:[%s7588_s23] sm:$0xff] }
 0xc95   :  { %v2332_v47 = vsub.f32 %v2306_v4, %v2328_v30  ;;  %2342 = vadd.xlane.f32.xlu1 %v2341_v32  ;;  %v2338_v33 = vsel %vm419_vm3, %v2334_v31, 0.0  ;;  %v6155_v29 = vpack.c.bf16 %v1102_v28, %v1101_v27  ;;  %v1110_v30 = vld [vmem:[%s7591_s28] sm:$0xff]  ;;  %v1111_v31 = vld [vmem:[%s7591_s28 + $0x8] sm:$0xff]  ;;  %v1103_v32 = vld [vmem:[%s7588_s23 + $0x10] sm:$0xff] }
 0xc96   :  { %2339 = vadd.xlane.f32.xlu0 %v2338_v33  ;;  %v2337_v60 = vmul.f32 %v2333_v50, %v2333_v50 }
 0xc97   :  { %v2336_v34 = vmul.f32 %v2332_v47, %v2332_v47  ;;  %6156 = vmatprep.subr.bf16.mxu0 %v6155_v29 }
 0xc98   :  { %v2347_v35 = vsel %vm419_vm3, %v2337_v60, 0.0 }
 0xc99   :  { %2348 = vadd.xlane.f32.xlu1 %v2347_v35  ;;  %v2344_v57 = vsel %vm419_vm3, %v2336_v34, 0.0  ;;  %v1112_v35 = vld [vmem:[%s7591_s28 + $0x10] sm:$0xff] }
 0xc9a   :  { %2345 = vadd.xlane.f32.xlu0 %v2344_v57  ;;  %v1113_v57 = vld [vmem:[%s7591_s28 + $0x18] sm:$0xff] }
 0xc9b   :  { %v6167_v37 = vpack.c.bf16 %v1113_v57, %v1112_v35  ;;  %v5101_v35 = vld [vmem:[%s7597_s25] ss:$0 sm:$0xff] }
 0xd22   :  { %v2343_v43 = vpop.xlane.xlu1 %2342 }
 0xd23   :  { %v2351_v44 = vmul.f32 0.03125, %v2343_v43  ;;  %v2340_v45 = vpop.xlane.xlu0 %2339 }
 0xd24   :  { %v2350_v46 = vmul.f32 0.03125, %v2340_v45 }
 0xd25   :  { %v2355_v48 = vadd.f32 1e-05, %v2351_v44 }
 0xd26   :  { %v2354_v49 = vadd.f32 1e-05, %v2350_v46  ;;  %v2349_v51 = vpop.xlane.xlu1 %2348 }
 0xd27   :  { %6430 = vrsqrt.f32 %v2355_v48  ;;  %v2353_v52 = vmul.f32 0.03125, %v2349_v51  ;;  %v2346_v53 = vpop.xlane.xlu0 %2345 }
 0xd28   :  { %6432 = vrsqrt.f32 %v2354_v49  ;;  %v2352_v56 = vmul.f32 0.03125, %v2346_v53  ;;  %v1118_v49 = vld [vmem:[%s7592_s24 + $0x18] sm:$0xff] }
 0xd29   :  { %v2357_v58 = vadd.f32 1e-05, %v2353_v52  ;;  %v5094_v52 = vld [vmem:[%s7594_s0] ss:$0 sm:$0xff] }
 0xd2a   :  { %v2356_v59 = vadd.f32 1e-05, %v2352_v56 }
 0xd2b   :  { %6434 = vrsqrt.f32 %v2357_v58 }
 0xd2c   :  { %6436 = vrsqrt.f32 %v2356_v59 }
 0xd31   :  { %v6431_v61 = vpop.eup %6430 }
 0xd32   :  { %v6433_v63 = vpop.eup %6432  ;;  %v2363_v0 = vmul.f32 %v6431_v61, %v2331_v15 }
 0xd33   :  { %v2362_v2 = vmul.f32 %v6433_v63, %v2330_v24  ;;  %v6462_v63 = vld [vmem:[%s7569_s29] sm:$0xff] }
 0xd34   :  { %v2373_v5 = vmul.f32 %v5085_v62, %v2363_v0  ;;  %v5097_v0 = vld [vmem:[%s7595_s5] ss:$0 sm:$0xff] }
 0xd35   :  { %v6435_v6 = vpop.eup %6434  ;;  %v2372_v7 = vmul.f32 %v5085_v62, %v2362_v2 }
 0xd36   :  { %v6437_v8 = vpop.eup %6436  ;;  %v2383_v9 = vadd.f32 %v5086_v1, %v2373_v5  ;;  %v2365_v4 = vmul.f32 %v6435_v6, %v2333_v50  ;;  %v6163_v50 = vpack.c.bf16 %v1111_v31, %v1110_v30 }
 0xd37   :  { %v2382_v10 = vadd.f32 %v5086_v1, %v2372_v7  ;;  %v2364_v3 = vmul.f32 %v6437_v8, %v2332_v47  ;;  %v1104_v47 = vld [vmem:[%s7588_s23 + $0x18] sm:$0xff] }
 0xd38   :  { %v2375_v14 = vmul.f32 %v5085_v62, %v2365_v4  ;;  %v6159_v34 = vpack.c.bf16 %v1104_v47, %v1103_v32  ;;  %v5100_v47 = vld [vmem:[%s7596_s9] ss:$0 sm:$0xff] }
 0xd39   :  { %v6139_v19 = vpack.c.bf16 %v2383_v9, %v2382_v10  ;;  %v2374_v21 = vmul.f32 %v5085_v62, %v2364_v3 }
 0xd3a   :  { %v2385_v22 = vadd.f32 %v5086_v1, %v2375_v14 }
 0xd3b   :  { %6140 = vmatprep.subr.bf16.mxu1 %v6139_v19  ;;  %v2384_v15 = vadd.f32 %v5086_v1, %v2374_v21 }
 0xd3c   :  { %6142 = vmatpush3.bf16.msra.mxu1 %v6139_v19 }
 0xd3d   :  { %v6143_v24 = vpack.c.bf16 %v2385_v22, %v2384_v15 }
 0xd3f   :  { %6144 = vmatprep.subr.bf16.mxu1 %v6143_v24 }
 0xd40   :  { %6146 = vmatpush3.bf16.msra.mxu1 %v6143_v24 }
 0xd41   :  { %6164 = vmatprep.subr.bf16.mxu1 %v6163_v50 }
 0xd43   :  { %5747 = vmatmul.mubr.msk.f32.vlgmr.msra.gmra.mrb[28].mxu1 %vm419_vm3, %v7259_v25 }
 0xd44   :  { %6166 = vmatpush3.bf16.msra.mxu1 %v6163_v50 }
 0xd45   :  { %6168 = vmatprep.subr.bf16.mxu1 %v6167_v37 }
 0xd48   :  { %6170 = vmatpush3.bf16.msra.mxu1 %v6167_v37 }
 0xd49   :  { %6172 = vmatprep.subr.bf16.mxu1 %v6171_v40 }
 0xe16   :  { %v5748_v33 = vpop.f32.mrb[28].mxu1 }
 0xe17   :  { %v2458_v60 = vpop.f32.mrb[29].mxu1 }
 0xe18   :  { %5757 = vmatprep.mubr.msk.f32.mxu0 %vm419_vm3, %v2458_v60 }
 0xe19   :  { %5758 = vmatmul.mubr.msk.f32.vlgmr.msra.gmra.mrb[22].mxu0 %vm419_vm3, %v5748_v33 }
 0xe1a   :  { %6158 = vmatpush3.bf16.msra.mxu0 %v6155_v29  ;;  %5768 = vmatprep.mubr.msk.f32.mxu0 %vm419_vm3, %v7069_v54 }
 0xe1b   :  { %6160 = vmatprep.subr.bf16.mxu0 %v6159_v34 }
 0xe1e   :  { %6162 = vmatpush3.bf16.msra.mxu0 %v6159_v34 }
 0xe21   :  { %5769 = vmatmul.mubr.msk.f32.vlgmr.msra.gmra.mrb[22].mxu0 %vm419_vm3, %v7071_v55 }
 0xe22   :  { %5797 = vmatprep.mubr.msk.f32.mxu0 %vm1122_vm5, %v7059_v26  ;;  %v1117_v26 = vld [vmem:[%s7592_s24 + $0x10] sm:$0xff] }
 0xe23   :  { %v6175_v51 = vpack.c.bf16 %v1118_v49, %v1117_v26  ;;  %v6463_v26 = vld [vmem:[%s7569_s29 + $0x8] sm:$0xff]  ;;  %v6465_v49 = vld [vmem:[%s7569_s29 + $0x10] sm:$0xff] }
 0xef4   :  { %v5770_v42 = vpop.f32.mrb[22].mxu0 }
 0xef5   :  { %v2636_v43 = vadd.f32 %v5770_v42, %v5093_v41  ;;  %v2620_v44 = vpop.f32.mrb[23].mxu0  ;;  %v5107_v42 = vld [vmem:[%s7573_s6 + $0x88] sm:$0xff] }
 0xef6   :  { %v2635_v45 = vadd.f32 %v5093_v41, %v2620_v44  ;;  %v5106_v41 = vld [vmem:[%s7573_s6 + $0x80] sm:$0xff] }
 0xef7   :  { %v2638_v48 = vmax.f32 %v2636_v43, 0.0 }
 0xef8   :  { %v2637_v46 = vmax.f32 %v2635_v45, 0.0  ;;  %v6187_v45 = vpack.c.bf16 %v5107_v42, %v5106_v41  ;;  %v5123_v41 = vld [vmem:[%s7575_s4 + $0x38] sm:$0xff] }
 0xefa   :  { %5779 = vmatprep.mubr.msk.f32.mxu1 %vm419_vm3, %v2637_v46  ;;  %v5108_v46 = vld [vmem:[%s7573_s6 + $0x90] sm:$0xff] }
 0xefb   :  { %5780 = vmatmul.mubr.msk.f32.vlgmr.msra.gmra.mrb[30].mxu1 %vm419_vm3, %v2638_v48  ;;  %v5109_v48 = vld [vmem:[%s7573_s6 + $0x98] sm:$0xff] }
 0xefc   :  { %6174 = vmatpush3.bf16.msra.mxu1 %v6171_v40 }
 0xefd   :  { %6176 = vmatprep.subr.bf16.mxu1 %v6175_v51 }
 0xf00   :  { %6178 = vmatpush3.bf16.msra.mxu1 %v6175_v51  ;;  %v6466_v51 = vld [vmem:[%s7570_s3 + $0x10] sm:$0xff] }
 0xfce   :  { %v5781_v53 = vpop.f32.mrb[30].mxu1 }
 0xfcf   :  { %v2723_v56 = vadd.f32 %v5781_v53, %v5094_v52  ;;  %v2717_v58 = vpop.f32.mrb[31].mxu1  ;;  %v6468_v53 = vld [vmem:[%s7570_s3 + $0x18] sm:$0xff] }
 0xfd0   :  { %v2718_v59 = vadd.f32 %v5094_v52, %v2717_v58  ;;  %v6467_v52 = vld [vmem:[%s7569_s29 + $0x18] sm:$0xff]  ;;  %v5103_v58 = vld [vmem:[%s7573_s6 + $0x68] sm:$0xff]  ;;  %s7598_s29 = sld [smem:[#allocation52_spill]] }
 0xfd1   :  { %v2727_v62 = vmax.f32 %v2723_v56, 0.0  ;;  %v5102_v56 = vld [vmem:[%s7573_s6 + $0x60] sm:$0xff] }
 0xfd2   :  { %v2726_v61 = vmax.f32 %v2718_v59, 0.0  ;;  %v6195_v59 = vpack.c.bf16 %v5103_v58, %v5102_v56 }
 0xfd4   :  { %5790 = vmatprep.mubr.msk.f32.mxu1 %vm419_vm3, %v2726_v61  ;;  %v5115_v61 = vld [vmem:[%s7574_s20 + $0x20] sm:$0xff] }
 0xfd5   :  { %5791 = vmatmul.mubr.msk.f32.vlgmr.msra.gmra.mrb[32].mxu1 %vm419_vm3, %v2727_v62  ;;  %v5116_v62 = vld [vmem:[%s7574_s20 + $0x28] sm:$0xff] }
 0xfd6   :  { %5807 = vmatprep.mubr.msk.f32.mxu1 %vm1122_vm5, %v6462_v63  ;;  %v6211_v63 = vpack.c.bf16 %v5116_v62, %v5115_v61 }
0x10a8   :  { %v5792_v1 = vpop.f32.mrb[32].mxu1 }
0x10a9   :  { %v2812_v2 = vadd.f32 %v5792_v1, %v5097_v0  ;;  %v2806_v5 = vpop.f32.mrb[33].mxu1  ;;  %v5105_v1 = vld [vmem:[%s7573_s6 + $0x78] sm:$0xff] }
0x10aa   :  { %v2807_v6 = vadd.f32 %v5097_v0, %v2806_v5  ;;  %v5104_v0 = vld [vmem:[%s7573_s6 + $0x70] sm:$0xff] }
0x10ab   :  { %v2818_v7 = vsel %vm419_vm3, %v2812_v2, 0.0 }
0x10ac   :  { %2819 = vadd.xlane.f32.xlu1 %v2818_v7  ;;  %v2815_v8 = vsel %vm419_vm3, %v2807_v6, 0.0  ;;  %v6199_v7 = vpack.c.bf16 %v5105_v1, %v5104_v0 }
0x10ad   :  { %2816 = vadd.xlane.f32.xlu0 %v2815_v8 }
0x1139   :  { %v2820_v9 = vpop.xlane.xlu1 %2819 }
0x113a   :  { %v2822_v4 = vmul.f32 0.03125, %v2820_v9  ;;  %v2817_v10 = vpop.xlane.xlu0 %2816  ;;  %v5110_v9 = vld [vmem:[%s7573_s6 + $0xa0] sm:$0xff] }
0x113b   :  { %v2821_v3 = vmul.f32 0.03125, %v2817_v10 }
0x113c   :  { %v2824_v14 = vsub.f32 %v2812_v2, %v2822_v4  ;;  %v5111_v4 = vld [vmem:[%s7573_s6 + $0xa8] sm:$0xff] }
0x113d   :  { %v2823_v19 = vsub.f32 %v2807_v6, %v2821_v3 }
0x113e   :  { %v2826_v21 = vmul.f32 %v2824_v14, %v2824_v14 }
0x113f   :  { %v2825_v22 = vmul.f32 %v2823_v19, %v2823_v19 }
0x1140   :  { %v2830_v15 = vsel %vm419_vm3, %v2826_v21, 0.0 }
0x1141   :  { %2831 = vadd.xlane.f32.xlu1 %v2830_v15  ;;  %v2827_v24 = vsel %vm419_vm3, %v2825_v22, 0.0  ;;  %v5112_v22 = vld [vmem:[%s7573_s6 + $0xb0] sm:$0xff]  ;;  %v5113_v15 = vld [vmem:[%s7573_s6 + $0xb8] sm:$0xff] }
0x1142   :  { %2828 = vadd.xlane.f32.xlu0 %v2827_v24  ;;  %v6207_v24 = vpack.c.bf16 %v5113_v15, %v5112_v22 }
0x11ce   :  { %v2832_v27 = vpop.xlane.xlu1 %2831 }
0x11cf   :  { %v2834_v28 = vmul.f32 0.03125, %v2832_v27  ;;  %v2829_v29 = vpop.xlane.xlu0 %2828  ;;  %v2859_v27 = vadd.f32 %v7198_v18, %v7143_v12  ;;  %v2862_v12 = vadd.f32 %v7208_v23, %v7157_v11  ;;  %v5117_v18 = vld [vmem:[%s7574_s20 + $0x30] sm:$0xff] }
0x11d0   :  { %v2833_v30 = vmul.f32 0.03125, %v2829_v29  ;;  %v2861_v29 = vadd.f32 %v7206_v17, %v7151_v16 }
0x11d1   :  { %v2836_v31 = vadd.f32 1e-05, %v2834_v28  ;;  %v2860_v28 = vadd.f32 %v7200_v20, %v7149_v13  ;;  %v5189_v20 = vld [vmem:[%s7576_s17 + $0x1] ss:$0 sm:$0xff] }
0x11d2   :  { %v2835_v50 = vadd.f32 1e-05, %v2833_v30  ;;  %v5118_v30 = vld [vmem:[%s7574_s20 + $0x38] sm:$0xff] }
0x11d3   :  { %6438 = vrsqrt.f32 %v2836_v31  ;;  %v6215_v31 = vpack.c.bf16 %v5118_v30, %v5117_v18 }
0x11d4   :  { %6440 = vrsqrt.f32 %v2835_v50  ;;  %v5120_v50 = vld [vmem:[%s7575_s4 + $0x20] sm:$0xff] }
0x11dd   :  { %v6439_v32 = vpop.eup %6438 }
0x11de   :  { %v6441_v33 = vpop.eup %6440  ;;  %v2840_v60 = vmul.f32 %v6439_v32, %v2824_v14  ;;  %v5121_v32 = vld [vmem:[%s7575_s4 + $0x28] sm:$0xff] }
0x11df   :  { %v2839_v34 = vmul.f32 %v6441_v33, %v2823_v19  ;;  %v6203_v19 = vpack.c.bf16 %v5111_v4, %v5110_v9  ;;  %v6219_v13 = vpack.c.bf16 %v5121_v32, %v5120_v50 }
0x11e0   :  { %v2848_v57 = vmul.f32 %v5100_v47, %v2840_v60 }
0x11e1   :  { %v2847_v37 = vmul.f32 %v5100_v47, %v2839_v34 }
0x11e2   :  { %v2856_v38 = vadd.f32 %v5101_v35, %v2848_v57 }
0x11e3   :  { %v2855_v39 = vadd.f32 %v5101_v35, %v2847_v37 }
0x11e4   :  { %v7299_v40 = vadd.f32 %v2856_v38, %v7071_v55  ;;  %v6191_v55 = vpack.c.bf16 %v5109_v48, %v5108_v46 }
0x11e5   :  { %v7304_v43 = vadd.f32 %v2855_v39, %v7069_v54  ;;  %v6464_v54 = vld [vmem:[%s7570_s3 + $0x8] sm:$0xff]  ;;  %v5122_v39 = vld [vmem:[%s7575_s4 + $0x30] sm:$0xff]  ;;  %s7599_s3 = sld [smem:[#allocation53_spill]] }
0x11e6   :  { %v6223_v42 = vpack.c.bf16 %v5123_v41, %v5122_v39  ;;  %v5128_v39 = vld [vmem:[%s7579_s10 + $0x48] sm:$0xff] }
0x11e7   :  { %v6179_v44 = vpack.c.bf16 %v7299_v40, %v7304_v43 }
0x11e9   :  { %6180 = vmatprep.subr.bf16.mxu0 %v6179_v44  ;;  %6184 = vmatprep.subr.bf16.mxu1 %v6179_v44 }
0x11ea   :  { %6182 = vmatpush3.bf16.msra.mxu0 %v6179_v44  ;;  %6186 = vmatpush3.bf16.msra.mxu1 %v6179_v44  ;;  %v5190_v44 = vld [vmem:[%s7577_s2 + $0x1] ss:$0 sm:$0xff] }
0x11eb   :  { %6188 = vmatprep.subr.bf16.mxu0 %v6187_v45  ;;  %6212 = vmatprep.subr.bf16.mxu1 %v6211_v63 }
0x11ed   :  { %5808 = vmatmul.mubr.msk.f32.vlgmr.msra.gmra.mrb[34].mxu1 %vm1122_vm5, %v6463_v26  ;;  %5798 = vmatmul.mubr.msk.f32.vlgmr.msra.gmra.mrb[24].mxu0 %vm1122_vm5, %v6464_v54 }
0x11ee   :  { %5810 = vmatprep.mubr.msk.f32.mxu1 %vm1122_vm5, %v6465_v49  ;;  %5800 = vmatprep.mubr.msk.f32.mxu0 %vm1122_vm5, %v6466_v51 }
0x11ef   :  { %6190 = vmatpush3.bf16.msra.mxu0 %v6187_v45  ;;  %6214 = vmatpush3.bf16.msra.mxu1 %v6211_v63 }
0x11f0   :  { %6192 = vmatprep.subr.bf16.mxu0 %v6191_v55  ;;  %6216 = vmatprep.subr.bf16.mxu1 %v6215_v31 }
0x11f1   :  { %5811 = vmatmul.mubr.msk.f32.gmra.mrb[36].mxu1 %vm1122_vm5, %v6467_v52  ;;  %5801 = vmatmul.mubr.msk.f32.gmra.mrb[26].mxu0 %vm1122_vm5, %v6468_v53 }
0x11f3   :  { %6194 = vmatpush3.bf16.msra.mxu0 %v6191_v55  ;;  %6218 = vmatpush3.bf16.msra.mxu1 %v6215_v31 }
0x11f4   :  { %6196 = vmatprep.subr.bf16.mxu0 %v6195_v59  ;;  %6220 = vmatprep.subr.bf16.mxu1 %v6219_v13 }
0x12c0   :  { %v5809_v2 = vpop.f32.mrb[34].mxu1  ;;  %v7328_v5 = vpop.f32.mrb[24].mxu0 }
0x12c1   :  { %v3105_v6 = vpop.f32.mrb[35].mxu1  ;;  %v7330_v8 = vpop.f32.mrb[25].mxu0 }
0x12c2   :  { %5821 = vmatprep.mubr.msk.f32.mxu0 %vm419_vm3, %v3105_v6 }
0x12c3   :  { %5822 = vmatmul.mubr.msk.f32.vlgmr.msra.gmra.mrb[28].mxu0 %vm419_vm3, %v5809_v2 }
0x12c4   :  { %v5812_v10 = vpop.f32.mrb[36].mxu1  ;;  %6198 = vmatpush3.bf16.msra.mxu0 %v6195_v59  ;;  %v7336_v3 = vpop.f32.mrb[26].mxu0  ;;  %v5195_v59 = vld [vmem:[%s7578_s7 + $0x1] ss:$0 sm:$0xff] }
0x12c5   :  { %v3115_v14 = vpop.f32.mrb[37].mxu1  ;;  %6200 = vmatprep.subr.bf16.mxu0 %v6199_v7  ;;  %v7338_v21 = vpop.f32.mrb[27].mxu0 }
0x12c6   :  { %5824 = vmatprep.mubr.msk.f32.mxu0 %vm419_vm3, %v3115_v14 }
0x12c7   :  { %5825 = vmatmul.mubr.msk.f32.gmra.mrb[30].mxu0 %vm419_vm3, %v5812_v10 }
0x12c8   :  { %6202 = vmatpush3.bf16.msra.mxu0 %v6199_v7  ;;  %5835 = vmatprep.mubr.msk.f32.mxu0 %vm419_vm3, %v7330_v8 }
0x12c9   :  { %6204 = vmatprep.subr.bf16.mxu0 %v6203_v19 }
0x12cb   :  { %5836 = vmatmul.mubr.msk.f32.vlgmr.msra.gmra.mrb[28].mxu0 %vm419_vm3, %v7328_v5 }
0x12cc   :  { %6206 = vmatpush3.bf16.msra.mxu0 %v6203_v19  ;;  %5838 = vmatprep.mubr.msk.f32.mxu0 %vm419_vm3, %v7338_v21 }
0x12cd   :  { %6208 = vmatprep.subr.bf16.mxu0 %v6207_v24 }
0x12cf   :  { %5839 = vmatmul.mubr.msk.f32.gmra.mrb[30].mxu0 %vm419_vm3, %v7336_v3 }
0x12d0   :  { %6210 = vmatpush3.bf16.msra.mxu0 %v6207_v24  ;;  %5849 = vmatprep.mubr.msk.f32.mxu0 %vm419_vm3, %v2859_v27 }
0x12d3   :  { %5850 = vmatmul.mubr.msk.f32.vlgmr.msra.gmra.mrb[28].mxu0 %vm419_vm3, %v2860_v28 }
0x12d4   :  { %5852 = vmatprep.mubr.msk.f32.mxu0 %vm419_vm3, %v2861_v29 }
0x12d7   :  { %5853 = vmatmul.mubr.msk.f32.gmra.mrb[30].mxu0 %vm419_vm3, %v2862_v12 }
0x13a6   :  { %v5851_v16 = vpop.f32.mrb[28].mxu0 }
0x13a7   :  { %v3426_v17 = vadd.f32 %v5851_v16, %v5189_v20  ;;  %v3396_v47 = vpop.f32.mrb[29].mxu0 }
0x13a8   :  { %v3425_v33 = vadd.f32 %v5189_v20, %v3396_v47 }
0x13a9   :  { %v3430_v23 = vmax.f32 %v3426_v17, 0.0 }
0x13aa   :  { %v3429_v60 = vmax.f32 %v3425_v33, 0.0  ;;  %v5854_v11 = vpop.f32.mrb[30].mxu0 }
0x13ab   :  { %v3428_v34 = vadd.f32 %v5854_v11, %v5189_v20  ;;  %v3406_v35 = vpop.f32.mrb[31].mxu0  ;;  %v5131_v11 = vld [vmem:[%s7579_s10 + $0x60] sm:$0xff] }
0x13ac   :  { %v3427_v57 = vadd.f32 %v5189_v20, %v3406_v35  ;;  %5863 = vmatprep.mubr.msk.f32.mxu1 %vm419_vm3, %v3429_v60  ;;  %v5133_v35 = vld [vmem:[%s7579_s10 + $0x70] sm:$0xff] }
0x13ad   :  { %5864 = vmatmul.mubr.msk.f32.vlgmr.msra.gmra.mrb[38].mxu1 %vm419_vm3, %v3430_v23  ;;  %v3432_v38 = vmax.f32 %v3428_v34, 0.0  ;;  %v5132_v23 = vld [vmem:[%s7579_s10 + $0x68] sm:$0xff] }
0x13ae   :  { %v3431_v37 = vmax.f32 %v3427_v57, 0.0  ;;  %6222 = vmatpush3.bf16.msra.mxu1 %v6219_v13  ;;  %v6227_v34 = vpack.c.bf16 %v5132_v23, %v5131_v11  ;;  %v5134_v57 = vld [vmem:[%s7579_s10 + $0x78] sm:$0xff] }
0x13af   :  { %6224 = vmatprep.subr.bf16.mxu1 %v6223_v42 }
0x13b0   :  { %5866 = vmatprep.mubr.msk.f32.mxu1 %vm419_vm3, %v3431_v37  ;;  %v6231_v37 = vpack.c.bf16 %v5134_v57, %v5133_v35  ;;  %v5143_v35 = vld [vmem:[%s7583_s27 + $0x30] sm:$0xff]  ;;  %v5144_v57 = vld [vmem:[%s7583_s27 + $0x38] sm:$0xff] }
0x13b1   :  { %5867 = vmatmul.mubr.msk.f32.gmra.mrb[40].mxu1 %vm419_vm3, %v3432_v38  ;;  %v5127_v38 = vld [vmem:[%s7579_s10 + $0x40] sm:$0xff] }
0x13b2   :  { %6226 = vmatpush3.bf16.msra.mxu1 %v6223_v42  ;;  %v6235_v41 = vpack.c.bf16 %v5128_v39, %v5127_v38  ;;  %v5136_v42 = vld [vmem:[%s7580_s11 + $0x20] sm:$0xff] }
0x13b3   :  { %6228 = vmatprep.subr.bf16.mxu1 %v6227_v34  ;;  %v5211_v38 = vld [vmem:[%s7585_s18 + $0x1] ss:$0 sm:$0xff] }
0x1480   :  { %v5865_v45 = vpop.f32.mrb[38].mxu1 }
0x1481   :  { %v3523_v46 = vadd.f32 %v5865_v45, %v5190_v44  ;;  %v3517_v48 = vpop.f32.mrb[39].mxu1 }
0x1482   :  { %v3518_v55 = vadd.f32 %v5190_v44, %v3517_v48 }
0x1483   :  { %v3537_v49 = vmax.f32 %v3523_v46, 0.0 }
0x1484   :  { %v3536_v26 = vmax.f32 %v3518_v55, 0.0  ;;  %v5868_v54 = vpop.f32.mrb[40].mxu1 }
0x1485   :  { %v3533_v51 = vadd.f32 %v5868_v54, %v5190_v44  ;;  %v3527_v52 = vpop.f32.mrb[41].mxu1 }
0x1486   :  { %v3528_v53 = vadd.f32 %v5190_v44, %v3527_v52  ;;  %5877 = vmatprep.mubr.msk.f32.mxu1 %vm419_vm3, %v3536_v26  ;;  %v5137_v44 = vld [vmem:[%s7580_s11 + $0x28] sm:$0xff] }
0x1487   :  { %5878 = vmatmul.mubr.msk.f32.vlgmr.msra.gmra.mrb[42].mxu1 %vm419_vm3, %v3537_v49  ;;  %v3539_v58 = vmax.f32 %v3533_v51, 0.0  ;;  %v6243_v45 = vpack.c.bf16 %v5137_v44, %v5136_v42 }
0x1488   :  { %v3538_v56 = vmax.f32 %v3528_v53, 0.0  ;;  %6230 = vmatpush3.bf16.msra.mxu1 %v6227_v34 }
0x1489   :  { %6232 = vmatprep.subr.bf16.mxu1 %v6231_v37  ;;  %6244 = vmatprep.subr.bf16.mxu0 %v6243_v45 }
0x148a   :  { %5880 = vmatprep.mubr.msk.f32.mxu1 %vm419_vm3, %v3538_v56  ;;  %6246 = vmatpush3.bf16.msra.mxu0 %v6243_v45 }
0x148b   :  { %5881 = vmatmul.mubr.msk.f32.gmra.mrb[44].mxu1 %vm419_vm3, %v3539_v58 }
0x148c   :  { %6234 = vmatpush3.bf16.msra.mxu1 %v6231_v37  ;;  %v6255_v37 = vpack.c.bf16 %v5144_v57, %v5143_v35 }
0x148d   :  { %6236 = vmatprep.subr.bf16.mxu1 %v6235_v41 }
0x155a   :  { %v5879_v61 = vpop.f32.mrb[42].mxu1 }
0x155b   :  { %v3630_v62 = vadd.f32 %v5879_v61, %v5195_v59  ;;  %v3624_v63 = vpop.f32.mrb[43].mxu1 }
0x155c   :  { %v3625_v0 = vadd.f32 %v5195_v59, %v3624_v63 }
0x155d   :  { %v3646_v1 = vsel %vm419_vm3, %v3630_v62, 0.0 }
0x155e   :  { %3647 = vadd.xlane.f32.xlu1 %v3646_v1  ;;  %v5882_v2 = vpop.f32.mrb[44].mxu1  ;;  %v3643_v6 = vsel %vm419_vm3, %v3625_v0, 0.0 }
0x155f   :  { %v3640_v7 = vadd.f32 %v5882_v2, %v5195_v59  ;;  %3644 = vadd.xlane.f32.xlu0 %v3643_v6  ;;  %v3634_v9 = vpop.f32.mrb[45].mxu1  ;;  %v5201_v2 = vld [vmem:[%s7582_s12 + $0x1] ss:$0 sm:$0xff] }
0x1560   :  { %v3635_v4 = vadd.f32 %v5195_v59, %v3634_v9 }
0x1561   :  { %v3652_v10 = vsel %vm419_vm3, %v3640_v7, 0.0 }
0x1562   :  { %3653 = vadd.xlane.f32.xlu1 %v3652_v10  ;;  %v3649_v14 = vsel %vm419_vm3, %v3635_v4, 0.0  ;;  %v5130_v10 = vld [vmem:[%s7579_s10 + $0x58] sm:$0xff] }
0x1563   :  { %3650 = vadd.xlane.f32.xlu0 %v3649_v14 }
0x15eb   :  { %v3648_v19 = vpop.xlane.xlu1 %3647 }
0x15ec   :  { %v3656_v22 = vmul.f32 0.03125, %v3648_v19  ;;  %v3645_v15 = vpop.xlane.xlu0 %3644 }
0x15ed   :  { %v3655_v24 = vmul.f32 0.03125, %v3645_v15 }
0x15ee   :  { %v3660_v27 = vsub.f32 %v3630_v62, %v3656_v22  ;;  %v5200_v62 = vld [vmem:[%s7581_s15 + $0x1] ss:$0 sm:$0xff] }
0x15ef   :  { %v3659_v28 = vsub.f32 %v3625_v0, %v3655_v24  ;;  %v3654_v29 = vpop.xlane.xlu1 %3653 }
0x15f0   :  { %v3658_v12 = vmul.f32 0.03125, %v3654_v29  ;;  %v3651_v18 = vpop.xlane.xlu0 %3650  ;;  %v3664_v30 = vmul.f32 %v3660_v27, %v3660_v27 }
0x15f1   :  { %v3657_v31 = vmul.f32 0.03125, %v3651_v18  ;;  %v3663_v50 = vmul.f32 %v3659_v28, %v3659_v28 }
0x15f2   :  { %v3662_v32 = vsub.f32 %v3640_v7, %v3658_v12  ;;  %v3670_v13 = vsel %vm419_vm3, %v3664_v30, 0.0  ;;  %v5138_v30 = vld [vmem:[%s7580_s11 + $0x30] sm:$0xff] }
0x15f3   :  { %v3661_v20 = vsub.f32 %v3635_v4, %v3657_v31  ;;  %3671 = vadd.xlane.f32.xlu1 %v3670_v13  ;;  %v3667_v16 = vsel %vm419_vm3, %v3663_v50, 0.0  ;;  %v5129_v4 = vld [vmem:[%s7579_s10 + $0x50] sm:$0xff]  ;;  %v5139_v31 = vld [vmem:[%s7580_s11 + $0x38] sm:$0xff]  ;;  %v5142_v13 = vld [vmem:[%s7583_s27 + $0x28] sm:$0xff] }
0x15f4   :  { %3668 = vadd.xlane.f32.xlu0 %v3667_v16  ;;  %v3666_v17 = vmul.f32 %v3662_v32, %v3662_v32  ;;  %v6239_v12 = vpack.c.bf16 %v5130_v10, %v5129_v4  ;;  %v6247_v50 = vpack.c.bf16 %v5139_v31, %v5138_v30 }
0x15f5   :  { %v3665_v47 = vmul.f32 %v3661_v20, %v3661_v20 }
0x15f6   :  { %v3676_v33 = vsel %vm419_vm3, %v3666_v17, 0.0  ;;  %6248 = vmatprep.subr.bf16.mxu0 %v6247_v50 }
0x15f7   :  { %3677 = vadd.xlane.f32.xlu1 %v3676_v33  ;;  %v3673_v60 = vsel %vm419_vm3, %v3665_v47, 0.0  ;;  %6250 = vmatpush3.bf16.msra.mxu0 %v6247_v50 }
0x15f8   :  { %3674 = vadd.xlane.f32.xlu0 %v3673_v60 }
0x1680   :  { %v3672_v46 = vpop.xlane.xlu1 %3671 }
0x1681   :  { %v3680_v48 = vmul.f32 0.03125, %v3672_v46  ;;  %v3669_v55 = vpop.xlane.xlu0 %3668 }
0x1682   :  { %v3679_v26 = vmul.f32 0.03125, %v3669_v55 }
0x1683   :  { %v3684_v54 = vadd.f32 1e-05, %v3680_v48 }
0x1684   :  { %v3683_v49 = vadd.f32 1e-05, %v3679_v26  ;;  %v3678_v51 = vpop.xlane.xlu1 %3677 }
0x1685   :  { %6442 = vrsqrt.f32 %v3684_v54  ;;  %v3682_v52 = vmul.f32 0.03125, %v3678_v51  ;;  %v3675_v53 = vpop.xlane.xlu0 %3674 }
0x1686   :  { %6444 = vrsqrt.f32 %v3683_v49  ;;  %v3681_v56 = vmul.f32 0.03125, %v3675_v53 }
0x1687   :  { %v3686_v58 = vadd.f32 1e-05, %v3682_v52  ;;  %v5216_v52 = vld [vmem:[%s7586_s21 + $0x1] ss:$0 sm:$0xff] }
0x1688   :  { %v3685_v59 = vadd.f32 1e-05, %v3681_v56 }
0x1689   :  { %6446 = vrsqrt.f32 %v3686_v58 }
0x168a   :  { %6448 = vrsqrt.f32 %v3685_v59 }
0x168f   :  { %v6443_v61 = vpop.eup %6442 }
0x1690   :  { %v6445_v63 = vpop.eup %6444  ;;  %v3692_v0 = vmul.f32 %v6443_v61, %v3660_v27 }
0x1691   :  { %v3691_v1 = vmul.f32 %v6445_v63, %v3659_v28 }
0x1692   :  { %v3702_v6 = vmul.f32 %v5200_v62, %v3692_v0 }
0x1693   :  { %v6447_v7 = vpop.eup %6446  ;;  %v3701_v9 = vmul.f32 %v5200_v62, %v3691_v1 }
0x1694   :  { %v6449_v14 = vpop.eup %6448  ;;  %v3694_v19 = vmul.f32 %v6447_v7, %v3662_v32  ;;  %v3712_v24 = vadd.f32 %v5201_v2, %v3702_v6  ;;  %v5141_v32 = vld [vmem:[%s7583_s27 + $0x20] sm:$0xff] }
0x1695   :  { %v3711_v22 = vadd.f32 %v5201_v2, %v3701_v9  ;;  %v3693_v15 = vmul.f32 %v6449_v14, %v3661_v20  ;;  %v5210_v20 = vld [vmem:[%s7584_s16 + $0x1] ss:$0 sm:$0xff] }
0x1696   :  { %v3704_v29 = vmul.f32 %v5200_v62, %v3694_v19 }
0x1697   :  { %5891 = vmatprep.mubr.msk.f32.mxu1 %vm419_vm3, %v3711_v22  ;;  %v3703_v18 = vmul.f32 %v5200_v62, %v3693_v15 }
0x1698   :  { %5892 = vmatmul.mubr.msk.f32.vlgmr.msra.gmra.mrb[46].mxu1 %vm419_vm3, %v3712_v24  ;;  %v3714_v28 = vadd.f32 %v5201_v2, %v3704_v29 }
0x1699   :  { %6238 = vmatpush3.bf16.msra.mxu1 %v6235_v41  ;;  %v3713_v27 = vadd.f32 %v5201_v2, %v3703_v18 }
0x169a   :  { %6240 = vmatprep.subr.bf16.mxu1 %v6239_v12 }
0x169b   :  { %5894 = vmatprep.mubr.msk.f32.mxu1 %vm419_vm3, %v3713_v27 }
0x169c   :  { %5895 = vmatmul.mubr.msk.f32.gmra.mrb[48].mxu1 %vm419_vm3, %v3714_v28 }
0x169d   :  { %6242 = vmatpush3.bf16.msra.mxu1 %v6239_v12  ;;  %5905 = vmatprep.mubr.msk.f32.mxu1 %vm419_vm3, %v7330_v8  ;;  %v6251_v8 = vpack.c.bf16 %v5142_v13, %v5141_v32 }
0x169f   :  { %6252 = vmatprep.subr.bf16.mxu0 %v6251_v8 }
0x16a0   :  { %5906 = vmatmul.mubr.msk.f32.vlgmr.msra.gmra.mrb[46].mxu1 %vm419_vm3, %v7328_v5 }
0x16a1   :  { %5908 = vmatprep.mubr.msk.f32.mxu1 %vm419_vm3, %v7338_v21 }
0x16a4   :  { %5909 = vmatmul.mubr.msk.f32.gmra.mrb[48].mxu1 %vm419_vm3, %v7336_v3 }
0x16a5   :  { %5947 = vmatprep.mubr.msk.f32.mxu1 %vm419_vm3, %v7248_v36 }
0x1773   :  { %v5907_v5 = vpop.f32.mrb[46].mxu1 }
0x1774   :  { %v3904_v16 = vadd.f32 %v5907_v5, %v5210_v20  ;;  %v3878_v21 = vpop.f32.mrb[47].mxu1  ;;  %v5152_v5 = vld [vmem:[%s7588_s23 + $0x60] sm:$0xff] }
0x1775   :  { %v3903_v17 = vadd.f32 %v5210_v20, %v3878_v21  ;;  %v5154_v21 = vld [vmem:[%s7588_s23 + $0x70] sm:$0xff] }
0x1776   :  { %v3908_v33 = vmax.f32 %v3904_v16, 0.0  ;;  %v5153_v16 = vld [vmem:[%s7588_s23 + $0x68] sm:$0xff] }
0x1777   :  { %v3907_v3 = vmax.f32 %v3903_v17, 0.0  ;;  %v5910_v47 = vpop.f32.mrb[48].mxu1  ;;  %v6267_v17 = vpack.c.bf16 %v5153_v16, %v5152_v5  ;;  %v5164_v5 = vld [vmem:[%s7592_s24 + $0x30] sm:$0xff]  ;;  %v5165_v16 = vld [vmem:[%s7592_s24 + $0x38] sm:$0xff] }
0x1778   :  { %v3906_v36 = vadd.f32 %v5910_v47, %v5210_v20  ;;  %v3888_v60 = vpop.f32.mrb[49].mxu1 }
0x1779   :  { %v3905_v11 = vadd.f32 %v5210_v20, %v3888_v60  ;;  %5919 = vmatprep.mubr.msk.f32.mxu0 %vm419_vm3, %v3907_v3  ;;  %v5155_v3 = vld [vmem:[%s7588_s23 + $0x78] sm:$0xff] }
0x177a   :  { %5920 = vmatmul.mubr.msk.f32.vlgmr.msra.gmra.mrb[32].mxu0 %vm419_vm3, %v3908_v33  ;;  %v3910_v34 = vmax.f32 %v3906_v36, 0.0  ;;  %v6271_v47 = vpack.c.bf16 %v5155_v3, %v5154_v21  ;;  %v6295_v21 = vpack.c.bf16 %v5165_v16, %v5164_v5 }
0x177b   :  { %v3909_v23 = vmax.f32 %v3905_v11, 0.0  ;;  %6254 = vmatpush3.bf16.msra.mxu0 %v6251_v8 }
0x177c   :  { %6256 = vmatprep.subr.bf16.mxu0 %v6255_v37 }
0x177d   :  { %5922 = vmatprep.mubr.msk.f32.mxu0 %vm419_vm3, %v3909_v23 }
0x177e   :  { %5923 = vmatmul.mubr.msk.f32.gmra.mrb[34].mxu0 %vm419_vm3, %v3910_v34 }
0x177f   :  { %6258 = vmatpush3.bf16.msra.mxu0 %v6255_v37 }
0x1780   :  { %6268 = vmatprep.subr.bf16.mxu0 %v6267_v17 }
0x184d   :  { %v5921_v39 = vpop.f32.mrb[32].mxu0 }
0x184e   :  { %v4001_v41 = vadd.f32 %v5921_v39, %v5211_v38  ;;  %v3995_v42 = vpop.f32.mrb[33].mxu0 }
0x184f   :  { %v3996_v44 = vadd.f32 %v5211_v38, %v3995_v42 }
0x1850   :  { %v4015_v48 = vmax.f32 %v4001_v41, 0.0 }
0x1851   :  { %v4014_v45 = vmax.f32 %v3996_v44, 0.0  ;;  %v5924_v46 = vpop.f32.mrb[34].mxu0  ;;  %v5221_v44 = vld [vmem:[%s7589_s26 + $0x1] ss:$0 sm:$0xff] }
0x1852   :  { %v4011_v55 = vadd.f32 %v5924_v46, %v5211_v38  ;;  %v4005_v26 = vpop.f32.mrb[35].mxu0 }
0x1853   :  { %v4006_v54 = vadd.f32 %v5211_v38, %v4005_v26  ;;  %5933 = vmatprep.mubr.msk.f32.mxu0 %vm419_vm3, %v4014_v45 }
0x1854   :  { %5934 = vmatmul.mubr.msk.f32.vlgmr.msra.gmra.mrb[36].mxu0 %vm419_vm3, %v4015_v48  ;;  %v4017_v51 = vmax.f32 %v4011_v55, 0.0  ;;  %v5222_v48 = vld [vmem:[%s7590_s30 + $0x1] ss:$0 sm:$0xff] }
0x1855   :  { %v4016_v49 = vmax.f32 %v4006_v54, 0.0  ;;  %6270 = vmatpush3.bf16.msra.mxu0 %v6267_v17  ;;  %v5230_v17 = vld [vmem:[%s7594_s0 + $0x1] ss:$0 sm:$0xff] }
0x1856   :  { %6272 = vmatprep.subr.bf16.mxu0 %v6271_v47 }
0x1857   :  { %5936 = vmatprep.mubr.msk.f32.mxu0 %vm419_vm3, %v4016_v49 }
0x1858   :  { %5937 = vmatmul.mubr.msk.f32.gmra.mrb[38].mxu0 %vm419_vm3, %v4017_v51 }
0x1859   :  { %6274 = vmatpush3.bf16.msra.mxu0 %v6271_v47 }
0x1927   :  { %v5935_v53 = vpop.f32.mrb[36].mxu0 }
0x1928   :  { %v4108_v56 = vadd.f32 %v5935_v53, %v5216_v52  ;;  %v4102_v58 = vpop.f32.mrb[37].mxu0 }
0x1929   :  { %v4103_v59 = vadd.f32 %v5216_v52, %v4102_v58 }
0x192a   :  { %v4124_v61 = vsel %vm419_vm3, %v4108_v56, 0.0 }
0x192b   :  { %4125 = vadd.xlane.f32.xlu1 %v4124_v61  ;;  %v5938_v62 = vpop.f32.mrb[38].mxu0  ;;  %v4121_v63 = vsel %vm419_vm3, %v4103_v59, 0.0 }
0x192c   :  { %v4118_v0 = vadd.f32 %v5938_v62, %v5216_v52  ;;  %4122 = vadd.xlane.f32.xlu0 %v4121_v63  ;;  %v4112_v1 = vpop.f32.mrb[39].mxu0 }
0x192d   :  { %v4113_v2 = vadd.f32 %v5216_v52, %v4112_v1 }
0x192e   :  { %v4130_v6 = vsel %vm419_vm3, %v4118_v0, 0.0 }
0x192f   :  { %4131 = vadd.xlane.f32.xlu1 %v4130_v6  ;;  %v4127_v7 = vsel %vm419_vm3, %v4113_v2, 0.0  ;;  %v5149_v6 = vld [vmem:[%s7588_s23 + $0x48] sm:$0xff] }
0x1930   :  { %4128 = vadd.xlane.f32.xlu0 %v4127_v7 }
0x19b8   :  { %v4126_v9 = vpop.xlane.xlu1 %4125 }
0x19b9   :  { %v4134_v4 = vmul.f32 0.03125, %v4126_v9  ;;  %v4123_v10 = vpop.xlane.xlu0 %4122  ;;  %v5157_v9 = vld [vmem:[%s7591_s28 + $0x20] sm:$0xff] }
0x19ba   :  { %v4133_v14 = vmul.f32 0.03125, %v4123_v10 }
0x19bb   :  { %v4138_v19 = vsub.f32 %v4108_v56, %v4134_v4  ;;  %v5158_v4 = vld [vmem:[%s7591_s28 + $0x28] sm:$0xff] }
0x19bc   :  { %v4137_v22 = vsub.f32 %v4103_v59, %v4133_v14  ;;  %v4132_v15 = vpop.xlane.xlu1 %4131  ;;  %v6283_v10 = vpack.c.bf16 %v5158_v4, %v5157_v9  ;;  %v5150_v14 = vld [vmem:[%s7588_s23 + $0x50] sm:$0xff] }
0x19bd   :  { %v4136_v24 = vmul.f32 0.03125, %v4132_v15  ;;  %v4129_v29 = vpop.xlane.xlu0 %4128  ;;  %v4142_v12 = vmul.f32 %v4138_v19, %v4138_v19 }
0x19be   :  { %v4135_v18 = vmul.f32 0.03125, %v4129_v29  ;;  %v4141_v27 = vmul.f32 %v4137_v22, %v4137_v22  ;;  %v5160_v29 = vld [vmem:[%s7591_s28 + $0x38] sm:$0xff] }
0x19bf   :  { %v4140_v28 = vsub.f32 %v4118_v0, %v4136_v24  ;;  %v4148_v30 = vsel %vm419_vm3, %v4142_v12, 0.0 }
0x19c0   :  { %v4139_v31 = vsub.f32 %v4113_v2, %v4135_v18  ;;  %4149 = vadd.xlane.f32.xlu1 %v4148_v30  ;;  %v4145_v50 = vsel %vm419_vm3, %v4141_v27, 0.0  ;;  %v5148_v2 = vld [vmem:[%s7588_s23 + $0x40] sm:$0xff]  ;;  %v5163_v27 = vld [vmem:[%s7592_s24 + $0x28] sm:$0xff] }
0x19c1   :  { %4146 = vadd.xlane.f32.xlu0 %v4145_v50  ;;  %v4144_v32 = vmul.f32 %v4140_v28, %v4140_v28  ;;  %v6275_v7 = vpack.c.bf16 %v5149_v6, %v5148_v2  ;;  %v5162_v18 = vld [vmem:[%s7592_s24 + $0x20] sm:$0xff] }
0x19c2   :  { %v4143_v13 = vmul.f32 %v4139_v31, %v4139_v31  ;;  %v5229_v30 = vld [vmem:[%s7593_s1 + $0x1] ss:$0 sm:$0xff] }
0x19c3   :  { %v4154_v8 = vsel %vm419_vm3, %v4144_v32, 0.0  ;;  %6276 = vmatprep.subr.bf16.mxu0 %v6275_v7 }
0x19c4   :  { %4155 = vadd.xlane.f32.xlu1 %v4154_v8  ;;  %v4151_v20 = vsel %vm419_vm3, %v4143_v13, 0.0 }
0x19c5   :  { %4152 = vadd.xlane.f32.xlu0 %v4151_v20 }
0x1a4d   :  { %v4150_v33 = vpop.xlane.xlu1 %4149 }
0x1a4e   :  { %v4158_v36 = vmul.f32 0.03125, %v4150_v33  ;;  %v4147_v60 = vpop.xlane.xlu0 %4146 }
0x1a4f   :  { %v4157_v11 = vmul.f32 0.03125, %v4147_v60 }
0x1a50   :  { %v4162_v23 = vadd.f32 1e-05, %v4158_v36 }
0x1a51   :  { %v4161_v34 = vadd.f32 1e-05, %v4157_v11  ;;  %v4156_v35 = vpop.xlane.xlu1 %4155 }
0x1a52   :  { %6450 = vrsqrt.f32 %v4162_v23  ;;  %v4160_v57 = vmul.f32 0.03125, %v4156_v35  ;;  %v4153_v37 = vpop.xlane.xlu0 %4152  ;;  %v5233_v23 = vld [vmem:[%s7595_s5 + $0x1] ss:$0 sm:$0xff] }
0x1a53   :  { %6452 = vrsqrt.f32 %v4161_v34  ;;  %v4159_v38 = vmul.f32 0.03125, %v4153_v37 }
0x1a54   :  { %v4164_v39 = vadd.f32 1e-05, %v4160_v57 }
0x1a55   :  { %v4163_v41 = vadd.f32 1e-05, %v4159_v38 }
0x1a56   :  { %6454 = vrsqrt.f32 %v4164_v39 }
0x1a57   :  { %6456 = vrsqrt.f32 %v4163_v41 }
0x1a5c   :  { %v6451_v42 = vpop.eup %6450 }
0x1a5d   :  { %v6453_v45 = vpop.eup %6452  ;;  %v4170_v46 = vmul.f32 %v6451_v42, %v4138_v19  ;;  %v5151_v19 = vld [vmem:[%s7588_s23 + $0x58] sm:$0xff] }
0x1a5e   :  { %v4169_v55 = vmul.f32 %v6453_v45, %v4137_v22  ;;  %v6279_v24 = vpack.c.bf16 %v5151_v19, %v5150_v14 }
0x1a5f   :  { %v4180_v26 = vmul.f32 %v5221_v44, %v4170_v46 }
0x1a60   :  { %v6455_v54 = vpop.eup %6454  ;;  %v4179_v49 = vmul.f32 %v5221_v44, %v4169_v55 }
0x1a61   :  { %v6457_v51 = vpop.eup %6456  ;;  %v4190_v52 = vadd.f32 %v5222_v48, %v4180_v26  ;;  %v4172_v53 = vmul.f32 %v6455_v54, %v4140_v28  ;;  %v6291_v28 = vpack.c.bf16 %v5163_v27, %v5162_v18 }
0x1a62   :  { %v4189_v56 = vadd.f32 %v5222_v48, %v4179_v49  ;;  %v4171_v58 = vmul.f32 %v6457_v51, %v4139_v31  ;;  %v4660_v51 = vld [vmem:[%s7598_s29] sm:$0xff] }
0x1a63   :  { %v4182_v59 = vmul.f32 %v5221_v44, %v4172_v53 }
0x1a64   :  { %v6259_v61 = vpack.c.bf16 %v4190_v52, %v4189_v56  ;;  %v4181_v62 = vmul.f32 %v5221_v44, %v4171_v58  ;;  %v4661_v52 = vld [vmem:[%s7598_s29 + $0x8] sm:$0xff]  ;;  %v4662_v56 = vld [vmem:[%s7598_s29 + $0x10] sm:$0xff]  ;;  %v4663_v58 = vld [vmem:[%s7598_s29 + $0x18] sm:$0xff] }
0x1a65   :  { %v4192_v63 = vadd.f32 %v5222_v48, %v4182_v59  ;;  %v6299_v53 = vpack.c.bf16 %v4661_v52, %v4660_v51  ;;  %v6303_v59 = vpack.c.bf16 %v4663_v58, %v4662_v56 }
0x1a66   :  { %6260 = vmatprep.subr.bf16.mxu1 %v6259_v61  ;;  %v4191_v0 = vadd.f32 %v5222_v48, %v4181_v62  ;;  %v4666_v62 = vld [vmem:[%s7599_s3 + $0x8] sm:$0xff] }
0x1a67   :  { %6262 = vmatpush3.bf16.msra.mxu1 %v6259_v61  ;;  %v4665_v61 = vld [vmem:[%s7599_s3] sm:$0xff] }
0x1a68   :  { %v6263_v1 = vpack.c.bf16 %v4192_v63, %v4191_v0  ;;  %v6307_v63 = vpack.c.bf16 %v4666_v62, %v4665_v61 }
0x1a6a   :  { %6264 = vmatprep.subr.bf16.mxu1 %v6263_v1 }
0x1a6b   :  { %6266 = vmatpush3.bf16.msra.mxu1 %v6263_v1 }
0x1a6c   :  { %6284 = vmatprep.subr.bf16.mxu1 %v6283_v10 }
0x1a6e   :  { %5948 = vmatmul.mubr.msk.f32.vlgmr.msra.gmra.mrb[50].mxu1 %vm419_vm3, %v7259_v25  ;;  %v5159_v25 = vld [vmem:[%s7591_s28 + $0x30] sm:$0xff] }
0x1a6f   :  { %6286 = vmatpush3.bf16.msra.mxu1 %v6283_v10  ;;  %v6287_v12 = vpack.c.bf16 %v5160_v29, %v5159_v25  ;;  %v5236_v10 = vld [vmem:[%s7596_s9 + $0x1] ss:$0 sm:$0xff] }
0x1a71   :  { %6288 = vmatprep.subr.bf16.mxu1 %v6287_v12 }
0x1a73   :  { %6290 = vmatpush3.bf16.msra.mxu1 %v6287_v12 }
0x1a74   :  { %6292 = vmatprep.subr.bf16.mxu1 %v6291_v28 }
0x1b41   :  { %v5949_v22 = vpop.f32.mrb[50].mxu1 }
0x1b42   :  { %v4259_v15 = vpop.f32.mrb[51].mxu1 }
0x1b43   :  { %5958 = vmatprep.mubr.msk.f32.mxu0 %vm419_vm3, %v4259_v15  ;;  %v5237_v15 = vld [vmem:[%s7597_s25 + $0x1] ss:$0 sm:$0xff] }
0x1b44   :  { %5959 = vmatmul.mubr.msk.f32.vlgmr.msra.gmra.mrb[40].mxu0 %vm419_vm3, %v5949_v22 }
0x1b45   :  { %6278 = vmatpush3.bf16.msra.mxu0 %v6275_v7  ;;  %5969 = vmatprep.mubr.msk.f32.mxu0 %vm419_vm3, %v7304_v43 }
0x1b46   :  { %6280 = vmatprep.subr.bf16.mxu0 %v6279_v24 }
0x1b49   :  { %6282 = vmatpush3.bf16.msra.mxu0 %v6279_v24 }
0x1b4a   :  { %6300 = vmatprep.subr.bf16.mxu0 %v6299_v53 }
0x1b4c   :  { %5970 = vmatmul.mubr.msk.f32.vlgmr.msra.gmra.mrb[40].mxu0 %vm419_vm3, %v7299_v40 }
0x1b4d   :  { %6302 = vmatpush3.bf16.msra.mxu0 %v6299_v53 }
0x1b4e   :  { %6304 = vmatprep.subr.bf16.mxu0 %v6303_v59 }
0x1b51   :  { %6306 = vmatpush3.bf16.msra.mxu0 %v6303_v59 }
0x1c1f   :  { %v5971_v31 = vpop.f32.mrb[40].mxu0 }
0x1c20   :  { %v4437_v50 = vadd.f32 %v5971_v31, %v5229_v30  ;;  %v4421_v32 = vpop.f32.mrb[41].mxu0 }
0x1c21   :  { %v4436_v13 = vadd.f32 %v5229_v30, %v4421_v32  ;;  %v4668_v30 = vld [vmem:[%s7599_s3 + $0x18] sm:$0xff]  ;;  %v4671_v32 = vld [vmem:[%s6967_s13 + $0x8] sm:$0xff] }
0x1c22   :  { %v4439_v20 = vmax.f32 %v4437_v50, 0.0  ;;  %v4670_v50 = vld [vmem:[%s6967_s13] sm:$0xff] }
0x1c23   :  { %v4438_v8 = vmax.f32 %v4436_v13, 0.0  ;;  %v6315_v13 = vpack.c.bf16 %v4671_v32, %v4670_v50 }
0x1c25   :  { %5980 = vmatprep.mubr.msk.f32.mxu1 %vm419_vm3, %v4438_v8  ;;  %6316 = vmatprep.subr.bf16.mxu0 %v6315_v13  ;;  %v5238_v8 = vld [vmem:[#allocation10] ss:$0 sm:$0xff] }
0x1c26   :  { %5981 = vmatmul.mubr.msk.f32.vlgmr.msra.gmra.mrb[52].mxu1 %vm419_vm3, %v4439_v20 }
0x1c27   :  { %6294 = vmatpush3.bf16.msra.mxu1 %v6291_v28  ;;  %v4667_v28 = vld [vmem:[%s7599_s3 + $0x10] sm:$0xff] }
0x1c28   :  { %6296 = vmatprep.subr.bf16.mxu1 %v6295_v21  ;;  %v6311_v31 = vpack.c.bf16 %v4668_v30, %v4667_v28 }
0x1c2b   :  { %6298 = vmatpush3.bf16.msra.mxu1 %v6295_v21 }
0x1c2c   :  { %6308 = vmatprep.subr.bf16.mxu1 %v6307_v63 }
0x1cf9   :  { %v5982_v3 = vpop.f32.mrb[52].mxu1 }
0x1cfa   :  { %v4524_v47 = vadd.f32 %v5982_v3, %v5230_v17  ;;  %v4518_v33 = vpop.f32.mrb[53].mxu1  ;;  %v4673_v3 = vld [vmem:[%s6967_s13 + $0x18] sm:$0xff] }
0x1cfb   :  { %v4519_v36 = vadd.f32 %v5230_v17, %v4518_v33  ;;  %v4672_v17 = vld [vmem:[%s6967_s13 + $0x10] sm:$0xff]  ;;  %v5241_v33 = vld [vmem:[#allocation12] ss:$0 sm:$0xff] }
0x1cfc   :  { %v4528_v11 = vmax.f32 %v4524_v47, 0.0  ;;  %v6319_v47 = vpack.c.bf16 %v4673_v3, %v4672_v17 }
0x1cfd   :  { %v4527_v60 = vmax.f32 %v4519_v36, 0.0 }
0x1cff   :  { %5991 = vmatprep.mubr.msk.f32.mxu1 %vm419_vm3, %v4527_v60 }
0x1d00   :  { %5992 = vmatmul.mubr.msk.f32.vlgmr.msra.gmra.mrb[54].mxu1 %vm419_vm3, %v4528_v11 }
0x1d01   :  { %6310 = vmatpush3.bf16.msra.mxu1 %v6307_v63 }
0x1d02   :  { %6312 = vmatprep.subr.bf16.mxu1 %v6311_v31 }
0x1d05   :  { %6314 = vmatpush3.bf16.msra.mxu1 %v6311_v31 }
0x1dd3   :  { %v5993_v34 = vpop.f32.mrb[54].mxu1 }
0x1dd4   :  { %v4613_v35 = vadd.f32 %v5993_v34, %v5233_v23  ;;  %v4607_v57 = vpop.f32.mrb[55].mxu1 }
0x1dd5   :  { %v4608_v37 = vadd.f32 %v5233_v23, %v4607_v57  ;;  %v5244_v57 = vld [vmem:[#allocation13] ss:$0 sm:$0xff] }
0x1dd6   :  { %v4619_v38 = vsel %vm419_vm3, %v4613_v35, 0.0 }
0x1dd7   :  { %4620 = vadd.xlane.f32.xlu1 %v4619_v38  ;;  %v4616_v39 = vsel %vm419_vm3, %v4608_v37, 0.0 }
0x1dd8   :  { %4617 = vadd.xlane.f32.xlu0 %v4616_v39 }
0x1e64   :  { %v4621_v41 = vpop.xlane.xlu1 %4620 }
0x1e65   :  { %v4623_v42 = vmul.f32 0.03125, %v4621_v41  ;;  %v4618_v44 = vpop.xlane.xlu0 %4617 }
0x1e66   :  { %v4622_v45 = vmul.f32 0.03125, %v4618_v44 }
0x1e67   :  { %v4625_v46 = vsub.f32 %v4613_v35, %v4623_v42 }
0x1e68   :  { %v4624_v48 = vsub.f32 %v4608_v37, %v4622_v45 }
0x1e69   :  { %v4627_v55 = vmul.f32 %v4625_v46, %v4625_v46 }
0x1e6a   :  { %v4626_v26 = vmul.f32 %v4624_v48, %v4624_v48 }
0x1e6b   :  { %v4631_v54 = vsel %vm419_vm3, %v4627_v55, 0.0 }
0x1e6c   :  { %4632 = vadd.xlane.f32.xlu1 %v4631_v54  ;;  %v4628_v49 = vsel %vm419_vm3, %v4626_v26, 0.0 }
0x1e6d   :  { %4629 = vadd.xlane.f32.xlu0 %v4628_v49 }
0x1ef9   :  { %v4633_v0 = vpop.xlane.xlu1 %4632 }
0x1efa   :  { %v4635_v1 = vmul.f32 0.03125, %v4633_v0  ;;  %v4630_v2 = vpop.xlane.xlu0 %4629 }
0x1efb   :  { %v4634_v6 = vmul.f32 0.03125, %v4630_v2 }
0x1efc   :  { %v4637_v7 = vadd.f32 1e-05, %v4635_v1 }
0x1efd   :  { %v4636_v9 = vadd.f32 1e-05, %v4634_v6 }
0x1efe   :  { %6458 = vrsqrt.f32 %v4637_v7 }
0x1eff   :  { %6460 = vrsqrt.f32 %v4636_v9 }
0x1f08   :  { %v6459_v4 = vpop.eup %6458 }
0x1f09   :  { %v6461_v14 = vpop.eup %6460  ;;  %v4641_v19 = vmul.f32 %v6459_v4, %v4625_v46 }
0x1f0a   :  { %v4640_v22 = vmul.f32 %v6461_v14, %v4624_v48 }
0x1f0b   :  { %v4649_v24 = vmul.f32 %v5236_v10, %v4641_v19 }
0x1f0c   :  { %v4648_v25 = vmul.f32 %v5236_v10, %v4640_v22 }
0x1f0d   :  { %v4657_v29 = vadd.f32 %v5237_v15, %v4649_v24 }
0x1f0e   :  { %v4656_v12 = vadd.f32 %v5237_v15, %v4648_v25 }
0x1f0f   :  { %v4659_v27 = vadd.f32 %v4657_v29, %v7299_v40 }
0x1f10   :  { %v4658_v18 = vadd.f32 %v4656_v12, %v7304_v43 }
0x1f12   :  { %6002 = vmatprep.mubr.msk.f32.mxu0 %vm419_vm3, %v4658_v18 }
0x1f13   :  { %6003 = vmatmul.mubr.msk.f32.vlgmr.msra.gmra.mrb[42].mxu0 %vm419_vm3, %v4659_v27 }
0x1f14   :  { %6318 = vmatpush3.bf16.msra.mxu0 %v6315_v13 }
0x1f15   :  { %6320 = vmatprep.subr.bf16.mxu0 %v6319_v47 }
0x1f18   :  { %6322 = vmatpush3.bf16.msra.mxu0 %v6319_v47 }
0x1fe6   :  { %v6004_v43 = vpop.f32.mrb[42].mxu0 }
0x1fe7   :  { %v4759_v20 = vadd.f32 %v6004_v43, %v5238_v8  ;;  %v4753_v40 = vpop.f32.mrb[43].mxu0 }
0x1fe8   :  { %v4754_v5 = vadd.f32 %v5238_v8, %v4753_v40 }
0x1fe9   :  { %v4763_v21 = vmax.f32 %v4759_v20, 0.0 }
0x1fea   :  { %v4762_v16 = vmax.f32 %v4754_v5, 0.0 }
0x1fec   :  { %6013 = vmatprep.mubr.msk.f32.mxu1 %vm419_vm3, %v4762_v16 }
0x1fed   :  { %6014 = vmatmul.mubr.msk.f32.vlgmr.msra.gmra.mrb[56].mxu1 %vm419_vm3, %v4763_v21 }
0x20c0   :  { %v6015_v36 = vpop.f32.mrb[56].mxu1 }
0x20c1   :  { %v4848_v60 = vadd.f32 %v6015_v36, %v5241_v33  ;;  %v4842_v11 = vpop.f32.mrb[57].mxu1 }
0x20c2   :  { %v4843_v23 = vadd.f32 %v5241_v33, %v4842_v11 }
0x20c3   :  { %v4852_v35 = vmax.f32 %v4848_v60, 0.0 }
0x20c4   :  { %v4851_v34 = vmax.f32 %v4843_v23, 0.0 }
0x20c6   :  { %6024 = vmatprep.mubr.msk.f32.mxu0 %vm419_vm3, %v4851_v34 }
0x20c7   :  { %6025 = vmatmul.mubr.msk.f32.vlgmr.msra.gmra.mrb[44].mxu0 %vm419_vm3, %v4852_v35 }
0x219a   :  { %v6026_v37 = vpop.f32.mrb[44].mxu0 }
0x219b   :  { %v4937_v38 = vadd.f32 %v6026_v37, %v5244_v57  ;;  %v4931_v39 = vpop.f32.mrb[45].mxu0 }
0x219c   :  { %v4932_v41 = vadd.f32 %v5244_v57, %v4931_v39 }
0x219d   :  { %4942 = vst.msk [vmem:[%s6977_s19 + $0x8] sm:$0xff] %vm4940_vm6, %v4937_v38 }
0x219e   :  { %4941 = vst.msk [vmem:[%s6977_s19] sm:$0xff] %vm4940_vm6, %v4932_v41 }
0x219f   :  { %4947 = vsyncpa [#allocation3], 1 }
0x21a0   :  { %4948 = vsyncpa [#allocation5], 1 }
0x21a1   :  { %4949 = vsyncpa [#allocation8], 1 }
0x21a2   :  { %4950 = vsyncpa [#allocation11], 1 }
0x21a3   :  { %4951 = vsyncpa [#allocation14], 1 }

</bundles_post_ra>
